<compile_context>
chip_gen: v6e
topology: v6e:2x2x1
jax: 0.10.0
libtpu: 0.0.40
codegen_flags: <defaults>
</compile_context>

<pallas_src>
import functools

import jax
import jax.numpy as jnp
from jax.experimental import pallas as pl
from jax.experimental.pallas import tpu as pltpu

F32 = jnp.float32
LANE = 128


def _round_up(v, m):
    return ((v + m - 1) // m) * m


def _pad2(a, rows, cols):
    a = a.astype(F32)
    return jnp.pad(a, ((0, rows - a.shape[0]), (0, cols - a.shape[1])))


def _full_spec(shape):
    nd = len(shape)
    return pl.BlockSpec(tuple(shape), lambda *_: (0,) * nd)


# -----------------------------------------------------------------------------
# Fused forward kernel: encoders -> L SymGatedGCN layers -> ScorePredictor
# -----------------------------------------------------------------------------

def _fused_forward_kernel(
        src_ref, dst_ref,                      # [Ep, 1] int32 (-1 on padded rows)
        x_ref, ein_ref,                        # [Np, Fnp], [Ep, Fep] f32
        nw1_ref, nb1_ref, nw2_ref, nb2_ref,    # node encoder
        ew1_ref, eb1_ref, ew2_ref, eb2_ref,    # edge encoder
        gwh_ref, gbh_ref,                      # [L, Hp, 5Hp], [L, 1, 5Hp]  (A1|A2|B1|A3|B2)
        gwe_ref, gbe_ref,                      # [L, Hp, Hp],  [L, 1, Hp]   (B3)
        pw1_ref, pb1_ref, pw2_ref, pb2_ref,    # predictor
        out_ref,                               # [Ep, Op] f32
        *, num_layers, hp):

    def mm(a, b):
        return jnp.dot(a, b, preferred_element_type=F32)

    def lin(v, w, b):
        return mm(v, w) + b

    # ---- node / edge encoder MLPs: linear -> relu -> linear -----------------
    h = lin(jnp.maximum(lin(x_ref[...], nw1_ref[...], nb1_ref[...]), 0.0),
            nw2_ref[...], nb2_ref[...])                          # [Np, Hp]
    e = lin(jnp.maximum(lin(ein_ref[...], ew1_ref[...], eb1_ref[...]), 0.0),
            ew2_ref[...], eb2_ref[...])                          # [Ep, Hp]

    ep_rows = ein_ref.shape[0]
    np_rows = x_ref.shape[0]

    # 0/1 gather masks built in-kernel (VPU compare beats DMA-ing one-hots).
    # Padded edges carry index -1 -> entire mask row is zero -> inert.
    node_iota = jax.lax.broadcasted_iota(jnp.int32, (ep_rows, np_rows), 1)
    msrc = (node_iota == src_ref[...]).astype(F32)               # [Ep, Np]
    mdst = (node_iota == dst_ref[...]).astype(F32)               # [Ep, Np]

    # Scatter (segment-sum over edges) = contract the edge axis of the mask.
    scatter_dims = (((0,), (0,)), ((), ()))

    # ---- SymGatedGCN layers (residual=True, no batch-norm / dropout) --------
    def layer_body(l, carry):
        h, e = carry
        # One wide h-projection: columns [A1 | A2 | B1 | A3 | B2].
        proj = mm(h, gwh_ref[l]) + gbh_ref[l]                    # [Np, 5Hp]
        A1h = proj[:, :hp]
        B3e = mm(e, gwe_ref[l]) + gbe_ref[l]                     # [Ep, Hp]

        # Gather src/dst node rows onto edges (one mask matmul per side,
        # RHS lane-concatenated so each MXU pass serves two projections).
        g_src = mm(msrc, proj[:, hp:3 * hp])                     # [Ep, 2Hp] = [A2_src | B1_src]
        g_dst = mm(mdst, proj[:, 3 * hp:5 * hp])                 # [Ep, 2Hp] = [A3_dst | B2_dst]
        A2h_src, B1h_src = g_src[:, :hp], g_src[:, hp:]
        A3h_dst, B2h_dst = g_dst[:, :hp], g_dst[:, hp:]

        # Edge update:  e <- e + relu(B1 h_src + B2 h_dst + B3 e)
        e = e + jnp.maximum(B1h_src + B2h_dst + B3e, 0.0)
        sigma = jax.nn.sigmoid(e)

        # Gated-mean aggregation, forward (src->dst) and reversed (dst->src).
        # num and den share one scatter matmul each via lane concat.
        s_fwd = jax.lax.dot_general(
            mdst, jnp.concatenate([sigma * A2h_src, sigma], axis=1),
            scatter_dims, preferred_element_type=F32)            # [Np, 2Hp]
        s_bwd = jax.lax.dot_general(
            msrc, jnp.concatenate([sigma * A3h_dst, sigma], axis=1),
            scatter_dims, preferred_element_type=F32)            # [Np, 2Hp]
        h_fwd = s_fwd[:, :hp] / (s_fwd[:, hp:] + 1e-6)
        h_bwd = s_bwd[:, :hp] / (s_bwd[:, hp:] + 1e-6)

        # Node update:  h <- h + relu(A1 h + h_fwd + h_bwd)
        h = h + jnp.maximum(A1h + h_fwd + h_bwd, 0.0)
        return h, e

    h, e = jax.lax.fori_loop(0, num_layers, layer_body, (h, e))

    # ---- ScorePredictor: MLP over cat(h_src, h_dst, e) per edge -------------
    hs = mm(msrc, h)
    hd = mm(mdst, h)
    z = jnp.concatenate([hs, hd, e], axis=1)                     # [Ep, 3Hp]
    z = jnp.maximum(mm(z, pw1_ref[...]) + pb1_ref[...], 0.0)
    out_ref[...] = mm(z, pw2_ref[...]) + pb2_ref[...]


# -----------------------------------------------------------------------------
# Wrapper: pad/stack params, build padded index vectors, one pallas_call
# -----------------------------------------------------------------------------

def _pack_params(params):
    """Pad lane dims to multiples of 128 and stack/pack the per-layer weights."""
    w1n, b1n, w2n, b2n = params["node_enc"]
    w1e, b1e, w2e, b2e = params["edge_enc"]
    f_node, d_mid = w1n.shape
    f_edge = w1e.shape[0]
    hidden = w2n.shape[1]
    d_score = params["pred"]["W1w"].shape[1]

    Fnp, Fep = _round_up(f_node, LANE), _round_up(f_edge, LANE)
    Mp, Hp = _round_up(d_mid, LANE), _round_up(hidden, LANE)
    Sp, Op = _round_up(d_score, LANE), LANE

    node_enc = (_pad2(w1n, Fnp, Mp), _pad2(b1n, 1, Mp),
                _pad2(w2n, Mp, Hp), _pad2(b2n, 1, Hp))
    edge_enc = (_pad2(w1e, Fep, Mp), _pad2(b1e, 1, Mp),
                _pad2(w2e, Mp, Hp), _pad2(b2e, 1, Hp))

    # Per-layer h-projections packed wide: columns [A1 | A2 | B1 | A3 | B2].
    order = ("A1", "A2", "B1", "A3", "B2")
    gwh, gbh, gwe, gbe = [], [], [], []
    for lp in params["gnn"]:
        gwh.append(jnp.concatenate([_pad2(lp[n + "w"], Hp, Hp) for n in order], axis=1))
        gbh.append(jnp.concatenate([_pad2(lp[n + "b"], 1, Hp) for n in order], axis=1))
        gwe.append(_pad2(lp["B3w"], Hp, Hp))
        gbe.append(_pad2(lp["B3b"], 1, Hp))
    gwh, gbh = jnp.stack(gwh), jnp.stack(gbh)
    gwe, gbe = jnp.stack(gwe), jnp.stack(gbe)

    # Predictor W1 [3H, S]: pad each H-row block to Hp so the padded-space
    # concat([h_src, h_dst, e]) lines up; still one packed array.
    H = hidden
    W1 = params["pred"]["W1w"]
    pw1 = jnp.concatenate(
        [_pad2(W1[i * H:(i + 1) * H], Hp, Sp) for i in range(3)], axis=0)
    pred = (pw1, _pad2(params["pred"]["W1b"], 1, Sp),
            _pad2(params["pred"]["W2w"], Sp, Op),
            _pad2(params["pred"]["W2b"], 1, Op))

    dims = dict(Fnp=Fnp, Fep=Fep, Hp=Hp, Op=Op)
    return node_enc, edge_enc, (gwh, gbh, gwe, gbe), pred, dims


@jax.jit
def model_forward(params, x, e, src, dst):
    N = x.shape[0]
    E = e.shape[0]
    num_layers = len(params["gnn"])

    node_enc, edge_enc, gnn_w, pred, dims = _pack_params(params)
    Np, Ep = _round_up(N, LANE), _round_up(E, LANE)
    Hp = dims["Hp"]

    xp = _pad2(x, Np, dims["Fnp"])
    epad = _pad2(e, Ep, dims["Fep"])
    # Edge endpoint indices as tiny int32 columns; padded rows get -1 so they
    # never match any (real or padded) node in the in-kernel mask compare.
    src_p = jnp.full((Ep, 1), -1, jnp.int32).at[:E, 0].set(src.astype(jnp.int32))
    dst_p = jnp.full((Ep, 1), -1, jnp.int32).at[:E, 0].set(dst.astype(jnp.int32))

    operands = (src_p, dst_p, xp, epad, *node_enc, *edge_enc, *gnn_w, *pred)

    out = pl.pallas_call(
        functools.partial(_fused_forward_kernel, num_layers=num_layers, hp=Hp),
        out_shape=jax.ShapeDtypeStruct((Ep, dims["Op"]), F32),
        grid=(1,),
        in_specs=[_full_spec(a.shape) for a in operands],
        out_specs=_full_spec((Ep, dims["Op"])),
        compiler_params=pltpu.CompilerParams(
            dimension_semantics=("arbitrary",)),
    )(*operands)
    return out[:E, :1]


# -----------------------------------------------------------------------------
# Pure-JAX reference (same math, f32) for correctness
# -----------------------------------------------------------------------------

def reference_forward(params, x, e, src, dst):
    N = x.shape[0]
    ssrc = jax.nn.one_hot(src, N, dtype=F32)
    sdst = jax.nn.one_hot(dst, N, dtype=F32)

    def lin(v, w, b):
        return jnp.dot(v, w) + b

    def mlp(v, p):
        w1, b1, w2, b2 = p
        return lin(jnp.maximum(lin(v, w1, b1), 0.0), w2, b2)

    h = mlp(x, params["node_enc"])
    ee = mlp(e, params["edge_enc"])
    for p in params["gnn"]:
        A1h = lin(h, p["A1w"], p["A1b"])
        A2h = lin(h, p["A2w"], p["A2b"])
        A3h = lin(h, p["A3w"], p["A3b"])
        B1h = lin(h, p["B1w"], p["B1b"])
        B2h = lin(h, p["B2w"], p["B2b"])
        B3e = lin(ee, p["B3w"], p["B3b"])
        e_hat = ssrc @ B1h + sdst @ B2h + B3e
        ee = ee + jnp.maximum(e_hat, 0.0)
        sigma = jax.nn.sigmoid(ee)
        A2h_src = ssrc @ A2h
        A3h_dst = sdst @ A3h
        h_fwd = (sdst.T @ (sigma * A2h_src)) / (sdst.T @ sigma + 1e-6)
        h_bwd = (ssrc.T @ (sigma * A3h_dst)) / (ssrc.T @ sigma + 1e-6)
        h = h + jnp.maximum(A1h + h_fwd + h_bwd, 0.0)
    pp = params["pred"]
    z = jnp.concatenate([ssrc @ h, sdst @ h, ee], axis=1)
    z = jnp.maximum(z @ pp["W1w"] + pp["W1b"], 0.0)
    return z @ pp["W2w"] + pp["W2b"]


# -----------------------------------------------------------------------------
# Deterministic parameter init (PyTorch nn.Linear-style uniform bounds)
# -----------------------------------------------------------------------------

def init_linear(key, fan_in, fan_out):
    k1, k2 = jax.random.split(key)
    bound = 1.0 / jnp.sqrt(jnp.float32(fan_in))
    w = jax.random.uniform(k1, (fan_in, fan_out), F32, -bound, bound)
    b = jax.random.uniform(k2, (1, fan_out), F32, -bound, bound)
    return w, b


def init_params(key, f_node, f_edge, d_mid, hidden, num_layers, d_score):
    keys = iter(jax.random.split(key, 6 * num_layers + 8))
    w1n, b1n = init_linear(next(keys), f_node, d_mid)
    w2n, b2n = init_linear(next(keys), d_mid, hidden)
    w1e, b1e = init_linear(next(keys), f_edge, d_mid)
    w2e, b2e = init_linear(next(keys), d_mid, hidden)
    gnn = []
    for _ in range(num_layers):
        layer = {}
        for name in ("A1", "A2", "A3", "B1", "B2", "B3"):
            w, b = init_linear(next(keys), hidden, hidden)
            layer[name + "w"] = w
            layer[name + "b"] = b
        gnn.append(layer)
    W1w, W1b = init_linear(next(keys), 3 * hidden, d_score)
    W2w, W2b = init_linear(next(keys), d_score, 1)
    return {
        "node_enc": (w1n, b1n, w2n, b2n),
        "edge_enc": (w1e, b1e, w2e, b2e),
        "gnn": gnn,
        "pred": {"W1w": W1w, "W1b": W1b, "W2w": W2w, "W2b": W2b},
    }


# -----------------------------------------------------------------------------

if __name__ == "__main__":
    key = jax.random.PRNGKey(0)
    k_param, k_x, k_e, k_src, k_dst = jax.random.split(key, 5)

    # Small shapes consistent with the module
    N, E = 16, 32                       # nodes, edges
    F_NODE, F_EDGE = 4, 4               # num_node_features / num_edge_features
    D_MID, HIDDEN = 16, 32              # intermediate / hidden features
    NUM_LAYERS, D_SCORE = 2, 16         # num_layers / num_hidden_edge_scores

    params = init_params(k_param, F_NODE, F_EDGE, D_MID, HIDDEN,
                         NUM_LAYERS, D_SCORE)
    x = jax.random.normal(k_x, (N, F_NODE), F32)
    e = jax.random.normal(k_e, (E, F_EDGE), F32)
    src = jax.random.randint(k_src, (E,), 0, N)
    dst = jax.random.randint(k_dst, (E,), 0, N)

    scores = model_forward(params, x, e, src, dst)
    scores = jax.block_until_ready(scores)

    ref = reference_forward(params, x, e, src, dst)
    err = float(jnp.max(jnp.abs(scores - ref)))
    assert scores.shape == (E, 1)
    assert jnp.allclose(scores, ref, atol=2e-2, rtol=2e-2), \
        f"mismatch vs JAX reference (max abs err {err})"

    print("KERNEL_OK")
</pallas_src>

<mosaic_0001>
module attributes {stable_mosaic.version = 11 : i64} {
  func.func @_fused_forward_kernel(%arg0: i32, %arg1: memref<128x1xi32, #tpu.memory_space<vmem>>, %arg2: memref<128x1xi32, #tpu.memory_space<vmem>>, %arg3: memref<128x128xf32, #tpu.memory_space<vmem>>, %arg4: memref<128x128xf32, #tpu.memory_space<vmem>>, %arg5: memref<128x128xf32, #tpu.memory_space<vmem>>, %arg6: memref<1x128xf32, #tpu.memory_space<vmem>>, %arg7: memref<128x128xf32, #tpu.memory_space<vmem>>, %arg8: memref<1x128xf32, #tpu.memory_space<vmem>>, %arg9: memref<128x128xf32, #tpu.memory_space<vmem>>, %arg10: memref<1x128xf32, #tpu.memory_space<vmem>>, %arg11: memref<128x128xf32, #tpu.memory_space<vmem>>, %arg12: memref<1x128xf32, #tpu.memory_space<vmem>>, %arg13: memref<2x128x640xf32, #tpu.memory_space<vmem>>, %arg14: memref<2x1x640xf32, #tpu.memory_space<vmem>>, %arg15: memref<2x128x128xf32, #tpu.memory_space<vmem>>, %arg16: memref<2x1x128xf32, #tpu.memory_space<vmem>>, %arg17: memref<384x128xf32, #tpu.memory_space<vmem>>, %arg18: memref<1x128xf32, #tpu.memory_space<vmem>>, %arg19: memref<128x128xf32, #tpu.memory_space<vmem>>, %arg20: memref<1x128xf32, #tpu.memory_space<vmem>>, %arg21: memref<128x128xf32, #tpu.memory_space<vmem>>) attributes {dimension_semantics = [#tpu.dimension_semantics<arbitrary>], iteration_bounds = array<i64: 1>, scalar_prefetch = 0 : i64, scratch_operands = 0 : i64, tpu.core_type = #tpu.core_type<tc>, window_params = [{pipeline_mode = #tpu.pipeline_mode<synchronous>, transform_indices = @transform_0, window_bounds = array<i64: 128, 1>}, {pipeline_mode = #tpu.pipeline_mode<synchronous>, transform_indices = @transform_1, window_bounds = array<i64: 128, 1>}, {pipeline_mode = #tpu.pipeline_mode<synchronous>, transform_indices = @transform_2, window_bounds = array<i64: 128, 128>}, {pipeline_mode = #tpu.pipeline_mode<synchronous>, transform_indices = @transform_3, window_bounds = array<i64: 128, 128>}, {pipeline_mode = #tpu.pipeline_mode<synchronous>, transform_indices = @transform_4, window_bounds = array<i64: 128, 128>}, {pipeline_mode = #tpu.pipeline_mode<synchronous>, transform_indices = @transform_5, window_bounds = array<i64: 1, 128>}, {pipeline_mode = #tpu.pipeline_mode<synchronous>, transform_indices = @transform_6, window_bounds = array<i64: 128, 128>}, {pipeline_mode = #tpu.pipeline_mode<synchronous>, transform_indices = @transform_7, window_bounds = array<i64: 1, 128>}, {pipeline_mode = #tpu.pipeline_mode<synchronous>, transform_indices = @transform_8, window_bounds = array<i64: 128, 128>}, {pipeline_mode = #tpu.pipeline_mode<synchronous>, transform_indices = @transform_9, window_bounds = array<i64: 1, 128>}, {pipeline_mode = #tpu.pipeline_mode<synchronous>, transform_indices = @transform_10, window_bounds = array<i64: 128, 128>}, {pipeline_mode = #tpu.pipeline_mode<synchronous>, transform_indices = @transform_11, window_bounds = array<i64: 1, 128>}, {pipeline_mode = #tpu.pipeline_mode<synchronous>, transform_indices = @transform_12, window_bounds = array<i64: 2, 128, 640>}, {pipeline_mode = #tpu.pipeline_mode<synchronous>, transform_indices = @transform_13, window_bounds = array<i64: 2, 1, 640>}, {pipeline_mode = #tpu.pipeline_mode<synchronous>, transform_indices = @transform_14, window_bounds = array<i64: 2, 128, 128>}, {pipeline_mode = #tpu.pipeline_mode<synchronous>, transform_indices = @transform_15, window_bounds = array<i64: 2, 1, 128>}, {pipeline_mode = #tpu.pipeline_mode<synchronous>, transform_indices = @transform_16, window_bounds = array<i64: 384, 128>}, {pipeline_mode = #tpu.pipeline_mode<synchronous>, transform_indices = @transform_17, window_bounds = array<i64: 1, 128>}, {pipeline_mode = #tpu.pipeline_mode<synchronous>, transform_indices = @transform_18, window_bounds = array<i64: 128, 128>}, {pipeline_mode = #tpu.pipeline_mode<synchronous>, transform_indices = @transform_19, window_bounds = array<i64: 1, 128>}, {pipeline_mode = #tpu.pipeline_mode<synchronous>, transform_indices = @transform_20, window_bounds = array<i64: 128, 128>}]} {
    %c0 = arith.constant 0 : index
    %c0_0 = arith.constant 0 : index
    %0 = vector.load %arg3[%c0, %c0_0] : memref<128x128xf32, #tpu.memory_space<vmem>>, vector<128x128xf32>
    %c0_1 = arith.constant 0 : index
    %c0_2 = arith.constant 0 : index
    %1 = vector.load %arg5[%c0_1, %c0_2] : memref<128x128xf32, #tpu.memory_space<vmem>>, vector<128x128xf32>
    %c0_3 = arith.constant 0 : index
    %c0_4 = arith.constant 0 : index
    %2 = vector.load %arg6[%c0_3, %c0_4] : memref<1x128xf32, #tpu.memory_space<vmem>>, vector<1x128xf32>
    %cst = arith.constant dense<0.000000e+00> : vector<128x128xf32>
    %3 = tpu.matmul %0, %1, %cst {dimension_numbers = #tpu.dot_dimension_numbers<[1], [0], [0], [1], [0, 0, 1, 1], [], []>} : vector<128x128xf32>, vector<128x128xf32>, vector<128x128xf32> -> vector<128x128xf32>
    %4 = vector.broadcast %2 : vector<1x128xf32> to vector<128x128xf32>
    %5 = arith.addf %3, %4 : vector<128x128xf32>
    %cst_5 = arith.constant 0.000000e+00 : f32
    %6 = vector.broadcast %cst_5 : f32 to vector<128x128xf32>
    %7 = arith.maximumf %5, %6 : vector<128x128xf32>
    %c0_6 = arith.constant 0 : index
    %c0_7 = arith.constant 0 : index
    %8 = vector.load %arg7[%c0_6, %c0_7] : memref<128x128xf32, #tpu.memory_space<vmem>>, vector<128x128xf32>
    %c0_8 = arith.constant 0 : index
    %c0_9 = arith.constant 0 : index
    %9 = vector.load %arg8[%c0_8, %c0_9] : memref<1x128xf32, #tpu.memory_space<vmem>>, vector<1x128xf32>
    %cst_10 = arith.constant dense<0.000000e+00> : vector<128x128xf32>
    %10 = tpu.matmul %7, %8, %cst_10 {dimension_numbers = #tpu.dot_dimension_numbers<[1], [0], [0], [1], [0, 0, 1, 1], [], []>} : vector<128x128xf32>, vector<128x128xf32>, vector<128x128xf32> -> vector<128x128xf32>
    %11 = vector.broadcast %9 : vector<1x128xf32> to vector<128x128xf32>
    %12 = arith.addf %10, %11 : vector<128x128xf32>
    %c0_11 = arith.constant 0 : index
    %c0_12 = arith.constant 0 : index
    %13 = vector.load %arg4[%c0_11, %c0_12] : memref<128x128xf32, #tpu.memory_space<vmem>>, vector<128x128xf32>
    %c0_13 = arith.constant 0 : index
    %c0_14 = arith.constant 0 : index
    %14 = vector.load %arg9[%c0_13, %c0_14] : memref<128x128xf32, #tpu.memory_space<vmem>>, vector<128x128xf32>
    %c0_15 = arith.constant 0 : index
    %c0_16 = arith.constant 0 : index
    %15 = vector.load %arg10[%c0_15, %c0_16] : memref<1x128xf32, #tpu.memory_space<vmem>>, vector<1x128xf32>
    %cst_17 = arith.constant dense<0.000000e+00> : vector<128x128xf32>
    %16 = tpu.matmul %13, %14, %cst_17 {dimension_numbers = #tpu.dot_dimension_numbers<[1], [0], [0], [1], [0, 0, 1, 1], [], []>} : vector<128x128xf32>, vector<128x128xf32>, vector<128x128xf32> -> vector<128x128xf32>
    %17 = vector.broadcast %15 : vector<1x128xf32> to vector<128x128xf32>
    %18 = arith.addf %16, %17 : vector<128x128xf32>
    %cst_18 = arith.constant 0.000000e+00 : f32
    %19 = vector.broadcast %cst_18 : f32 to vector<128x128xf32>
    %20 = arith.maximumf %18, %19 : vector<128x128xf32>
    %c0_19 = arith.constant 0 : index
    %c0_20 = arith.constant 0 : index
    %21 = vector.load %arg11[%c0_19, %c0_20] : memref<128x128xf32, #tpu.memory_space<vmem>>, vector<128x128xf32>
    %c0_21 = arith.constant 0 : index
    %c0_22 = arith.constant 0 : index
    %22 = vector.load %arg12[%c0_21, %c0_22] : memref<1x128xf32, #tpu.memory_space<vmem>>, vector<1x128xf32>
    %cst_23 = arith.constant dense<0.000000e+00> : vector<128x128xf32>
    %23 = tpu.matmul %20, %21, %cst_23 {dimension_numbers = #tpu.dot_dimension_numbers<[1], [0], [0], [1], [0, 0, 1, 1], [], []>} : vector<128x128xf32>, vector<128x128xf32>, vector<128x128xf32> -> vector<128x128xf32>
    %24 = vector.broadcast %22 : vector<1x128xf32> to vector<128x128xf32>
    %25 = arith.addf %23, %24 : vector<128x128xf32>
    %26 = tpu.iota {dimensions = array<i32: 1>} : vector<128x128xi32>
    %c0_24 = arith.constant 0 : index
    %c0_25 = arith.constant 0 : index
    %27 = vector.load %arg1[%c0_24, %c0_25] : memref<128x1xi32, #tpu.memory_space<vmem>>, vector<128x1xi32>
    %28 = vector.broadcast %27 : vector<128x1xi32> to vector<128x128xi32>
    %29 = arith.cmpi eq, %26, %28 : vector<128x128xi32>
    %30 = arith.extui %29 : vector<128x128xi1> to vector<128x128xi32>
    %31 = arith.sitofp %30 : vector<128x128xi32> to vector<128x128xf32>
    %c0_26 = arith.constant 0 : index
    %c0_27 = arith.constant 0 : index
    %32 = vector.load %arg2[%c0_26, %c0_27] : memref<128x1xi32, #tpu.memory_space<vmem>>, vector<128x1xi32>
    %33 = vector.broadcast %32 : vector<128x1xi32> to vector<128x128xi32>
    %34 = arith.cmpi eq, %26, %33 : vector<128x128xi32>
    %35 = arith.extui %34 : vector<128x128xi1> to vector<128x128xi32>
    %36 = arith.sitofp %35 : vector<128x128xi32> to vector<128x128xf32>
    %c0_i32 = arith.constant 0 : i32
    %c2_i32 = arith.constant 2 : i32
    %37 = arith.addi %c0_i32, %c2_i32 : i32
    %c1_i32 = arith.constant 1 : i32
    %38:2 = scf.for %arg22 = %c0_i32 to %37 step %c1_i32 iter_args(%arg23 = %12, %arg24 = %25) -> (vector<128x128xf32>, vector<128x128xf32>)  : i32 {
      %55 = arith.index_cast %arg22 : i32 to index
      %c0_44 = arith.constant 0 : index
      %c0_45 = arith.constant 0 : index
      %56 = vector.load %arg13[%55, %c0_44, %c0_45] : memref<2x128x640xf32, #tpu.memory_space<vmem>>, vector<1x128x640xf32>
      %57 = vector.shape_cast %56 : vector<1x128x640xf32> to vector<128x640xf32>
      %cst_46 = arith.constant dense<0.000000e+00> : vector<128x640xf32>
      %58 = tpu.matmul %arg23, %57, %cst_46 {dimension_numbers = #tpu.dot_dimension_numbers<[1], [0], [0], [1], [0, 0, 1, 1], [], []>} : vector<128x128xf32>, vector<128x640xf32>, vector<128x640xf32> -> vector<128x640xf32>
      %59 = arith.index_cast %arg22 : i32 to index
      %c0_47 = arith.constant 0 : index
      %c0_48 = arith.constant 0 : index
      %60 = vector.load %arg14[%59, %c0_47, %c0_48] : memref<2x1x640xf32, #tpu.memory_space<vmem>>, vector<1x1x640xf32>
      %61 = vector.shape_cast %60 : vector<1x1x640xf32> to vector<1x640xf32>
      %62 = vector.broadcast %61 : vector<1x640xf32> to vector<128x640xf32>
      %63 = arith.addf %58, %62 : vector<128x640xf32>
      %64 = vector.extract_strided_slice %63 {offsets = [0, 0], sizes = [128, 128], strides = [1, 1]} : vector<128x640xf32> to vector<128x128xf32>
      %65 = arith.index_cast %arg22 : i32 to index
      %c0_49 = arith.constant 0 : index
      %c0_50 = arith.constant 0 : index
      %66 = vector.load %arg15[%65, %c0_49, %c0_50] : memref<2x128x128xf32, #tpu.memory_space<vmem>>, vector<1x128x128xf32>
      %67 = vector.shape_cast %66 : vector<1x128x128xf32> to vector<128x128xf32>
      %cst_51 = arith.constant dense<0.000000e+00> : vector<128x128xf32>
      %68 = tpu.matmul %arg24, %67, %cst_51 {dimension_numbers = #tpu.dot_dimension_numbers<[1], [0], [0], [1], [0, 0, 1, 1], [], []>} : vector<128x128xf32>, vector<128x128xf32>, vector<128x128xf32> -> vector<128x128xf32>
      %69 = arith.index_cast %arg22 : i32 to index
      %c0_52 = arith.constant 0 : index
      %c0_53 = arith.constant 0 : index
      %70 = vector.load %arg16[%69, %c0_52, %c0_53] : memref<2x1x128xf32, #tpu.memory_space<vmem>>, vector<1x1x128xf32>
      %71 = vector.shape_cast %70 : vector<1x1x128xf32> to vector<1x128xf32>
      %72 = vector.broadcast %71 : vector<1x128xf32> to vector<128x128xf32>
      %73 = arith.addf %68, %72 : vector<128x128xf32>
      %74 = vector.extract_strided_slice %63 {offsets = [0, 128], sizes = [128, 256], strides = [1, 1]} : vector<128x640xf32> to vector<128x256xf32>
      %cst_54 = arith.constant dense<0.000000e+00> : vector<128x256xf32>
      %75 = tpu.matmul %31, %74, %cst_54 {dimension_numbers = #tpu.dot_dimension_numbers<[1], [0], [0], [1], [0, 0, 1, 1], [], []>} : vector<128x128xf32>, vector<128x256xf32>, vector<128x256xf32> -> vector<128x256xf32>
      %76 = vector.extract_strided_slice %63 {offsets = [0, 384], sizes = [128, 256], strides = [1, 1]} : vector<128x640xf32> to vector<128x256xf32>
      %cst_55 = arith.constant dense<0.000000e+00> : vector<128x256xf32>
      %77 = tpu.matmul %36, %76, %cst_55 {dimension_numbers = #tpu.dot_dimension_numbers<[1], [0], [0], [1], [0, 0, 1, 1], [], []>} : vector<128x128xf32>, vector<128x256xf32>, vector<128x256xf32> -> vector<128x256xf32>
      %78 = vector.extract_strided_slice %75 {offsets = [0, 0], sizes = [128, 128], strides = [1, 1]} : vector<128x256xf32> to vector<128x128xf32>
      %79 = vector.extract_strided_slice %75 {offsets = [0, 128], sizes = [128, 128], strides = [1, 1]} : vector<128x256xf32> to vector<128x128xf32>
      %80 = vector.extract_strided_slice %77 {offsets = [0, 0], sizes = [128, 128], strides = [1, 1]} : vector<128x256xf32> to vector<128x128xf32>
      %81 = vector.extract_strided_slice %77 {offsets = [0, 128], sizes = [128, 128], strides = [1, 1]} : vector<128x256xf32> to vector<128x128xf32>
      %82 = arith.addf %79, %81 : vector<128x128xf32>
      %83 = arith.addf %82, %73 : vector<128x128xf32>
      %cst_56 = arith.constant 0.000000e+00 : f32
      %84 = vector.broadcast %cst_56 : f32 to vector<128x128xf32>
      %85 = arith.maximumf %83, %84 : vector<128x128xf32>
      %86 = arith.addf %arg24, %85 : vector<128x128xf32>
      %87 = arith.negf %86 : vector<128x128xf32>
      %88 = math.exp %87 : vector<128x128xf32>
      %cst_57 = arith.constant 1.000000e+00 : f32
      %89 = vector.broadcast %cst_57 : f32 to vector<128x128xf32>
      %90 = arith.addf %89, %88 : vector<128x128xf32>
      %91 = arith.divf %89, %90 : vector<128x128xf32>
      %92 = arith.mulf %91, %78 : vector<128x128xf32>
      %93 = tpu.concatenate %92, %91 in 1 : vector<128x128xf32>, vector<128x128xf32> -> vector<128x256xf32>
      %cst_58 = arith.constant dense<0.000000e+00> : vector<128x256xf32>
      %94 = tpu.matmul %36, %93, %cst_58 {dimension_numbers = #tpu.dot_dimension_numbers<[0], [0], [1], [1], [0, 1, 1, 1], [], []>} : vector<128x128xf32>, vector<128x256xf32>, vector<128x256xf32> -> vector<128x256xf32>
      %95 = arith.mulf %91, %80 : vector<128x128xf32>
      %96 = tpu.concatenate %95, %91 in 1 : vector<128x128xf32>, vector<128x128xf32> -> vector<128x256xf32>
      %cst_59 = arith.constant dense<0.000000e+00> : vector<128x256xf32>
      %97 = tpu.matmul %31, %96, %cst_59 {dimension_numbers = #tpu.dot_dimension_numbers<[0], [0], [1], [1], [0, 1, 1, 1], [], []>} : vector<128x128xf32>, vector<128x256xf32>, vector<128x256xf32> -> vector<128x256xf32>
      %98 = vector.extract_strided_slice %94 {offsets = [0, 0], sizes = [128, 128], strides = [1, 1]} : vector<128x256xf32> to vector<128x128xf32>
      %99 = vector.extract_strided_slice %94 {offsets = [0, 128], sizes = [128, 128], strides = [1, 1]} : vector<128x256xf32> to vector<128x128xf32>
      %cst_60 = arith.constant 9.99999997E-7 : f32
      %100 = vector.broadcast %cst_60 : f32 to vector<128x128xf32>
      %101 = arith.addf %99, %100 : vector<128x128xf32>
      %102 = arith.divf %98, %101 : vector<128x128xf32>
      %103 = vector.extract_strided_slice %97 {offsets = [0, 0], sizes = [128, 128], strides = [1, 1]} : vector<128x256xf32> to vector<128x128xf32>
      %104 = vector.extract_strided_slice %97 {offsets = [0, 128], sizes = [128, 128], strides = [1, 1]} : vector<128x256xf32> to vector<128x128xf32>
      %cst_61 = arith.constant 9.99999997E-7 : f32
      %105 = vector.broadcast %cst_61 : f32 to vector<128x128xf32>
      %106 = arith.addf %104, %105 : vector<128x128xf32>
      %107 = arith.divf %103, %106 : vector<128x128xf32>
      %108 = arith.addf %64, %102 : vector<128x128xf32>
      %109 = arith.addf %108, %107 : vector<128x128xf32>
      %cst_62 = arith.constant 0.000000e+00 : f32
      %110 = vector.broadcast %cst_62 : f32 to vector<128x128xf32>
      %111 = arith.maximumf %109, %110 : vector<128x128xf32>
      %112 = arith.addf %arg23, %111 : vector<128x128xf32>
      scf.yield %112, %86 : vector<128x128xf32>, vector<128x128xf32>
    }
    %c2_i32_28 = arith.constant 2 : i32
    %cst_29 = arith.constant dense<0.000000e+00> : vector<128x128xf32>
    %39 = tpu.matmul %31, %38#0, %cst_29 {dimension_numbers = #tpu.dot_dimension_numbers<[1], [0], [0], [1], [0, 0, 1, 1], [], []>} : vector<128x128xf32>, vector<128x128xf32>, vector<128x128xf32> -> vector<128x128xf32>
    %cst_30 = arith.constant dense<0.000000e+00> : vector<128x128xf32>
    %40 = tpu.matmul %36, %38#0, %cst_30 {dimension_numbers = #tpu.dot_dimension_numbers<[1], [0], [0], [1], [0, 0, 1, 1], [], []>} : vector<128x128xf32>, vector<128x128xf32>, vector<128x128xf32> -> vector<128x128xf32>
    %41 = tpu.concatenate %39, %40, %38#1 in 1 : vector<128x128xf32>, vector<128x128xf32>, vector<128x128xf32> -> vector<128x384xf32>
    %c0_31 = arith.constant 0 : index
    %c0_32 = arith.constant 0 : index
    %42 = vector.load %arg17[%c0_31, %c0_32] : memref<384x128xf32, #tpu.memory_space<vmem>>, vector<384x128xf32>
    %cst_33 = arith.constant dense<0.000000e+00> : vector<128x128xf32>
    %43 = tpu.matmul %41, %42, %cst_33 {dimension_numbers = #tpu.dot_dimension_numbers<[1], [0], [0], [1], [0, 0, 1, 1], [], []>} : vector<128x384xf32>, vector<384x128xf32>, vector<128x128xf32> -> vector<128x128xf32>
    %c0_34 = arith.constant 0 : index
    %c0_35 = arith.constant 0 : index
    %44 = vector.load %arg18[%c0_34, %c0_35] : memref<1x128xf32, #tpu.memory_space<vmem>>, vector<1x128xf32>
    %45 = vector.broadcast %44 : vector<1x128xf32> to vector<128x128xf32>
    %46 = arith.addf %43, %45 : vector<128x128xf32>
    %cst_36 = arith.constant 0.000000e+00 : f32
    %47 = vector.broadcast %cst_36 : f32 to vector<128x128xf32>
    %48 = arith.maximumf %46, %47 : vector<128x128xf32>
    %c0_37 = arith.constant 0 : index
    %c0_38 = arith.constant 0 : index
    %49 = vector.load %arg19[%c0_37, %c0_38] : memref<128x128xf32, #tpu.memory_space<vmem>>, vector<128x128xf32>
    %cst_39 = arith.constant dense<0.000000e+00> : vector<128x128xf32>
    %50 = tpu.matmul %48, %49, %cst_39 {dimension_numbers = #tpu.dot_dimension_numbers<[1], [0], [0], [1], [0, 0, 1, 1], [], []>} : vector<128x128xf32>, vector<128x128xf32>, vector<128x128xf32> -> vector<128x128xf32>
    %c0_40 = arith.constant 0 : index
    %c0_41 = arith.constant 0 : index
    %51 = vector.load %arg20[%c0_40, %c0_41] : memref<1x128xf32, #tpu.memory_space<vmem>>, vector<1x128xf32>
    %52 = vector.broadcast %51 : vector<1x128xf32> to vector<128x128xf32>
    %53 = arith.addf %50, %52 : vector<128x128xf32>
    %c0_42 = arith.constant 0 : index
    %c0_43 = arith.constant 0 : index
    %54 = vector.load %arg21[%c0_42, %c0_43] : memref<128x128xf32, #tpu.memory_space<vmem>>, vector<128x128xf32>
    tpu.vector_store %arg21[%c0_42, %c0_43], %53 {strides = array<i32>} : memref<128x128xf32, #tpu.memory_space<vmem>>, vector<128x128xf32>,
    return
  }
  func.func @transform_0(%arg0: i32) -> (i32, i32) {
    %c0_i32 = arith.constant 0 : i32
    %c0_i32_0 = arith.constant 0 : i32
    %c0_i32_1 = arith.constant 0 : i32
    return %c0_i32, %c0_i32_0 : i32, i32
  }
  func.func @transform_1(%arg0: i32) -> (i32, i32) {
    %c0_i32 = arith.constant 0 : i32
    %c0_i32_0 = arith.constant 0 : i32
    %c0_i32_1 = arith.constant 0 : i32
    return %c0_i32, %c0_i32_0 : i32, i32
  }
  func.func @transform_2(%arg0: i32) -> (i32, i32) {
    %c0_i32 = arith.constant 0 : i32
    %c0_i32_0 = arith.constant 0 : i32
    %c0_i32_1 = arith.constant 0 : i32
    return %c0_i32, %c0_i32_0 : i32, i32
  }
  func.func @transform_3(%arg0: i32) -> (i32, i32) {
    %c0_i32 = arith.constant 0 : i32
    %c0_i32_0 = arith.constant 0 : i32
    %c0_i32_1 = arith.constant 0 : i32
    return %c0_i32, %c0_i32_0 : i32, i32
  }
  func.func @transform_4(%arg0: i32) -> (i32, i32) {
    %c0_i32 = arith.constant 0 : i32
    %c0_i32_0 = arith.constant 0 : i32
    %c0_i32_1 = arith.constant 0 : i32
    return %c0_i32, %c0_i32_0 : i32, i32
  }
  func.func @transform_5(%arg0: i32) -> (i32, i32) {
    %c0_i32 = arith.constant 0 : i32
    %c0_i32_0 = arith.constant 0 : i32
    %c0_i32_1 = arith.constant 0 : i32
    return %c0_i32, %c0_i32_0 : i32, i32
  }
  func.func @transform_6(%arg0: i32) -> (i32, i32) {
    %c0_i32 = arith.constant 0 : i32
    %c0_i32_0 = arith.constant 0 : i32
    %c0_i32_1 = arith.constant 0 : i32
    return %c0_i32, %c0_i32_0 : i32, i32
  }
  func.func @transform_7(%arg0: i32) -> (i32, i32) {
    %c0_i32 = arith.constant 0 : i32
    %c0_i32_0 = arith.constant 0 : i32
    %c0_i32_1 = arith.constant 0 : i32
    return %c0_i32, %c0_i32_0 : i32, i32
  }
  func.func @transform_8(%arg0: i32) -> (i32, i32) {
    %c0_i32 = arith.constant 0 : i32
    %c0_i32_0 = arith.constant 0 : i32
    %c0_i32_1 = arith.constant 0 : i32
    return %c0_i32, %c0_i32_0 : i32, i32
  }
  func.func @transform_9(%arg0: i32) -> (i32, i32) {
    %c0_i32 = arith.constant 0 : i32
    %c0_i32_0 = arith.constant 0 : i32
    %c0_i32_1 = arith.constant 0 : i32
    return %c0_i32, %c0_i32_0 : i32, i32
  }
  func.func @transform_10(%arg0: i32) -> (i32, i32) {
    %c0_i32 = arith.constant 0 : i32
    %c0_i32_0 = arith.constant 0 : i32
    %c0_i32_1 = arith.constant 0 : i32
    return %c0_i32, %c0_i32_0 : i32, i32
  }
  func.func @transform_11(%arg0: i32) -> (i32, i32) {
    %c0_i32 = arith.constant 0 : i32
    %c0_i32_0 = arith.constant 0 : i32
    %c0_i32_1 = arith.constant 0 : i32
    return %c0_i32, %c0_i32_0 : i32, i32
  }
  func.func @transform_12(%arg0: i32) -> (i32, i32, i32) {
    %c0_i32 = arith.constant 0 : i32
    %c0_i32_0 = arith.constant 0 : i32
    %c0_i32_1 = arith.constant 0 : i32
    %c0_i32_2 = arith.constant 0 : i32
    return %c0_i32, %c0_i32_0, %c0_i32_1 : i32, i32, i32
  }
  func.func @transform_13(%arg0: i32) -> (i32, i32, i32) {
    %c0_i32 = arith.constant 0 : i32
    %c0_i32_0 = arith.constant 0 : i32
    %c0_i32_1 = arith.constant 0 : i32
    %c0_i32_2 = arith.constant 0 : i32
    return %c0_i32, %c0_i32_0, %c0_i32_1 : i32, i32, i32
  }
  func.func @transform_14(%arg0: i32) -> (i32, i32, i32) {
    %c0_i32 = arith.constant 0 : i32
    %c0_i32_0 = arith.constant 0 : i32
    %c0_i32_1 = arith.constant 0 : i32
    %c0_i32_2 = arith.constant 0 : i32
    return %c0_i32, %c0_i32_0, %c0_i32_1 : i32, i32, i32
  }
  func.func @transform_15(%arg0: i32) -> (i32, i32, i32) {
    %c0_i32 = arith.constant 0 : i32
    %c0_i32_0 = arith.constant 0 : i32
    %c0_i32_1 = arith.constant 0 : i32
    %c0_i32_2 = arith.constant 0 : i32
    return %c0_i32, %c0_i32_0, %c0_i32_1 : i32, i32, i32
  }
  func.func @transform_16(%arg0: i32) -> (i32, i32) {
    %c0_i32 = arith.constant 0 : i32
    %c0_i32_0 = arith.constant 0 : i32
    %c0_i32_1 = arith.constant 0 : i32
    return %c0_i32, %c0_i32_0 : i32, i32
  }
  func.func @transform_17(%arg0: i32) -> (i32, i32) {
    %c0_i32 = arith.constant 0 : i32
    %c0_i32_0 = arith.constant 0 : i32
    %c0_i32_1 = arith.constant 0 : i32
    return %c0_i32, %c0_i32_0 : i32, i32
  }
  func.func @transform_18(%arg0: i32) -> (i32, i32) {
    %c0_i32 = arith.constant 0 : i32
    %c0_i32_0 = arith.constant 0 : i32
    %c0_i32_1 = arith.constant 0 : i32
    return %c0_i32, %c0_i32_0 : i32, i32
  }
  func.func @transform_19(%arg0: i32) -> (i32, i32) {
    %c0_i32 = arith.constant 0 : i32
    %c0_i32_0 = arith.constant 0 : i32
    %c0_i32_1 = arith.constant 0 : i32
    return %c0_i32, %c0_i32_0 : i32, i32
  }
  func.func @transform_20(%arg0: i32) -> (i32, i32) {
    %c0_i32 = arith.constant 0 : i32
    %c0_i32_0 = arith.constant 0 : i32
    %c0_i32_1 = arith.constant 0 : i32
    return %c0_i32, %c0_i32_0 : i32, i32
  }
}

</mosaic_0001>

<bundles_post_ra>
// kernel: model_forward.1
= control target key start
LH: loop header
LB: loop body
LE: loop exit
PB: predicated region body
PF: predicated region fallthrough
CT: control target
= control target key end

     0   :  { %s8537_s4 = inlined_call_operand.vmem [shape: f32[128,128], index: 4, kind: input, shape index: {}]   ;;  %s8538_s12 = inlined_call_operand.vmem [shape: f32[2,128,640], index: 12, kind: input, shape index: {}]   ;;  %s8539_s13 = inlined_call_operand.vmem [shape: f32[2,1,640], index: 13, kind: input, shape index: {}]   ;;  %s8540_s14 = inlined_call_operand.vmem [shape: f32[2,128,128], index: 14, kind: input, shape index: {}]   ;;  %s8541_s15 = inlined_call_operand.vmem [shape: f32[2,1,128], index: 15, kind: input, shape index: {}]   ;;  %s8542_s16 = inlined_call_operand.vmem [shape: f32[384,128], index: 16, kind: input, shape index: {}]   ;;  %s8543_s17 = inlined_call_operand.vmem [shape: f32[1,128], index: 17, kind: input, shape index: {}]   ;;  %s8544_s18 = inlined_call_operand.vmem [shape: f32[128,128], index: 18, kind: input, shape index: {}]   ;;  %s8545_s19 = inlined_call_operand.vmem [shape: f32[1,128], index: 19, kind: input, shape index: {}]   ;;  %s8546_s20 = inlined_call_operand.vmem [shape: f32[128,128], index: 20, kind: output, shape index: {}]   ;;  %s8547_s2 = inlined_call_operand.vmem [shape: f32[128,128], index: 2, kind: input, shape index: {}]   ;;  %s8548_s6 = inlined_call_operand.vmem [shape: f32[128,128], index: 6, kind: input, shape index: {}]   ;;  %s8549_s8 = inlined_call_operand.vmem [shape: f32[128,128], index: 8, kind: input, shape index: {}]   ;;  %s8550_s3 = inlined_call_operand.vmem [shape: f32[128,128], index: 3, kind: input, shape index: {}]   ;;  %s8551_s10 = inlined_call_operand.vmem [shape: f32[128,128], index: 10, kind: input, shape index: {}]   ;;  %s8552_s0 = inlined_call_operand.vmem [shape: s32[128,1], index: 0, kind: input, shape index: {}]   ;;  %s8553_s1 = inlined_call_operand.vmem [shape: s32[128,1], index: 1, kind: input, shape index: {}]   ;;  %s8554_s5 = inlined_call_operand.vmem [shape: f32[1,128], index: 5, kind: input, shape index: {}]   ;;  %s8555_s9 = inlined_call_operand.vmem [shape: f32[1,128], index: 9, kind: input, shape index: {}]   ;;  %s8556_s7 = inlined_call_operand.vmem [shape: f32[1,128], index: 7, kind: input, shape index: {}]   ;;  %s8557_s11 = inlined_call_operand.vmem [shape: f32[1,128], index: 11, kind: input, shape index: {}]  }
   0x1   :  { %8675 = sst [smem:[#allocation134_spill]] %s8537_s4  ;;  %v65_v4 = vld [vmem:[%s8547_s2] sm:$0xff]  ;;  %v280_v13 = vld [vmem:[%s8548_s6 + $0x78] sm:$0xff]  ;;  %v279_v14 = vld [vmem:[%s8548_s6 + $0x70] sm:$0xff] }
   0x2   :  { %8676 = sst [smem:[#allocation135_spill]] %s8538_s12  ;;  %4376 = vmatprep.mubr.f32.mxu0 %v65_v4  ;;  %4400 = vmatprep.subr.mxu1 %v280_v13  ;;  %v278_v16 = vld [vmem:[%s8548_s6 + $0x68] sm:$0xff]  ;;  %v277_v18 = vld [vmem:[%s8548_s6 + $0x60] sm:$0xff]  ;;  %v276_v20 = vld [vmem:[%s8548_s6 + $0x58] sm:$0xff] }
   0x3   :  { %8677 = sst [smem:[#allocation136_spill]] %s8539_s13  ;;  %4401 = vmatpush3.msra.mxu1 %v280_v13  ;;  %v275_v22 = vld [vmem:[%s8548_s6 + $0x50] sm:$0xff]  ;;  %v66_v23 = vld [vmem:[%s8547_s2 + $0x8] sm:$0xff]  ;;  %v464_v24 = vld [vmem:[%s8549_s8 + $0x78] sm:$0xff] }
   0x4   :  { %8678 = sst [smem:[#allocation137_spill]] %s8540_s14  ;;  %4402 = vmatprep.subr.mxu1 %v279_v14  ;;  %v67_v25 = vld [vmem:[%s8547_s2 + $0x10] sm:$0xff]  ;;  %v274_v27 = vld [vmem:[%s8548_s6 + $0x48] sm:$0xff]  ;;  %v68_v28 = vld [vmem:[%s8547_s2 + $0x18] sm:$0xff] }
   0x5   :  { %8679 = sst [smem:[#allocation138_spill]] %s8541_s15  ;;  %4403 = vmatpush3.msra.mxu1 %v279_v14  ;;  %v463_v26 = vld [vmem:[%s8549_s8 + $0x70] sm:$0xff]  ;;  %v462_v29 = vld [vmem:[%s8549_s8 + $0x68] sm:$0xff]  ;;  %v69_v30 = vld [vmem:[%s8547_s2 + $0x20] sm:$0xff] }
   0x6   :  { %s8680_s23 = sld [smem:[#allocation134_spill]]  ;;  %4404 = vmatprep.subr.mxu1 %v278_v16  ;;  %v461_v31 = vld [vmem:[%s8549_s8 + $0x60] sm:$0xff]  ;;  %v70_v33 = vld [vmem:[%s8547_s2 + $0x28] sm:$0xff]  ;;  %v460_v34 = vld [vmem:[%s8549_s8 + $0x58] sm:$0xff] }
   0x7   :  { %4405 = vmatpush3.msra.mxu1 %v278_v16  ;;  %v273_v32 = vld [vmem:[%s8548_s6 + $0x40] sm:$0xff]  ;;  %v71_v35 = vld [vmem:[%s8547_s2 + $0x30] sm:$0xff]  ;;  %v272_v37 = vld [vmem:[%s8548_s6 + $0x38] sm:$0xff] }
   0x8   :  { %4406 = vmatprep.subr.mxu1 %v277_v18  ;;  %v459_v36 = vld [vmem:[%s8549_s8 + $0x50] sm:$0xff]  ;;  %v72_v38 = vld [vmem:[%s8547_s2 + $0x38] sm:$0xff]  ;;  %v458_v39 = vld [vmem:[%s8549_s8 + $0x48] sm:$0xff] }
   0x9   :  { %4407 = vmatpush3.msra.mxu1 %v277_v18  ;;  %v73_v40 = vld [vmem:[%s8547_s2 + $0x40] sm:$0xff]  ;;  %v271_v42 = vld [vmem:[%s8548_s6 + $0x30] sm:$0xff]  ;;  %v74_v43 = vld [vmem:[%s8547_s2 + $0x48] sm:$0xff] }
   0xa   :  { %4408 = vmatprep.subr.mxu1 %v276_v20  ;;  %v457_v41 = vld [vmem:[%s8549_s8 + $0x40] sm:$0xff]  ;;  %v456_v44 = vld [vmem:[%s8549_s8 + $0x38] sm:$0xff]  ;;  %v75_v45 = vld [vmem:[%s8547_s2 + $0x50] sm:$0xff] }
   0xb   :  { %4409 = vmatpush3.msra.mxu1 %v276_v20  ;;  %v455_v46 = vld [vmem:[%s8549_s8 + $0x30] sm:$0xff]  ;;  %v270_v47 = vld [vmem:[%s8548_s6 + $0x28] sm:$0xff]  ;;  %v76_v48 = vld [vmem:[%s8547_s2 + $0x58] sm:$0xff] }
   0xc   :  { %v96_v0 = vld [vmem:[%s8680_s23 + $0x78] sm:$0xff]  ;;  %v95_v1 = vld [vmem:[%s8680_s23 + $0x70] sm:$0xff]  ;;  %v94_v2 = vld [vmem:[%s8680_s23 + $0x68] sm:$0xff]  ;;  %4410 = vmatprep.subr.mxu1 %v275_v22 }
   0xd   :  { %4344 = vmatprep.subr.mxu0 %v96_v0  ;;  %v93_v3 = vld [vmem:[%s8680_s23 + $0x60] sm:$0xff]  ;;  %v92_v5 = vld [vmem:[%s8680_s23 + $0x58] sm:$0xff]  ;;  %v91_v6 = vld [vmem:[%s8680_s23 + $0x50] sm:$0xff]  ;;  %4411 = vmatpush3.msra.mxu1 %v275_v22 }
   0xe   :  { %4345 = vmatpush3.msra.mxu0 %v96_v0  ;;  %v90_v7 = vld [vmem:[%s8680_s23 + $0x48] sm:$0xff]  ;;  %v89_v8 = vld [vmem:[%s8680_s23 + $0x40] sm:$0xff]  ;;  %v88_v9 = vld [vmem:[%s8680_s23 + $0x38] sm:$0xff]  ;;  %4412 = vmatprep.subr.mxu1 %v274_v27 }
   0xf   :  { %4346 = vmatprep.subr.mxu0 %v95_v1  ;;  %v87_v10 = vld [vmem:[%s8680_s23 + $0x30] sm:$0xff]  ;;  %v86_v11 = vld [vmem:[%s8680_s23 + $0x28] sm:$0xff]  ;;  %v85_v12 = vld [vmem:[%s8680_s23 + $0x20] sm:$0xff]  ;;  %4413 = vmatpush3.msra.mxu1 %v274_v27 }
  0x10   :  { %4347 = vmatpush3.msra.mxu0 %v95_v1  ;;  %v84_v15 = vld [vmem:[%s8680_s23 + $0x18] sm:$0xff]  ;;  %v83_v17 = vld [vmem:[%s8680_s23 + $0x10] sm:$0xff]  ;;  %v82_v19 = vld [vmem:[%s8680_s23 + $0x8] sm:$0xff]  ;;  %4414 = vmatprep.subr.mxu1 %v273_v32 }
  0x11   :  { %4348 = vmatprep.subr.mxu0 %v94_v2  ;;  %v81_v21 = vld [vmem:[%s8680_s23] sm:$0xff]  ;;  %4415 = vmatpush3.msra.mxu1 %v273_v32  ;;  %v454_v49 = vld [vmem:[%s8549_s8 + $0x28] sm:$0xff]  ;;  %v452_v54 = vld [vmem:[%s8549_s8 + $0x18] sm:$0xff] }
  0x12   :  { %4349 = vmatpush3.msra.mxu0 %v94_v2  ;;  %4416 = vmatprep.subr.mxu1 %v272_v37  ;;  %v77_v50 = vld [vmem:[%s8547_s2 + $0x60] sm:$0xff]  ;;  %v78_v53 = vld [vmem:[%s8547_s2 + $0x68] sm:$0xff]  ;;  %v79_v55 = vld [vmem:[%s8547_s2 + $0x70] sm:$0xff] }
  0x13   :  { %4350 = vmatprep.subr.mxu0 %v93_v3  ;;  %4417 = vmatpush3.msra.mxu1 %v272_v37  ;;  %v453_v51 = vld [vmem:[%s8549_s8 + $0x20] sm:$0xff]  ;;  %v451_v56 = vld [vmem:[%s8549_s8 + $0x10] sm:$0xff]  ;;  %v80_v57 = vld [vmem:[%s8547_s2 + $0x78] sm:$0xff] }
  0x14   :  { %4351 = vmatpush3.msra.mxu0 %v93_v3  ;;  %4418 = vmatprep.subr.mxu1 %v271_v42  ;;  %v269_v52 = vld [vmem:[%s8548_s6 + $0x20] sm:$0xff]  ;;  %v450_v58 = vld [vmem:[%s8549_s8 + $0x8] sm:$0xff]  ;;  %v435_v62 = vld [vmem:[%s8550_s3 + $0x10] sm:$0xff] }
  0x15   :  { %4352 = vmatprep.subr.mxu0 %v92_v5  ;;  %4419 = vmatpush3.msra.mxu1 %v271_v42  ;;  %v433_v59 = vld [vmem:[%s8550_s3] sm:$0xff]  ;;  %v434_v61 = vld [vmem:[%s8550_s3 + $0x8] sm:$0xff]  ;;  %v436_v63 = vld [vmem:[%s8550_s3 + $0x18] sm:$0xff] }
  0x16   :  { %4353 = vmatpush3.msra.mxu0 %v92_v5  ;;  %4420 = vmatprep.subr.mxu1 %v270_v47  ;;  %v449_v60 = vld [vmem:[%s8549_s8] sm:$0xff]  ;;  %v438_v1 = vld [vmem:[%s8550_s3 + $0x28] sm:$0xff]  ;;  %v439_v2 = vld [vmem:[%s8550_s3 + $0x30] sm:$0xff] }
  0x17   :  { %4354 = vmatprep.subr.mxu0 %v91_v6  ;;  %4421 = vmatpush3.msra.mxu1 %v270_v47  ;;  %v437_v0 = vld [vmem:[%s8550_s3 + $0x20] sm:$0xff]  ;;  %v440_v3 = vld [vmem:[%s8550_s3 + $0x38] sm:$0xff]  ;;  %v442_v5 = vld [vmem:[%s8550_s3 + $0x48] sm:$0xff] }
  0x18   :  { %4355 = vmatpush3.msra.mxu0 %v91_v6  ;;  %4422 = vmatprep.subr.mxu1 %v269_v52  ;;  %v441_v4 = vld [vmem:[%s8550_s3 + $0x40] sm:$0xff]  ;;  %v443_v6 = vld [vmem:[%s8550_s3 + $0x50] sm:$0xff]  ;;  %v266_v14 = vld [vmem:[%s8548_s6 + $0x8] sm:$0xff] }
  0x19   :  { %4356 = vmatprep.subr.mxu0 %v90_v7  ;;  %4423 = vmatpush3.msra.mxu1 %v269_v52  ;;  %v267_v13 = vld [vmem:[%s8548_s6 + $0x10] sm:$0xff]  ;;  %v6033_v16 = vld [vmem:[%s8551_s10 + $0x78] sm:$0xff]  ;;  %v808_v22 = vld [vmem:[%s8552_s0 + $0x28] sm:$0xff] }
  0x1a   :  { %4357 = vmatpush3.msra.mxu0 %v90_v7  ;;  %v444_v7 = vld [vmem:[%s8550_s3 + $0x58] sm:$0xff]  ;;  %v805_v18 = vld [vmem:[%s8552_s0 + $0x10] sm:$0xff]  ;;  %v811_v27 = vld [vmem:[%s8552_s0 + $0x40] sm:$0xff] }
  0x1b   :  { %4358 = vmatprep.subr.mxu0 %v89_v8  ;;  %v806_v20 = vld [vmem:[%s8552_s0 + $0x18] sm:$0xff]  ;;  %v917_v37 = vld [vmem:[%s8553_s1 + $0x10] sm:$0xff]  ;;  %v924_v42 = vld [vmem:[%s8553_s1 + $0x48] sm:$0xff] }
  0x1c   :  { %4359 = vmatpush3.msra.mxu0 %v89_v8  ;;  %v445_v8 = vld [vmem:[%s8550_s3 + $0x60] sm:$0xff]  ;;  %v818_v32 = vld [vmem:[%s8552_s0 + $0x78] sm:$0xff] }
  0x1d   :  { %4360 = vmatprep.subr.mxu0 %v88_v9  ;;  %v927_v47 = vld [vmem:[%s8553_s1 + $0x60] sm:$0xff] }
  0x1e   :  { %4361 = vmatpush3.msra.mxu0 %v88_v9  ;;  %v446_v9 = vld [vmem:[%s8550_s3 + $0x68] sm:$0xff] }
  0x1f   :  { %4362 = vmatprep.subr.mxu0 %v87_v10 }
  0x20   :  { %4363 = vmatpush3.msra.mxu0 %v87_v10  ;;  %v447_v10 = vld [vmem:[%s8550_s3 + $0x70] sm:$0xff] }
  0x21   :  { %4364 = vmatprep.subr.mxu0 %v86_v11 }
  0x22   :  { %4365 = vmatpush3.msra.mxu0 %v86_v11  ;;  %v448_v11 = vld [vmem:[%s8550_s3 + $0x78] sm:$0xff] }
  0x23   :  { %4366 = vmatprep.subr.mxu0 %v85_v12 }
  0x24   :  { %4367 = vmatpush3.msra.mxu0 %v85_v12  ;;  %v268_v12 = vld [vmem:[%s8548_s6 + $0x18] sm:$0xff] }
  0x25   :  { %4368 = vmatprep.subr.mxu0 %v84_v15  ;;  %4424 = vmatprep.subr.mxu1 %v268_v12 }
  0x26   :  { %4369 = vmatpush3.msra.mxu0 %v84_v15  ;;  %4425 = vmatpush3.msra.mxu1 %v268_v12  ;;  %v265_v15 = vld [vmem:[%s8548_s6] sm:$0xff] }
  0x27   :  { %4370 = vmatprep.subr.mxu0 %v83_v17  ;;  %4426 = vmatprep.subr.mxu1 %v267_v13 }
  0x28   :  { %4371 = vmatpush3.msra.mxu0 %v83_v17  ;;  %4427 = vmatpush3.msra.mxu1 %v267_v13  ;;  %v5680_v17 = vmov 0  }
  0x29   :  { %4372 = vmatprep.subr.mxu0 %v82_v19  ;;  %4428 = vmatprep.subr.mxu1 %v266_v14 }
  0x2a   :  { %4373 = vmatpush3.msra.mxu0 %v82_v19  ;;  %4429 = vmatpush3.msra.mxu1 %v266_v14  ;;  %v803_v19 = vld [vmem:[%s8552_s0] sm:$0xff] }
  0x2b   :  { %4374 = vmatprep.subr.mxu0 %v81_v21  ;;  %4430 = vmatprep.subr.mxu1 %v265_v15 }
  0x2c   :  { %4375 = vmatpush3.msra.mxu0 %v81_v21  ;;  %4431 = vmatpush3.msra.mxu1 %v265_v15  ;;  %v804_v21 = vld [vmem:[%s8552_s0 + $0x8] sm:$0xff] }
  0x2d   :  { %4377 = vmatmul.mubr.f32.vlgmr.msra.gmra.mxu0 %v66_v23  ;;  %4456 = vmatprep.subr.mxu0 %v464_v24  ;;  %v807_v23 = vld [vmem:[%s8552_s0 + $0x20] sm:$0xff] }
  0x2e   :  { %4457 = vmatpush3.msra.mxu0 %v464_v24  ;;  %4379 = vmatprep.mubr.f32.mxu0 %v67_v25  ;;  %v810_v24 = vld [vmem:[%s8552_s0 + $0x38] sm:$0xff]  ;;  %v809_v25 = vld [vmem:[%s8552_s0 + $0x30] sm:$0xff] }
  0x2f   :  { %4458 = vmatprep.subr.mxu0 %v463_v26  ;;  %4512 = vmatprep.subr.mxu1 %v6033_v16 }
  0x30   :  { %4459 = vmatpush3.msra.mxu0 %v463_v26  ;;  %5174 = vset.pattern.permute.xlu1 %v5680_v17  ;;  %v812_v26 = vld [vmem:[%s8552_s0 + $0x48] sm:$0xff] }
  0x31   :  { %4380 = vmatmul.mubr.f32.gmra.mxu0 %v68_v28  ;;  %4460 = vmatprep.subr.mxu0 %v462_v29  ;;  %v814_v28 = vld [vmem:[%s8552_s0 + $0x58] sm:$0xff] }
  0x32   :  { %4461 = vmatpush3.msra.mxu0 %v462_v29  ;;  %4382 = vmatprep.mubr.f32.mxu0 %v69_v30  ;;  %v813_v29 = vld [vmem:[%s8552_s0 + $0x50] sm:$0xff]  ;;  %v816_v30 = vld [vmem:[%s8552_s0 + $0x68] sm:$0xff] }
  0x33   :  { %4462 = vmatprep.subr.mxu0 %v461_v31  ;;  %5173 = vset.pattern.permute.xlu0 %v5680_v17  ;;  %v643_v17 = vld [vmem:[%s8551_s10 + $0x50] sm:$0xff] }
  0x34   :  { %4463 = vmatpush3.msra.mxu0 %v461_v31  ;;  %826 = vperm.xlu1 %5174, %v805_v18   ;;  %v815_v31 = vld [vmem:[%s8552_s0 + $0x60] sm:$0xff]  ;;  %v5681_v18 = vmov 0.0  }
  0x35   :  { %4383 = vmatmul.mubr.f32.gmra.mxu0 %v70_v33  ;;  %4464 = vmatprep.subr.mxu0 %v460_v34  ;;  %v817_v33 = vld [vmem:[%s8552_s0 + $0x70] sm:$0xff] }
  0x36   :  { %4465 = vmatpush3.msra.mxu0 %v460_v34  ;;  %4385 = vmatprep.mubr.f32.mxu0 %v71_v35  ;;  %v916_v34 = vld [vmem:[%s8553_s1 + $0x8] sm:$0xff]  ;;  %v915_v35 = vld [vmem:[%s8553_s1] sm:$0xff] }
  0x37   :  { %4466 = vmatprep.subr.mxu0 %v459_v36  ;;  %820 = vperm.xlu0 %5173, %v803_v19  }
  0x38   :  { %4467 = vmatpush3.msra.mxu0 %v459_v36  ;;  %829 = vperm.xlu1 %5174, %v806_v20   ;;  %v918_v36 = vld [vmem:[%s8553_s1 + $0x18] sm:$0xff] }
  0x39   :  { %4386 = vmatmul.mubr.f32.gmra.mxu0 %v72_v38  ;;  %4468 = vmatprep.subr.mxu0 %v458_v39  ;;  %v920_v38 = vld [vmem:[%s8553_s1 + $0x28] sm:$0xff] }
  0x3a   :  { %4469 = vmatpush3.msra.mxu0 %v458_v39  ;;  %4388 = vmatprep.mubr.f32.mxu0 %v73_v40  ;;  %v919_v39 = vld [vmem:[%s8553_s1 + $0x20] sm:$0xff]  ;;  %v922_v40 = vld [vmem:[%s8553_s1 + $0x38] sm:$0xff] }
  0x3b   :  { %4470 = vmatprep.subr.mxu0 %v457_v41  ;;  %823 = vperm.xlu0 %5173, %v804_v21  }
  0x3c   :  { %4471 = vmatpush3.msra.mxu0 %v457_v41  ;;  %835 = vperm.xlu1 %5174, %v808_v22   ;;  %v921_v41 = vld [vmem:[%s8553_s1 + $0x30] sm:$0xff] }
  0x3d   :  { %4389 = vmatmul.mubr.f32.gmra.mxu0 %v74_v43  ;;  %4472 = vmatprep.subr.mxu0 %v456_v44  ;;  %v923_v43 = vld [vmem:[%s8553_s1 + $0x40] sm:$0xff] }
  0x3e   :  { %4473 = vmatpush3.msra.mxu0 %v456_v44  ;;  %4391 = vmatprep.mubr.f32.mxu0 %v75_v45  ;;  %v926_v44 = vld [vmem:[%s8553_s1 + $0x58] sm:$0xff]  ;;  %v925_v45 = vld [vmem:[%s8553_s1 + $0x50] sm:$0xff] }
  0x3f   :  { %4474 = vmatprep.subr.mxu0 %v455_v46  ;;  %832 = vperm.xlu0 %5173, %v807_v23   ;;  %v642_v23 = vld [vmem:[%s8551_s10 + $0x48] sm:$0xff] }
  0x40   :  { %4475 = vmatpush3.msra.mxu0 %v455_v46  ;;  %841 = vperm.xlu1 %5174, %v810_v24   ;;  %v928_v46 = vld [vmem:[%s8553_s1 + $0x68] sm:$0xff] }
  0x41   :  { %4392 = vmatmul.mubr.f32.gmra.mxu0 %v76_v48  ;;  %4476 = vmatprep.subr.mxu0 %v454_v49  ;;  %v930_v48 = vld [vmem:[%s8553_s1 + $0x78] sm:$0xff] }
  0x42   :  { %4477 = vmatpush3.msra.mxu0 %v454_v49  ;;  %4394 = vmatprep.mubr.f32.mxu0 %v77_v50  ;;  %v929_v49 = vld [vmem:[%s8553_s1 + $0x70] sm:$0xff]  ;;  %v6135_v50 = vld [vmem:[%s8554_s5] ss:$0 sm:$0xff] }
  0x43   :  { %4478 = vmatprep.subr.mxu0 %v453_v51  ;;  %838 = vperm.xlu0 %5173, %v809_v25  }
  0x44   :  { %4479 = vmatpush3.msra.mxu0 %v453_v51  ;;  %847 = vperm.xlu1 %5174, %v812_v26  }
  0x45   :  { %4395 = vmatmul.mubr.f32.gmra.mxu0 %v78_v53  ;;  %4480 = vmatprep.subr.mxu0 %v452_v54 }
  0x46   :  { %4481 = vmatpush3.msra.mxu0 %v452_v54  ;;  %4397 = vmatprep.mubr.f32.mxu0 %v79_v55 }
  0x47   :  { %4482 = vmatprep.subr.mxu0 %v451_v56  ;;  %844 = vperm.xlu0 %5173, %v811_v27  }
  0x48   :  { %4483 = vmatpush3.msra.mxu0 %v451_v56  ;;  %853 = vperm.xlu1 %5174, %v814_v28  }
  0x49   :  { %4398 = vmatmul.mubr.f32.gmra.mxu0 %v80_v57  ;;  %4484 = vmatprep.subr.mxu0 %v450_v58 }
  0x4a   :  { %4485 = vmatpush3.msra.mxu0 %v450_v58  ;;  %4488 = vmatprep.mubr.f32.mxu0 %v433_v59 }
  0x4b   :  { %4486 = vmatprep.subr.mxu0 %v449_v60  ;;  %850 = vperm.xlu0 %5173, %v813_v29  }
  0x4c   :  { %4487 = vmatpush3.msra.mxu0 %v449_v60  ;;  %859 = vperm.xlu1 %5174, %v816_v30   ;;  %v8573_v60 = vlaneseq  ;;  %v641_v30 = vld [vmem:[%s8551_s10 + $0x40] sm:$0xff] }
  0x4d   :  { %4489 = vmatmul.mubr.f32.vlgmr.msra.gmra.mxu0 %v434_v61 }
  0x4e   :  { %4491 = vmatprep.mubr.f32.mxu0 %v435_v62  ;;  %v647_v62 = vld [vmem:[%s8551_s10 + $0x70] sm:$0xff] }
  0x4f   :  { %856 = vperm.xlu0 %5173, %v815_v31  }
  0x50   :  { %865 = vperm.xlu1 %5174, %v818_v32  }
  0x51   :  { %4492 = vmatmul.mubr.f32.gmra.mxu0 %v436_v63 }
  0x52   :  { %4494 = vmatprep.mubr.f32.mxu0 %v437_v0 }
  0x53   :  { %862 = vperm.xlu0 %5173, %v817_v33  }
  0x54   :  { %935 = vperm.xlu1 %5174, %v916_v34  }
  0x55   :  { %4495 = vmatmul.mubr.f32.gmra.mxu0 %v438_v1  ;;  %v646_v1 = vld [vmem:[%s8551_s10 + $0x68] sm:$0xff] }
  0x56   :  { %4497 = vmatprep.mubr.f32.mxu0 %v439_v2 }
  0x57   :  { %932 = vperm.xlu0 %5173, %v915_v35   ;;  %v640_v35 = vld [vmem:[%s8551_s10 + $0x38] sm:$0xff] }
  0x58   :  { %941 = vperm.xlu1 %5174, %v918_v36  }
  0x59   :  { %4498 = vmatmul.mubr.f32.gmra.mxu0 %v440_v3 }
  0x5a   :  { %4500 = vmatprep.mubr.f32.mxu0 %v441_v4 }
  0x5b   :  { %938 = vperm.xlu0 %5173, %v917_v37  }
  0x5c   :  { %947 = vperm.xlu1 %5174, %v920_v38  }
  0x5d   :  { %4501 = vmatmul.mubr.f32.gmra.mxu0 %v442_v5  ;;  %v6150_v5 = vand.u32 127, %v8573_v60 }
  0x5e   :  { %4503 = vmatprep.mubr.f32.mxu0 %v443_v6 }
  0x5f   :  { %944 = vperm.xlu0 %5173, %v919_v39   ;;  %8681 = vst [vmem:[#allocation2_spill] sm:$0xff] %v6150_v5 }
  0x60   :  { %953 = vperm.xlu1 %5174, %v922_v40  }
  0x61   :  { %4504 = vmatmul.mubr.f32.gmra.mxu0 %v444_v7  ;;  %v645_v7 = vld [vmem:[%s8551_s10 + $0x60] sm:$0xff] }
  0x62   :  { %4506 = vmatprep.mubr.f32.mxu0 %v445_v8 }
  0x63   :  { %950 = vperm.xlu0 %5173, %v921_v41  }
  0x64   :  { %959 = vperm.xlu1 %5174, %v924_v42   ;;  %v639_v42 = vld [vmem:[%s8551_s10 + $0x30] sm:$0xff] }
  0x65   :  { %4507 = vmatmul.mubr.f32.gmra.mxu0 %v446_v9 }
  0x66   :  { %4509 = vmatprep.mubr.f32.mxu0 %v447_v10  ;;  %v644_v10 = vld [vmem:[%s8551_s10 + $0x58] sm:$0xff] }
  0x67   :  { %956 = vperm.xlu0 %5173, %v923_v43  }
  0x68   :  { %965 = vperm.xlu1 %5174, %v926_v44  }
  0x69   :  { %4510 = vmatmul.mubr.f32.gmra.mxu0 %v448_v11 }
  0x6b   :  { %962 = vperm.xlu0 %5173, %v925_v45  }
  0x6c   :  { %971 = vperm.xlu1 %5174, %v928_v46  }
  0x6f   :  { %968 = vperm.xlu0 %5173, %v927_v47   ;;  %v638_v47 = vld [vmem:[%s8551_s10 + $0x28] sm:$0xff] }
  0x70   :  { %977 = vperm.xlu1 %5174, %v930_v48  }
  0x73   :  { %974 = vperm.xlu0 %5173, %v929_v49  }
  0xaf   :  { %v6159_v11 = vpop.permute.xlu1 %826 }
  0xb0   :  { %8682 = vst [vmem:[#allocation3_spill] sm:$0xff] %v6159_v11  ;;  %vm869_vm0 = vcmp.eq.s32.totalorder %v6150_v5, %v6159_v11 }
  0xb1   :  { %v6176_v19 = vsel %vm869_vm0, 1.0, %v5681_v18 }
  0xb2   :  { %v6161_v12 = vpop.permute.xlu0 %820  ;;  %8684 = vst [vmem:[#allocation5_spill] sm:$0xff] %v6176_v19 }
  0xb3   :  { %8683 = vst [vmem:[#allocation4_spill] sm:$0xff] %v6161_v12  ;;  %vm867_vm1 = vcmp.eq.s32.totalorder %v6150_v5, %v6161_v12  ;;  %v6187_v24 = vpop.permute.xlu1 %829 }
  0xb4   :  { %v6182_v20 = vsel %vm867_vm1, 1.0, %v5681_v18  ;;  %8686 = vst [vmem:[#allocation7_spill] sm:$0xff] %v6187_v24  ;;  %vm870_vm2 = vcmp.eq.s32.totalorder %v6150_v5, %v6187_v24 }
  0xb5   :  { %8685 = vst [vmem:[#allocation6_spill] sm:$0xff] %v6182_v20  ;;  %v6204_v31 = vsel %vm870_vm2, 1.0, %v5681_v18 }
  0xb6   :  { %v6189_v25 = vpop.permute.xlu0 %823  ;;  %8688 = vst [vmem:[#allocation9_spill] sm:$0xff] %v6204_v31 }
  0xb7   :  { %8687 = vst [vmem:[#allocation8_spill] sm:$0xff] %v6189_v25  ;;  %vm868_vm3 = vcmp.eq.s32.totalorder %v6150_v5, %v6189_v25  ;;  %v6215_v36 = vpop.permute.xlu1 %835 }
  0xb8   :  { %v6210_v32 = vsel %vm868_vm3, 1.0, %v5681_v18  ;;  %8690 = vst [vmem:[#allocation11_spill] sm:$0xff] %v6215_v36  ;;  %vm872_vm4 = vcmp.eq.s32.totalorder %v6150_v5, %v6215_v36 }
  0xb9   :  { %8689 = vst [vmem:[#allocation10_spill] sm:$0xff] %v6210_v32  ;;  %v6232_v43 = vsel %vm872_vm4, 1.0, %v5681_v18 }
  0xba   :  { %v6217_v37 = vpop.permute.xlu0 %832  ;;  %8692 = vst [vmem:[#allocation13_spill] sm:$0xff] %v6232_v43 }
  0xbb   :  { %8691 = vst [vmem:[#allocation12_spill] sm:$0xff] %v6217_v37  ;;  %vm871_vm5 = vcmp.eq.s32.totalorder %v6150_v5, %v6217_v37  ;;  %v6243_v48 = vpop.permute.xlu1 %841 }
  0xbc   :  { %v6238_v44 = vsel %vm871_vm5, 1.0, %v5681_v18  ;;  %8694 = vst [vmem:[#allocation15_spill] sm:$0xff] %v6243_v48  ;;  %vm8637_vm6 = vcmp.eq.s32.totalorder %v6150_v5, %v6243_v48 }
  0xbd   :  { %8693 = vst [vmem:[#allocation14_spill] sm:$0xff] %v6238_v44 }
  0xbe   :  { %v6245_v49 = vpop.permute.xlu0 %838 }
  0xbf   :  { %8695 = vst [vmem:[#allocation16_spill] sm:$0xff] %v6245_v49  ;;  %vm873_vm7 = vcmp.eq.s32.totalorder %v6150_v5, %v6245_v49 }
  0xed   :  { %v4378_v51 = vpop.f32.mrf.mxu0 }
  0xee   :  { %v176_v52 = vadd.f32 %v4378_v51, %v6135_v50 }
  0xef   :  { %v170_v53 = vpop.f32.mrf.mxu0 }
  0xf0   :  { %v171_v54 = vadd.f32 %v6135_v50, %v170_v53  ;;  %v250_v57 = vmax.f32 %v176_v52, 0.0 }
  0xf1   :  { %v4381_v55 = vpop.f32.mrf.mxu0 }
  0xf2   :  { %v249_v56 = vmax.f32 %v171_v54, 0.0  ;;  %v186_v58 = vadd.f32 %v4381_v55, %v6135_v50  ;;  %v637_v55 = vld [vmem:[%s8551_s10 + $0x20] sm:$0xff] }
  0xf3   :  { %v180_v59 = vpop.f32.mrf.mxu0 }
  0xf4   :  { %v181_v61 = vadd.f32 %v6135_v50, %v180_v59  ;;  %4432 = vmatprep.mubr.f32.mxu1 %v249_v56  ;;  %v252_v2 = vmax.f32 %v186_v58, 0.0  ;;  %v6260_v56 = vsel %vm8637_vm6, 1.0, %v5681_v18 }
  0xf5   :  { %v4384_v63 = vpop.f32.mrf.mxu0  ;;  %4433 = vmatmul.mubr.f32.vlgmr.msra.gmra.mxu1 %v250_v57  ;;  %8696 = vst [vmem:[#allocation17_spill] sm:$0xff] %v6260_v56  ;;  %v6266_v57 = vsel %vm873_vm7, 1.0, %v5681_v18 }
  0xf6   :  { %v251_v0 = vmax.f32 %v181_v61, 0.0  ;;  %4513 = vmatpush3.msra.mxu1 %v6033_v16  ;;  %v196_v3 = vadd.f32 %v4384_v63, %v6135_v50  ;;  %8697 = vst [vmem:[#allocation18_spill] sm:$0xff] %v6266_v57  ;;  %v636_v61 = vld [vmem:[%s8551_s10 + $0x18] sm:$0xff]  ;;  %v6273_v63 = vpop.permute.xlu0 %844 }
  0xf7   :  { %v190_v4 = vpop.f32.mrf.mxu0  ;;  %4514 = vmatprep.subr.mxu1 %v647_v62  ;;  %8699 = vst [vmem:[#allocation20_spill] sm:$0xff] %v6273_v63  ;;  %vm8636_vm9 = vcmp.eq.s32.totalorder %v6150_v5, %v6273_v63 }
  0xf8   :  { %v191_v6 = vadd.f32 %v6135_v50, %v190_v4  ;;  %4435 = vmatprep.mubr.f32.mxu1 %v251_v0  ;;  %4515 = vmatpush3.msra.mxu1 %v647_v62  ;;  %v254_v13 = vmax.f32 %v196_v3, 0.0  ;;  %v6271_v62 = vpop.permute.xlu1 %847  ;;  %v6284_v4 = vld [vmem:[%s8555_s9] ss:$0 sm:$0xff] }
  0xf9   :  { %v4387_v8 = vpop.f32.mrf.mxu0  ;;  %4436 = vmatmul.mubr.f32.gmra.mxu1 %v252_v2  ;;  %4516 = vmatprep.subr.mxu1 %v646_v1  ;;  %8698 = vst [vmem:[#allocation19_spill] sm:$0xff] %v6271_v62  ;;  %vm8638_vm8 = vcmp.eq.s32.totalorder %v6150_v5, %v6271_v62 }
  0xfa   :  { %v253_v9 = vmax.f32 %v191_v6, 0.0  ;;  %4517 = vmatpush3.msra.mxu1 %v646_v1  ;;  %v206_v14 = vadd.f32 %v4387_v8, %v6135_v50  ;;  %v635_v6 = vld [vmem:[%s8551_s10 + $0x10] sm:$0xff] }
  0xfb   :  { %v200_v15 = vpop.f32.mrf.mxu0  ;;  %4518 = vmatprep.subr.mxu1 %v645_v7 }
  0xfc   :  { %v201_v16 = vadd.f32 %v6135_v50, %v200_v15  ;;  %4438 = vmatprep.mubr.f32.mxu1 %v253_v9  ;;  %4519 = vmatpush3.msra.mxu1 %v645_v7  ;;  %v256_v26 = vmax.f32 %v206_v14, 0.0  ;;  %v6293_v7 = vsel %vm8638_vm8, 1.0, %v5681_v18  ;;  %v6306_v14 = vpop.permute.xlu0 %850 }
  0xfd   :  { %v4390_v21 = vpop.f32.mrf.mxu0  ;;  %4439 = vmatmul.mubr.f32.gmra.mxu1 %v254_v13  ;;  %4520 = vmatprep.subr.mxu1 %v644_v10  ;;  %8700 = vst [vmem:[#allocation21_spill] sm:$0xff] %v6293_v7  ;;  %v6304_v13 = vpop.permute.xlu1 %853  ;;  %8703 = vst [vmem:[#allocation24_spill] sm:$0xff] %v6306_v14  ;;  %vm8566_vm11 = vcmp.eq.s32.totalorder %v6150_v5, %v6306_v14 }
  0xfe   :  { %v255_v22 = vmax.f32 %v201_v16, 0.0  ;;  %4521 = vmatpush3.msra.mxu1 %v644_v10  ;;  %v216_v27 = vadd.f32 %v4390_v21, %v6135_v50  ;;  %v634_v10 = vld [vmem:[%s8551_s10 + $0x8] sm:$0xff]  ;;  %8702 = vst [vmem:[#allocation23_spill] sm:$0xff] %v6304_v13  ;;  %vm8563_vm10 = vcmp.eq.s32.totalorder %v6150_v5, %v6304_v13 }
  0xff   :  { %v210_v28 = vpop.f32.mrf.mxu0  ;;  %4522 = vmatprep.subr.mxu1 %v643_v17 }
 0x100   :  { %v211_v29 = vadd.f32 %v6135_v50, %v210_v28  ;;  %4441 = vmatprep.mubr.f32.mxu1 %v255_v22  ;;  %4523 = vmatpush3.msra.mxu1 %v643_v17  ;;  %v258_v38 = vmax.f32 %v216_v27, 0.0  ;;  %v633_v22 = vld [vmem:[%s8551_s10] sm:$0xff] }
 0x101   :  { %v4393_v33 = vpop.f32.mrf.mxu0  ;;  %4442 = vmatmul.mubr.f32.gmra.mxu1 %v256_v26  ;;  %4524 = vmatprep.subr.mxu1 %v642_v23  ;;  %v6327_v26 = vsel %vm8566_vm11, 1.0, %v5681_v18 }
 0x102   :  { %v257_v34 = vmax.f32 %v211_v29, 0.0  ;;  %4525 = vmatpush3.msra.mxu1 %v642_v23  ;;  %v226_v39 = vadd.f32 %v4393_v33, %v6135_v50  ;;  %v6321_v23 = vsel %vm8563_vm10, 1.0, %v5681_v18  ;;  %8705 = vst [vmem:[#allocation26_spill] sm:$0xff] %v6327_v26  ;;  %v6329_v29 = vpop.permute.xlu1 %859 }
 0x103   :  { %v220_v40 = vpop.f32.mrf.mxu0  ;;  %4526 = vmatprep.subr.mxu1 %v641_v30  ;;  %8704 = vst [vmem:[#allocation25_spill] sm:$0xff] %v6321_v23  ;;  %8706 = vst [vmem:[#allocation27_spill] sm:$0xff] %v6329_v29  ;;  %vm8560_vm12 = vcmp.eq.s32.totalorder %v6150_v5, %v6329_v29 }
 0x104   :  { %v221_v41 = vadd.f32 %v6135_v50, %v220_v40  ;;  %4444 = vmatprep.mubr.f32.mxu1 %v257_v34  ;;  %4527 = vmatpush3.msra.mxu1 %v641_v30  ;;  %v260_v51 = vmax.f32 %v226_v39, 0.0  ;;  %v6331_v30 = vpop.permute.xlu0 %856  ;;  %v6343_v39 = vsel %vm8560_vm12, 1.0, %v5681_v18 }
 0x105   :  { %v4396_v45 = vpop.f32.mrf.mxu0  ;;  %4445 = vmatmul.mubr.f32.gmra.mxu1 %v258_v38  ;;  %4528 = vmatprep.subr.mxu1 %v640_v35  ;;  %8707 = vst [vmem:[#allocation28_spill] sm:$0xff] %v6331_v30  ;;  %vm8562_vm13 = vcmp.eq.s32.totalorder %v6150_v5, %v6331_v30  ;;  %8708 = vst [vmem:[#allocation29_spill] sm:$0xff] %v6343_v39  ;;  %v3823_v39 = vld [vmem:[%s8556_s7] ss:$0 sm:$0xff] }
 0x106   :  { %v259_v46 = vmax.f32 %v221_v41, 0.0  ;;  %4529 = vmatpush3.msra.mxu1 %v640_v35  ;;  %v236_v52 = vadd.f32 %v4396_v45, %v6135_v50  ;;  %v6349_v40 = vsel %vm8562_vm13, 1.0, %v5681_v18  ;;  %v6351_v45 = vpop.permute.xlu1 %865 }
 0x107   :  { %v230_v53 = vpop.f32.mrf.mxu0  ;;  %4530 = vmatprep.subr.mxu1 %v639_v42  ;;  %8709 = vst [vmem:[#allocation30_spill] sm:$0xff] %v6349_v40  ;;  %8710 = vst [vmem:[#allocation31_spill] sm:$0xff] %v6351_v45  ;;  %vm8559_vm14 = vcmp.eq.s32.totalorder %v6150_v5, %v6351_v45 }
 0x108   :  { %v231_v54 = vadd.f32 %v6135_v50, %v230_v53  ;;  %4447 = vmatprep.mubr.f32.mxu1 %v259_v46  ;;  %4531 = vmatpush3.msra.mxu1 %v639_v42  ;;  %v262_v0 = vmax.f32 %v236_v52, 0.0  ;;  %v6353_v46 = vpop.permute.xlu0 %862 }
 0x109   :  { %v4399_v58 = vpop.f32.mrf.mxu0  ;;  %4448 = vmatmul.mubr.f32.gmra.mxu1 %v260_v51  ;;  %4532 = vmatprep.subr.mxu1 %v638_v47  ;;  %8711 = vst [vmem:[#allocation32_spill] sm:$0xff] %v6353_v46  ;;  %vm8561_vm15 = vcmp.eq.s32.totalorder %v6150_v5, %v6353_v46 }
 0x10a   :  { %v261_v59 = vmax.f32 %v231_v54, 0.0  ;;  %4533 = vmatpush3.msra.mxu1 %v638_v47  ;;  %v246_v1 = vadd.f32 %v4399_v58, %v6135_v50  ;;  %v6365_v54 = vsel %vm8559_vm14, 1.0, %v5681_v18 }
 0x10b   :  { %v240_v2 = vpop.f32.mrf.mxu0  ;;  %4534 = vmatprep.subr.mxu1 %v637_v55  ;;  %8712 = vst [vmem:[#allocation33_spill] sm:$0xff] %v6365_v54 }
 0x10c   :  { %v241_v3 = vadd.f32 %v6135_v50, %v240_v2  ;;  %4450 = vmatprep.mubr.f32.mxu1 %v261_v59  ;;  %4535 = vmatpush3.msra.mxu1 %v637_v55  ;;  %v6299_v50 = vsel %vm8636_vm9, 1.0, %v5681_v18  ;;  %v264_v15 = vmax.f32 %v246_v1, 0.0  ;;  %v6371_v55 = vsel %vm8561_vm15, 1.0, %v5681_v18 }
 0x10d   :  { %8701 = vst [vmem:[#allocation22_spill] sm:$0xff] %v6299_v50  ;;  %4451 = vmatmul.mubr.f32.gmra.mxu1 %v262_v0  ;;  %v4490_v8 = vpop.f32.mrf.mxu0  ;;  %4536 = vmatprep.subr.mxu1 %v636_v61  ;;  %8713 = vst [vmem:[#allocation34_spill] sm:$0xff] %v6371_v55  ;;  %v6375_v0 = vpop.permute.xlu0 %932 }
 0x10e   :  { %v263_v9 = vmax.f32 %v241_v3, 0.0  ;;  %4537 = vmatpush3.msra.mxu1 %v636_v61  ;;  %v544_v16 = vadd.f32 %v4490_v8, %v6284_v4  ;;  %v6373_v61 = vpop.permute.xlu1 %935  ;;  %8715 = vst [vmem:[#allocation36_spill] sm:$0xff] %v6375_v0  ;;  %vm979_vm12 = vcmp.eq.s32.totalorder %v6150_v5, %v6375_v0 }
 0x10f   :  { %v538_v17 = vpop.f32.mrf.mxu0  ;;  %4538 = vmatprep.subr.mxu1 %v635_v6  ;;  %8714 = vst [vmem:[#allocation35_spill] sm:$0xff] %v6373_v61  ;;  %vm980_vm14 = vcmp.eq.s32.totalorder %v6150_v5, %v6373_v61 }
 0x110   :  { %v539_v21 = vadd.f32 %v6284_v4, %v538_v17  ;;  %4453 = vmatprep.mubr.f32.mxu1 %v263_v9  ;;  %4539 = vmatpush3.msra.mxu1 %v635_v6  ;;  %v618_v33 = vmax.f32 %v544_v16, 0.0  ;;  %v6387_v8 = vsel %vm980_vm14, 1.0, %v5681_v18  ;;  %v6393_v9 = vsel %vm979_vm12, 1.0, %v5681_v18 }
 0x111   :  { %4454 = vmatmul.mubr.f32.gmra.mxu1 %v264_v15  ;;  %v4493_v27 = vpop.f32.mrf.mxu0  ;;  %4540 = vmatprep.subr.mxu1 %v634_v10  ;;  %8716 = vst [vmem:[#allocation37_spill] sm:$0xff] %v6387_v8  ;;  %8717 = vst [vmem:[#allocation38_spill] sm:$0xff] %v6393_v9  ;;  %v6397_v17 = vpop.permute.xlu0 %938 }
 0x112   :  { %v617_v28 = vmax.f32 %v539_v21, 0.0  ;;  %4541 = vmatpush3.msra.mxu1 %v634_v10  ;;  %v554_v34 = vadd.f32 %v4493_v27, %v6284_v4  ;;  %v6395_v16 = vpop.permute.xlu1 %941  ;;  %8719 = vst [vmem:[#allocation40_spill] sm:$0xff] %v6397_v17  ;;  %vm8572_vm13 = vcmp.eq.s32.totalorder %v6150_v5, %v6397_v17 }
 0x113   :  { %v548_v35 = vpop.f32.mrf.mxu0  ;;  %4542 = vmatprep.subr.mxu1 %v633_v22  ;;  %8718 = vst [vmem:[#allocation39_spill] sm:$0xff] %v6395_v16  ;;  %vm8564_vm15 = vcmp.eq.s32.totalorder %v6150_v5, %v6395_v16 }
 0x114   :  { %v549_v38 = vadd.f32 %v6284_v4, %v548_v35  ;;  %4543 = vmatpush3.msra.mxu1 %v633_v22  ;;  %4544 = vmatprep.mubr.f32.mxu1 %v617_v28  ;;  %v620_v47 = vmax.f32 %v554_v34, 0.0  ;;  %v6415_v34 = vsel %vm8572_vm13, 1.0, %v5681_v18 }
 0x115   :  { %v4496_v41 = vpop.f32.mrf.mxu0  ;;  %4545 = vmatmul.mubr.f32.vlgmr.msra.gmra.mxu1 %v618_v33  ;;  %v6409_v33 = vsel %vm8564_vm15, 1.0, %v5681_v18  ;;  %8721 = vst [vmem:[#allocation42_spill] sm:$0xff] %v6415_v34 }
 0x116   :  { %v619_v42 = vmax.f32 %v549_v38, 0.0  ;;  %v564_v51 = vadd.f32 %v4496_v41, %v6284_v4  ;;  %8720 = vst [vmem:[#allocation41_spill] sm:$0xff] %v6409_v33  ;;  %v6417_v41 = vpop.permute.xlu1 %947 }
 0x117   :  { %v558_v52 = vpop.f32.mrf.mxu0  ;;  %8722 = vst [vmem:[#allocation43_spill] sm:$0xff] %v6417_v41  ;;  %vm8565_vm10 = vcmp.eq.s32.totalorder %v6150_v5, %v6417_v41 }
 0x118   :  { %v559_v53 = vadd.f32 %v6284_v4, %v558_v52  ;;  %4547 = vmatprep.mubr.f32.mxu1 %v619_v42  ;;  %v622_v1 = vmax.f32 %v564_v51, 0.0  ;;  %v6419_v42 = vpop.permute.xlu0 %944 }
 0x119   :  { %v4499_v58 = vpop.f32.mrf.mxu0  ;;  %4548 = vmatmul.mubr.f32.gmra.mxu1 %v620_v47  ;;  %8723 = vst [vmem:[#allocation44_spill] sm:$0xff] %v6419_v42  ;;  %vm8568_vm15 = vcmp.eq.s32.totalorder %v6150_v5, %v6419_v42 }
 0x11a   :  { %v621_v59 = vmax.f32 %v559_v53, 0.0  ;;  %v574_v2 = vadd.f32 %v4499_v58, %v6284_v4  ;;  %v6431_v58 = vsel %vm8565_vm10, 1.0, %v5681_v18 }
 0x11b   :  { %v568_v3 = vpop.f32.mrf.mxu0  ;;  %8724 = vst [vmem:[#allocation45_spill] sm:$0xff] %v6431_v58 }
 0x11c   :  { %v569_v6 = vadd.f32 %v6284_v4, %v568_v3  ;;  %4550 = vmatprep.mubr.f32.mxu1 %v621_v59  ;;  %v624_v21 = vmax.f32 %v574_v2, 0.0  ;;  %v6437_v59 = vsel %vm8568_vm15, 1.0, %v5681_v18  ;;  %v6439_v3 = vpop.permute.xlu1 %953 }
 0x11d   :  { %v4502_v10 = vpop.f32.mrf.mxu0  ;;  %4551 = vmatmul.mubr.f32.gmra.mxu1 %v622_v1  ;;  %8725 = vst [vmem:[#allocation46_spill] sm:$0xff] %v6437_v59  ;;  %8726 = vst [vmem:[#allocation47_spill] sm:$0xff] %v6439_v3  ;;  %vm8567_vm10 = vcmp.eq.s32.totalorder %v6150_v5, %v6439_v3 }
 0x11e   :  { %v623_v15 = vmax.f32 %v569_v6, 0.0  ;;  %v584_v22 = vadd.f32 %v4502_v10, %v6284_v4  ;;  %v6441_v6 = vpop.permute.xlu0 %950 }
 0x11f   :  { %v578_v27 = vpop.f32.mrf.mxu0  ;;  %8727 = vst [vmem:[#allocation48_spill] sm:$0xff] %v6441_v6  ;;  %vm8569_vm11 = vcmp.eq.s32.totalorder %v6150_v5, %v6441_v6 }
 0x120   :  { %v579_v28 = vadd.f32 %v6284_v4, %v578_v27  ;;  %4553 = vmatprep.mubr.f32.mxu1 %v623_v15  ;;  %v626_v47 = vmax.f32 %v584_v22, 0.0  ;;  %v6453_v27 = vsel %vm8567_vm10, 1.0, %v5681_v18 }
 0x121   :  { %v4505_v35 = vpop.f32.mrf.mxu0  ;;  %4554 = vmatmul.mubr.f32.gmra.mxu1 %v624_v21  ;;  %8728 = vst [vmem:[#allocation49_spill] sm:$0xff] %v6453_v27 }
 0x122   :  { %v625_v38 = vmax.f32 %v579_v28, 0.0  ;;  %v594_v51 = vadd.f32 %v4505_v35, %v6284_v4  ;;  %v6459_v28 = vsel %vm8569_vm11, 1.0, %v5681_v18 }
 0x123   :  { %v588_v52 = vpop.f32.mrf.mxu0  ;;  %8729 = vst [vmem:[#allocation50_spill] sm:$0xff] %v6459_v28 }
 0x124   :  { %v589_v53 = vadd.f32 %v6284_v4, %v588_v52  ;;  %4556 = vmatprep.mubr.f32.mxu1 %v625_v38  ;;  %v628_v10 = vmax.f32 %v594_v51, 0.0  ;;  %v6463_v51 = vpop.permute.xlu0 %956 }
 0x125   :  { %v4508_v1 = vpop.f32.mrf.mxu0  ;;  %4557 = vmatmul.mubr.f32.gmra.mxu1 %v626_v47  ;;  %v6461_v47 = vpop.permute.xlu1 %959  ;;  %8731 = vst [vmem:[#allocation52_spill] sm:$0xff] %v6463_v51  ;;  %vm8571_vm15 = vcmp.eq.s32.totalorder %v6150_v5, %v6463_v51 }
 0x126   :  { %v627_v2 = vmax.f32 %v589_v53, 0.0  ;;  %v604_v15 = vadd.f32 %v4508_v1, %v6284_v4  ;;  %8730 = vst [vmem:[#allocation51_spill] sm:$0xff] %v6461_v47  ;;  %vm8570_vm10 = vcmp.eq.s32.totalorder %v6150_v5, %v6461_v47 }
 0x127   :  { %v598_v21 = vpop.f32.mrf.mxu0 }
 0x128   :  { %v599_v22 = vadd.f32 %v6284_v4, %v598_v21  ;;  %4559 = vmatprep.mubr.f32.mxu1 %v627_v2  ;;  %v630_v52 = vmax.f32 %v604_v15, 0.0  ;;  %v6481_v15 = vsel %vm8571_vm15, 1.0, %v5681_v18 }
 0x129   :  { %v4511_v35 = vpop.f32.mrf.mxu0  ;;  %4560 = vmatmul.mubr.f32.gmra.mxu1 %v628_v10  ;;  %v6475_v10 = vsel %vm8570_vm10, 1.0, %v5681_v18  ;;  %8733 = vst [vmem:[#allocation54_spill] sm:$0xff] %v6481_v15 }
 0x12a   :  { %v629_v38 = vmax.f32 %v599_v22, 0.0  ;;  %v614_v53 = vadd.f32 %v4511_v35, %v6284_v4  ;;  %8732 = vst [vmem:[#allocation53_spill] sm:$0xff] %v6475_v10  ;;  %v6483_v22 = vpop.permute.xlu1 %965  ;;  %v6485_v35 = vpop.permute.xlu0 %962 }
 0x12b   :  { %v608_v1 = vpop.f32.mrf.mxu0  ;;  %8734 = vst [vmem:[#allocation55_spill] sm:$0xff] %v6483_v22  ;;  %8735 = vst [vmem:[#allocation56_spill] sm:$0xff] %v6485_v35  ;;  %vm8574_vm11 = vcmp.eq.s32.totalorder %v6150_v5, %v6483_v22  ;;  %vm8575_vm10 = vcmp.eq.s32.totalorder %v6150_v5, %v6485_v35 }
 0x12c   :  { %v609_v2 = vadd.f32 %v6284_v4, %v608_v1  ;;  %4562 = vmatprep.mubr.f32.mxu1 %v629_v38  ;;  %v632_v4 = vmax.f32 %v614_v53, 0.0  ;;  %v6495_v38 = vsel %vm8574_vm11, 1.0, %v5681_v18 }
 0x12d   :  { %4563 = vmatmul.mubr.f32.gmra.mxu1 %v630_v52  ;;  %8736 = vst [vmem:[#allocation57_spill] sm:$0xff] %v6495_v38  ;;  %v6501_v52 = vsel %vm8575_vm10, 1.0, %v5681_v18 }
 0x12e   :  { %v631_v21 = vmax.f32 %v609_v2, 0.0  ;;  %8737 = vst [vmem:[#allocation58_spill] sm:$0xff] %v6501_v52  ;;  %v6503_v53 = vpop.permute.xlu1 %971  ;;  %v6505_v1 = vpop.permute.xlu0 %968 }
 0x12f   :  { %8738 = vst [vmem:[#allocation59_spill] sm:$0xff] %v6503_v53  ;;  %8739 = vst [vmem:[#allocation60_spill] sm:$0xff] %v6505_v1  ;;  %vm992_vm15 = vcmp.eq.s32.totalorder %v6150_v5, %v6503_v53  ;;  %vm991_vm13 = vcmp.eq.s32.totalorder %v6150_v5, %v6505_v1 }
 0x130   :  { %4565 = vmatprep.mubr.f32.mxu1 %v631_v21  ;;  %v6515_v2 = vsel %vm992_vm15, 1.0, %v5681_v18  ;;  %v6521_v21 = vsel %vm991_vm13, 1.0, %v5681_v18 }
 0x131   :  { %4566 = vmatmul.mubr.f32.gmra.mxu1 %v632_v4  ;;  %8740 = vst [vmem:[#allocation61_spill] sm:$0xff] %v6515_v2  ;;  %8741 = vst [vmem:[#allocation62_spill] sm:$0xff] %v6521_v21 }
 0x132   :  { %v6523_v4 = vpop.permute.xlu1 %977  ;;  %v6525_v60 = vpop.permute.xlu0 %974 }
 0x133   :  { %8742 = vst [vmem:[#allocation63_spill] sm:$0xff] %v6523_v4  ;;  %8743 = vst [vmem:[#allocation64_spill] sm:$0xff] %v6525_v60  ;;  %vm994_vm11 = vcmp.eq.s32.totalorder %v6150_v5, %v6523_v4  ;;  %vm993_vm10 = vcmp.eq.s32.totalorder %v6150_v5, %v6525_v60 }
 0x134   :  { %v6535_v54 = vsel %vm994_vm11, 1.0, %v5681_v18  ;;  %v6541_v55 = vsel %vm993_vm10, 1.0, %v5681_v18 }
 0x135   :  { %8744 = vst [vmem:[#allocation65_spill] sm:$0xff] %v6535_v54  ;;  %8745 = vst [vmem:[#allocation66_spill] sm:$0xff] %v6541_v55 }
 0x1b5   :  { %v4434_v2 = vpop.f32.mrf.mxu1 }
 0x1b6   :  { %v6546_v40 = vadd.f32 %v4434_v2, %v3823_v39  }
 0x1b7   :  { %v354_v21 = vpop.f32.mrf.mxu1 }
 0x1b8   :  { %v6548_v23 = vadd.f32 %v3823_v39, %v354_v21  }
 0x1b9   :  { %v4437_v38 = vpop.f32.mrf.mxu1 }
 0x1ba   :  { %v6550_v26 = vadd.f32 %v4437_v38, %v3823_v39  }
 0x1bb   :  { %v364_v54 = vpop.f32.mrf.mxu1 }
 0x1bc   :  { %v6552_v52 = vadd.f32 %v3823_v39, %v364_v54  }
 0x1bd   :  { %v4440_v7 = vpop.f32.mrf.mxu1 }
 0x1be   :  { %v6554_v10 = vadd.f32 %v4440_v7, %v3823_v39  }
 0x1bf   :  { %v374_v18 = vpop.f32.mrf.mxu1 }
 0x1c0   :  { %v6556_v55 = vadd.f32 %v3823_v39, %v374_v18  }
 0x1c1   :  { %v4443_v50 = vpop.f32.mrf.mxu1 }
 0x1c2   :  { %v6558_v15 = vadd.f32 %v4443_v50, %v3823_v39  }
 0x1c3   :  { %v384_v2 = vpop.f32.mrf.mxu1 }
 0x1c4   :  { %v6560_v56 = vadd.f32 %v3823_v39, %v384_v2  }
 0x1c5   :  { %v4446_v21 = vpop.f32.mrf.mxu1 }
 0x1c6   :  { %v6562_v27 = vadd.f32 %v4446_v21, %v3823_v39   ;;  %v3825_v21 = vld [vmem:[%s8557_s11] ss:$0 sm:$0xff]  ;;  %s6649_s11 = smov 0  }
 0x1c7   :  { %v394_v38 = vpop.f32.mrf.mxu1 }
 0x1c8   :  { %v6564_v57 = vadd.f32 %v3823_v39, %v394_v38  }
 0x1c9   :  { %v4449_v54 = vpop.f32.mrf.mxu1 }
 0x1ca   :  { %v6566_v28 = vadd.f32 %v4449_v54, %v3823_v39  }
 0x1cb   :  { %v404_v7 = vpop.f32.mrf.mxu1 }
 0x1cc   :  { %v6568_v43 = vadd.f32 %v3823_v39, %v404_v7  }
 0x1cd   :  { %v4452_v18 = vpop.f32.mrf.mxu1 }
 0x1ce   :  { %v420_v58 = vadd.f32 %v4452_v18, %v3823_v39  }
 0x1cf   :  { %v414_v44 = vpop.f32.mrf.mxu1 }
 0x1d0   :  { %v415_v50 = vadd.f32 %v3823_v39, %v414_v44  }
 0x1d1   :  { %v4455_v59 = vpop.f32.mrf.mxu1 }
 0x1d2   :  { %v430_v31 = vadd.f32 %v4455_v59, %v3823_v39  }
 0x1d3   :  { %v424_v2 = vpop.f32.mrf.mxu1 }
 0x1d4   :  { %v425_v33 = vadd.f32 %v3823_v39, %v424_v2  }
 0x1d5   :  { %v4546_v38 = vpop.f32.mrf.mxu1 }
 0x1d6   :  { %v728_v19 = vadd.f32 %v4546_v38, %v3825_v21  }
 0x1d7   :  { %v722_v34 = vpop.f32.mrf.mxu1 }
 0x1d8   :  { %v723_v54 = vadd.f32 %v3825_v21, %v722_v34  }
 0x1d9   :  { %v4549_v32 = vpop.f32.mrf.mxu1 }
 0x1da   :  { %v738_v8 = vadd.f32 %v4549_v32, %v3825_v21  }
 0x1db   :  { %v732_v7 = vpop.f32.mrf.mxu1 }
 0x1dc   :  { %v733_v20 = vadd.f32 %v3825_v21, %v732_v7  }
 0x1dd   :  { %v4552_v9 = vpop.f32.mrf.mxu1 }
 0x1de   :  { %v748_v18 = vadd.f32 %v4552_v9, %v3825_v21  }
 0x1df   :  { %v742_v4 = vpop.f32.mrf.mxu1 }
 0x1e0   :  { %v743_v44 = vadd.f32 %v3825_v21, %v742_v4  }
 0x1e1   :  { %v4555_v60 = vpop.f32.mrf.mxu1 }
 0x1e2   :  { %v758_v59 = vadd.f32 %v4555_v60, %v3825_v21  }
 0x1e3   :  { %v752_v53 = vpop.f32.mrf.mxu1 }
 0x1e4   :  { %v753_v1 = vadd.f32 %v3825_v21, %v752_v53  }
 0x1e5   :  { %v4558_v22 = vpop.f32.mrf.mxu1 }
 0x1e6   :  { %v768_v35 = vadd.f32 %v4558_v22, %v3825_v21  }
 0x1e7   :  { %v762_v47 = vpop.f32.mrf.mxu1 }
 0x1e8   :  { %v763_v39 = vadd.f32 %v3825_v21, %v762_v47  }
 0x1e9   :  { %v4561_v2 = vpop.f32.mrf.mxu1 }
 0x1ea   :  { %v778_v38 = vadd.f32 %v4561_v2, %v3825_v21  }
 0x1eb   :  { %v772_v51 = vpop.f32.mrf.mxu1 }
 0x1ec   :  { %v773_v34 = vadd.f32 %v3825_v21, %v772_v51  }
 0x1ed   :  { %v4564_v45 = vpop.f32.mrf.mxu1 }
 0x1ee   :  { %v788_v32 = vadd.f32 %v4564_v45, %v3825_v21  }
 0x1ef   :  { %v782_v3 = vpop.f32.mrf.mxu1 }
 0x1f0   :  { %v783_v7 = vadd.f32 %v3825_v21, %v782_v3  }
 0x1f1   :  { %v4567_v46 = vpop.f32.mrf.mxu1 }
 0x1f2   :  { %v798_v9 = vadd.f32 %v4567_v46, %v3825_v21  }
 0x1f3   :  { %v792_v6 = vpop.f32.mrf.mxu1 }
 0x1f4   :  { %v793_v4 = vadd.f32 %v3825_v21, %v792_v6  }
 0x1f5 LB: > { %v8746_v5 = vld [vmem:[#allocation2_spill] sm:$0xff]  ;;  %8747 = vst [vmem:[#allocation67_spill] sm:$0xff] %v5550_v9  ;;  %8748 = vst [vmem:[#allocation68_spill] sm:$0xff] %v5554_v4  ;;  %v8588_v60 = vmov 0.0   ;;  %s3943_s26 = smul.u32 640, %s5678_s11  ;;  %s8779_s23 = sld [smem:[#allocation135_spill]]  ;;  %v5550_v9 = vphi %v798_v9, %v9005_v9   ;;  %s5678_s11 = sphi %s6649_s11, %s9037_s11   ;;  %v5674_v23 = vphi %v6548_v23, %v9036_v23   ;;  %v5670_v40 = vphi %v6546_v40, %v9035_v40   ;;  %v5666_v52 = vphi %v6552_v52, %v9034_v52   ;;  %v5662_v26 = vphi %v6550_v26, %v9033_v26   ;;  %v5658_v55 = vphi %v6556_v55, %v9032_v55   ;;  %v5654_v10 = vphi %v6554_v10, %v9031_v10   ;;  %v5650_v56 = vphi %v6560_v56, %v9030_v56   ;;  %v5646_v15 = vphi %v6558_v15, %v9029_v15   ;;  %v5642_v57 = vphi %v6564_v57, %v9028_v57   ;;  %v5638_v27 = vphi %v6562_v27, %v9027_v27   ;;  %v5634_v43 = vphi %v6568_v43, %v9026_v43   ;;  %v5630_v28 = vphi %v6566_v28, %v9025_v28   ;;  %v5626_v50 = vphi %v415_v50, %v9024_v50   ;;  %v5622_v58 = vphi %v420_v58, %v9023_v58   ;;  %v5618_v33 = vphi %v425_v33, %v9022_v33   ;;  %v5614_v31 = vphi %v430_v31, %v9021_v31   ;;  %v5610_v54 = vphi %v723_v54, %v9020_v54   ;;  %v5606_v19 = vphi %v728_v19, %v9019_v19   ;;  %v5602_v20 = vphi %v733_v20, %v9018_v20   ;;  %v5598_v8 = vphi %v738_v8, %v9017_v8   ;;  %v5594_v44 = vphi %v743_v44, %v9016_v44   ;;  %v5590_v18 = vphi %v748_v18, %v9015_v18   ;;  %v5586_v1 = vphi %v753_v1, %v9014_v1   ;;  %v5582_v59 = vphi %v758_v59, %v9013_v59   ;;  %v5578_v39 = vphi %v763_v39, %v9012_v39   ;;  %v5574_v35 = vphi %v768_v35, %v9011_v35   ;;  %v5570_v34 = vphi %v773_v34, %v9010_v34   ;;  %v5566_v38 = vphi %v778_v38, %v9009_v38   ;;  %v5562_v7 = vphi %v783_v7, %v9008_v7   ;;  %v5558_v32 = vphi %v788_v32, %v9007_v32   ;;  %v5554_v4 = vphi %v793_v4, %v9006_v4  }
 0x1f6   : > { %8749 = vst [vmem:[#allocation69_spill] sm:$0xff] %v5558_v32  ;;  %8750 = vst [vmem:[#allocation70_spill] sm:$0xff] %v5562_v7  ;;  %1241 = vmatprep.mubr.f32.mxu0 %v8588_v60  ;;  %1402 = vmatprep.mubr.f32.mxu1 %v8588_v60  ;;  %s3859_s0 = sshll.u32 %s5678_s11, 7  ;;  %s8781_s6 = sld [smem:[#allocation137_spill]] }
 0x1f7   : > { %8751 = vst [vmem:[#allocation71_spill] sm:$0xff] %v5566_v38  ;;  %8752 = vst [vmem:[#allocation72_spill] sm:$0xff] %v5570_v34  ;;  %s1148_s4 = smul.u32 5, %s5678_s11  ;;  %s8802_s5 = sld [smem:[#allocation136_spill]] }
 0x1f8   : > { %8753 = vst [vmem:[#allocation73_spill] sm:$0xff] %v5574_v35  ;;  %8754 = vst [vmem:[#allocation74_spill] sm:$0xff] %v5578_v39  ;;  %s8892_s9 = sld [smem:[#allocation138_spill]]  ;;  %s1032_s25 = sadd.s32 1, %s5678_s11  }
 0x1f9   : > { %8755 = vst [vmem:[#allocation75_spill] sm:$0xff] %v5582_v59  ;;  %8756 = vst [vmem:[#allocation76_spill] sm:$0xff] %v5586_v1  ;;  %p7974_p0 = scmp.ge.s32.totalorder %s1032_s25, 2  }
 0x1fa   : > { %8757 = vst [vmem:[#allocation77_spill] sm:$0xff] %v5590_v18  ;;  %8758 = vst [vmem:[#allocation78_spill] sm:$0xff] %v5594_v44 }
 0x1fb   : > { %8759 = vst [vmem:[#allocation79_spill] sm:$0xff] %v5598_v8  ;;  %8760 = vst [vmem:[#allocation80_spill] sm:$0xff] %v5602_v20  ;;  %s6756_s8 = scalar_lea.vmem %s8779_s23, %s3943_s26 }
 0x1fc   : > { %8761 = vst [vmem:[#allocation81_spill] sm:$0xff] %v5606_v19  ;;  %8762 = vst [vmem:[#allocation82_spill] sm:$0xff] %v5610_v54  ;;  %v1144_v45 = vld [vmem:[%s6756_s8 + $0x260] sm:$0xff]  ;;  %v1143_v46 = vld [vmem:[%s6756_s8 + $0x258] sm:$0xff]  ;;  %s6921_s30 = scalar_lea.vmem %s8781_s6, %s3859_s0 }
 0x1fd   : > { %8763 = vst [vmem:[#allocation83_spill] sm:$0xff] %v5614_v31  ;;  %8764 = vst [vmem:[#allocation84_spill] sm:$0xff] %v5618_v33  ;;  %v1146_v3 = vld [vmem:[%s6756_s8 + $0x270] sm:$0xff]  ;;  %1177 = vmatprep.subr.mxu0 %v1144_v45  ;;  %v1139_v6 = vld [vmem:[%s6756_s8 + $0x238] sm:$0xff]  ;;  %s7057_s12 = scalar_lea.vmem %s8802_s5, %s1148_s4 }
 0x1fe   : > { %8765 = vst [vmem:[#allocation85_spill] sm:$0xff] %v5622_v58  ;;  %8766 = vst [vmem:[#allocation86_spill] sm:$0xff] %v5626_v50  ;;  %1338 = vmatprep.subr.mxu1 %v1146_v3  ;;  %v1145_v47 = vld [vmem:[%s6756_s8 + $0x268] sm:$0xff]  ;;  %v1138_v51 = vld [vmem:[%s6756_s8 + $0x230] sm:$0xff]  ;;  %1178 = vmatpush1.msra.mxu0 %v1143_v46  ;;  %s1662_s13 = scalar_lea.vmem %s8892_s9, %s5678_s11  ;;  %s9037_s11 = smov %s1032_s25 }
 0x1ff   : > { %8767 = vst [vmem:[#allocation87_spill] sm:$0xff] %v5630_v28  ;;  %8768 = vst [vmem:[#allocation88_spill] sm:$0xff] %v5634_v43  ;;  %1339 = vmatpush1.msra.mxu1 %v1145_v47  ;;  %v1141_v22 = vld [vmem:[%s6756_s8 + $0x248] sm:$0xff]  ;;  %v1134_v53 = vld [vmem:[%s6756_s8 + $0x210] sm:$0xff]  ;;  %1179 = vmatprep.subr.mxu0 %v1139_v6 }
 0x200   : > { %8769 = vst [vmem:[#allocation89_spill] sm:$0xff] %v5638_v27  ;;  %8770 = vst [vmem:[#allocation90_spill] sm:$0xff] %v5642_v57  ;;  %v1140_v21 = vld [vmem:[%s6756_s8 + $0x240] sm:$0xff]  ;;  %1340 = vmatprep.subr.mxu1 %v1141_v22  ;;  %v1133_v2 = vld [vmem:[%s6756_s8 + $0x208] sm:$0xff]  ;;  %1180 = vmatpush1.msra.mxu0 %v1138_v51 }
 0x201   : > { %8771 = vst [vmem:[#allocation91_spill] sm:$0xff] %v5646_v15  ;;  %8772 = vst [vmem:[#allocation92_spill] sm:$0xff] %v5650_v56  ;;  %v1136_v45 = vld [vmem:[%s6756_s8 + $0x220] sm:$0xff]  ;;  %1341 = vmatpush1.msra.mxu1 %v1140_v21  ;;  %v1129_v3 = vld [vmem:[%s6756_s8 + $0x1e8] sm:$0xff]  ;;  %1181 = vmatprep.subr.mxu0 %v1134_v53 }
 0x202   : > { %8773 = vst [vmem:[#allocation93_spill] sm:$0xff] %v5654_v10  ;;  %8774 = vst [vmem:[#allocation94_spill] sm:$0xff] %v5658_v55  ;;  %v1135_v60 = vld [vmem:[%s6756_s8 + $0x218] sm:$0xff]  ;;  %1342 = vmatprep.subr.mxu1 %v1136_v45  ;;  %v1128_v47 = vld [vmem:[%s6756_s8 + $0x1e0] sm:$0xff]  ;;  %1182 = vmatpush1.msra.mxu0 %v1133_v2 }
 0x203   : > { %8775 = vst [vmem:[#allocation95_spill] sm:$0xff] %v5662_v26  ;;  %8776 = vst [vmem:[#allocation96_spill] sm:$0xff] %v5666_v52  ;;  %v1131_v46 = vld [vmem:[%s6756_s8 + $0x1f8] sm:$0xff]  ;;  %v1130_v29 = vld [vmem:[%s6756_s8 + $0x1f0] sm:$0xff]  ;;  %1343 = vmatpush1.msra.mxu1 %v1135_v60  ;;  %1183 = vmatprep.subr.mxu0 %v1129_v3 }
 0x204   : > { %8777 = vst [vmem:[#allocation97_spill] sm:$0xff] %v5670_v40  ;;  %8778 = vst [vmem:[#allocation98_spill] sm:$0xff] %v5674_v23  ;;  %v1124_v6 = vld [vmem:[%s6756_s8 + $0x1c0] sm:$0xff]  ;;  %v1126_v22 = vld [vmem:[%s6756_s8 + $0x1d0] sm:$0xff]  ;;  %1344 = vmatprep.subr.mxu1 %v1131_v46  ;;  %1184 = vmatpush1.msra.mxu0 %v1128_v47 }
 0x205   : > { %v1123_v51 = vld [vmem:[%s6756_s8 + $0x1b8] sm:$0xff]  ;;  %v1125_v21 = vld [vmem:[%s6756_s8 + $0x1c8] sm:$0xff]  ;;  %1345 = vmatpush1.msra.mxu1 %v1130_v29  ;;  %1185 = vmatprep.subr.mxu0 %v1124_v6  ;;  %v1118_v2 = vld [vmem:[%s6756_s8 + $0x190] sm:$0xff] }
 0x206   : > { %v1119_v53 = vld [vmem:[%s6756_s8 + $0x198] sm:$0xff]  ;;  %v1121_v45 = vld [vmem:[%s6756_s8 + $0x1a8] sm:$0xff]  ;;  %1346 = vmatprep.subr.mxu1 %v1126_v22  ;;  %v1120_v60 = vld [vmem:[%s6756_s8 + $0x1a0] sm:$0xff]  ;;  %1186 = vmatpush1.msra.mxu0 %v1123_v51 }
 0x207   : > { %1347 = vmatpush1.msra.mxu1 %v1125_v21  ;;  %v1114_v3 = vld [vmem:[%s6756_s8 + $0x170] sm:$0xff]  ;;  %v1116_v46 = vld [vmem:[%s6756_s8 + $0x180] sm:$0xff]  ;;  %1187 = vmatprep.subr.mxu0 %v1119_v53  ;;  %v1113_v47 = vld [vmem:[%s6756_s8 + $0x168] sm:$0xff] }
 0x208   : > { %1348 = vmatprep.subr.mxu1 %v1121_v45  ;;  %v1115_v29 = vld [vmem:[%s6756_s8 + $0x178] sm:$0xff]  ;;  %1188 = vmatpush1.msra.mxu0 %v1118_v2  ;;  %v1109_v6 = vld [vmem:[%s6756_s8 + $0x148] sm:$0xff]  ;;  %v1108_v51 = vld [vmem:[%s6756_s8 + $0x140] sm:$0xff] }
 0x209   : > { %1349 = vmatpush1.msra.mxu1 %v1120_v60  ;;  %v1111_v22 = vld [vmem:[%s6756_s8 + $0x158] sm:$0xff]  ;;  %1189 = vmatprep.subr.mxu0 %v1114_v3  ;;  %v1110_v21 = vld [vmem:[%s6756_s8 + $0x150] sm:$0xff]  ;;  %v1104_v53 = vld [vmem:[%s6756_s8 + $0x120] sm:$0xff] }
 0x20a   : > { %1350 = vmatprep.subr.mxu1 %v1116_v46  ;;  %1190 = vmatpush1.msra.mxu0 %v1113_v47  ;;  %v1106_v45 = vld [vmem:[%s6756_s8 + $0x130] sm:$0xff]  ;;  %v1103_v2 = vld [vmem:[%s6756_s8 + $0x118] sm:$0xff]  ;;  %v1105_v60 = vld [vmem:[%s6756_s8 + $0x128] sm:$0xff] }
 0x20b   : > { %1351 = vmatpush1.msra.mxu1 %v1115_v29  ;;  %1191 = vmatprep.subr.mxu0 %v1109_v6  ;;  %v1099_v3 = vld [vmem:[%s6756_s8 + $0xf8] sm:$0xff]  ;;  %v1101_v46 = vld [vmem:[%s6756_s8 + $0x108] sm:$0xff]  ;;  %v1098_v47 = vld [vmem:[%s6756_s8 + $0xf0] sm:$0xff] }
 0x20c   : > { %1352 = vmatprep.subr.mxu1 %v1111_v22  ;;  %1192 = vmatpush1.msra.mxu0 %v1108_v51  ;;  %v1100_v29 = vld [vmem:[%s6756_s8 + $0x100] sm:$0xff]  ;;  %v1094_v6 = vld [vmem:[%s6756_s8 + $0xd0] sm:$0xff]  ;;  %v1093_v51 = vld [vmem:[%s6756_s8 + $0xc8] sm:$0xff] }
 0x20d   : > { %1353 = vmatpush1.msra.mxu1 %v1110_v21  ;;  %1193 = vmatprep.subr.mxu0 %v1104_v53  ;;  %v1096_v22 = vld [vmem:[%s6756_s8 + $0xe0] sm:$0xff]  ;;  %v1095_v21 = vld [vmem:[%s6756_s8 + $0xd8] sm:$0xff]  ;;  %v1089_v53 = vld [vmem:[%s6756_s8 + $0xa8] sm:$0xff] }
 0x20e   : > { %1354 = vmatprep.subr.mxu1 %v1106_v45  ;;  %1194 = vmatpush1.msra.mxu0 %v1103_v2  ;;  %v1091_v45 = vld [vmem:[%s6756_s8 + $0xb8] sm:$0xff]  ;;  %v1088_v2 = vld [vmem:[%s6756_s8 + $0xa0] sm:$0xff]  ;;  %v1073_v41 = vld [vmem:[%s6756_s8 + $0x28] sm:$0xff] }
 0x20f   : > { %1355 = vmatpush1.msra.mxu1 %v1105_v60  ;;  %1195 = vmatprep.subr.mxu0 %v1099_v3  ;;  %v1090_v60 = vld [vmem:[%s6756_s8 + $0xb0] sm:$0xff]  ;;  %v1084_v3 = vld [vmem:[%s6756_s8 + $0x80] sm:$0xff]  ;;  %v1071_v30 = vld [vmem:[%s6756_s8 + $0x18] sm:$0xff] }
 0x210   : > { %1356 = vmatprep.subr.mxu1 %v1101_v46  ;;  %1196 = vmatpush1.msra.mxu0 %v1098_v47  ;;  %v1086_v46 = vld [vmem:[%s6756_s8 + $0x90] sm:$0xff]  ;;  %v1083_v47 = vld [vmem:[%s6756_s8 + $0x78] sm:$0xff]  ;;  %v7064_v14 = vld [vmem:[%s7057_s12] sm:$0x1f] }
 0x211   : > { %1357 = vmatpush1.msra.mxu1 %v1100_v29  ;;  %1197 = vmatprep.subr.mxu0 %v1094_v6  ;;  %v1085_v29 = vld [vmem:[%s6756_s8 + $0x88] sm:$0xff]  ;;  %v1079_v6 = vld [vmem:[%s6756_s8 + $0x58] sm:$0xff] }
 0x212   : > { %1358 = vmatprep.subr.mxu1 %v1096_v22  ;;  %1198 = vmatpush1.msra.mxu0 %v1093_v51  ;;  %v1081_v22 = vld [vmem:[%s6756_s8 + $0x68] sm:$0xff]  ;;  %v1078_v51 = vld [vmem:[%s6756_s8 + $0x50] sm:$0xff] }
 0x213   : > { %1359 = vmatpush1.msra.mxu1 %v1095_v21  ;;  %1199 = vmatprep.subr.mxu0 %v1089_v53  ;;  %v1080_v21 = vld [vmem:[%s6756_s8 + $0x60] sm:$0xff]  ;;  %v1074_v53 = vld [vmem:[%s6756_s8 + $0x30] sm:$0xff] }
 0x214   : > { %1360 = vmatprep.subr.mxu1 %v1091_v45  ;;  %1200 = vmatpush1.msra.mxu0 %v1088_v2  ;;  %v1076_v45 = vld [vmem:[%s6756_s8 + $0x40] sm:$0xff]  ;;  %v1075_v2 = vld [vmem:[%s6756_s8 + $0x38] sm:$0xff] }
 0x215   : > { %1361 = vmatpush1.msra.mxu1 %v1090_v60  ;;  %1201 = vmatprep.subr.mxu0 %v1084_v3  ;;  %v1069_v60 = vld [vmem:[%s6756_s8 + $0x8] sm:$0xff]  ;;  %v1068_v3 = vld [vmem:[%s6756_s8] sm:$0xff] }
 0x216   : > { %1362 = vmatprep.subr.mxu1 %v1086_v46  ;;  %1202 = vmatpush1.msra.mxu0 %v1083_v47  ;;  %v1070_v46 = vld [vmem:[%s6756_s8 + $0x10] sm:$0xff]  ;;  %v1147_v47 = vld [vmem:[%s6756_s8 + $0x278] sm:$0xff] }
 0x217   : > { %1363 = vmatpush1.msra.mxu1 %v1085_v29  ;;  %1203 = vmatprep.subr.mxu0 %v1079_v6  ;;  %v8780_v29 = vmov 0.0   ;;  %v1142_v6 = vld [vmem:[%s6756_s8 + $0x250] sm:$0xff] }
 0x218   : > { %1364 = vmatprep.subr.mxu1 %v1081_v22  ;;  %1204 = vmatpush1.msra.mxu0 %v1078_v51  ;;  %v1127_v22 = vld [vmem:[%s6756_s8 + $0x1d8] sm:$0xff]  ;;  %v1122_v51 = vld [vmem:[%s6756_s8 + $0x1b0] sm:$0xff] }
 0x219   : > { %1365 = vmatpush1.msra.mxu1 %v1080_v21  ;;  %1205 = vmatprep.subr.mxu0 %v1074_v53  ;;  %v1117_v21 = vld [vmem:[%s6756_s8 + $0x188] sm:$0xff]  ;;  %v1112_v53 = vld [vmem:[%s6756_s8 + $0x160] sm:$0xff] }
 0x21a   : > { %1366 = vmatprep.subr.mxu1 %v1076_v45  ;;  %1206 = vmatpush1.msra.mxu0 %v1073_v41  ;;  %v1132_v41 = vld [vmem:[%s6756_s8 + $0x200] sm:$0xff]  ;;  %v1107_v45 = vld [vmem:[%s6756_s8 + $0x138] sm:$0xff] }
 0x21b   : > { %1367 = vmatpush1.msra.mxu1 %v1075_v2  ;;  %1207 = vmatprep.subr.mxu0 %v1069_v60  ;;  %v1102_v2 = vld [vmem:[%s6756_s8 + $0x110] sm:$0xff]  ;;  %v1097_v60 = vld [vmem:[%s6756_s8 + $0xe8] sm:$0xff] }
 0x21c   : > { %1368 = vmatprep.subr.mxu1 %v1071_v30  ;;  %1208 = vmatpush1.msra.mxu0 %v1068_v3  ;;  %v1137_v30 = vld [vmem:[%s6756_s8 + $0x228] sm:$0xff]  ;;  %v1092_v3 = vld [vmem:[%s6756_s8 + $0xc0] sm:$0xff] }
 0x21d   : > { %1369 = vmatpush1.msra.mxu1 %v1070_v46  ;;  %1242 = vmatmul.mubr.f32.vlgmr.msra.gmra.mxu0 %v5674_v23  ;;  %v1087_v46 = vld [vmem:[%s6756_s8 + $0x98] sm:$0xff] }
 0x21e   : > { %1403 = vmatmul.mubr.f32.vlgmr.msra.gmra.mxu1 %v5674_v23  ;;  %1247 = vmatprep.mubr.f32.mxu0 %v8780_v29 }
 0x21f   : > { %1408 = vmatprep.mubr.f32.mxu1 %v8780_v29  ;;  %4568 = vmatprep.subr.mxu0 %v1147_v47 }
 0x220   : > { %4569 = vmatpush3.msra.mxu0 %v1147_v47  ;;  %v1082_v47 = vld [vmem:[%s6756_s8 + $0x70] sm:$0xff] }
 0x221   : > { %1248 = vmatmul.mubr.f32.gmra.mxu0 %v5670_v40  ;;  %4570 = vmatprep.subr.mxu0 %v1142_v6 }
 0x222   : > { %1409 = vmatmul.mubr.f32.gmra.mxu1 %v5670_v40  ;;  %1253 = vmatprep.mubr.f32.mxu0 %v8780_v29 }
 0x223   : > { %1414 = vmatprep.mubr.f32.mxu1 %v8780_v29  ;;  %4571 = vmatpush3.msra.mxu0 %v1142_v6  ;;  %v1077_v6 = vld [vmem:[%s6756_s8 + $0x48] sm:$0xff] }
 0x224   : > { %4572 = vmatprep.subr.mxu0 %v1137_v30 }
 0x225   : > { %1254 = vmatmul.mubr.f32.gmra.mxu0 %v5666_v52 }
 0x226   : > { %1415 = vmatmul.mubr.f32.gmra.mxu1 %v5666_v52  ;;  %1259 = vmatprep.mubr.f32.mxu0 %v8780_v29 }
 0x227   : > { %1420 = vmatprep.mubr.f32.mxu1 %v8780_v29  ;;  %4573 = vmatpush3.msra.mxu0 %v1137_v30  ;;  %v1072_v30 = vld [vmem:[%s6756_s8 + $0x20] sm:$0xff] }
 0x228   : > { %4574 = vmatprep.subr.mxu0 %v1132_v41 }
 0x229   : > { %1260 = vmatmul.mubr.f32.gmra.mxu0 %v5662_v26 }
 0x22a   : > { %1421 = vmatmul.mubr.f32.gmra.mxu1 %v5662_v26  ;;  %1265 = vmatprep.mubr.f32.mxu0 %v8780_v29 }
 0x22b   : > { %1426 = vmatprep.mubr.f32.mxu1 %v8780_v29  ;;  %4575 = vmatpush3.msra.mxu0 %v1132_v41  ;;  %v1661_v41 = vld [vmem:[%s6921_s30 + $0x78] sm:$0xff] }
 0x22c   : > { %4576 = vmatprep.subr.mxu0 %v1127_v22  ;;  %4624 = vmatprep.subr.mxu1 %v1661_v41 }
 0x22d   : > { %1266 = vmatmul.mubr.f32.gmra.mxu0 %v5658_v55  ;;  %4625 = vmatpush3.msra.mxu1 %v1661_v41  ;;  %v1648_v41 = vld [vmem:[%s6921_s30 + $0x10] sm:$0xff] }
 0x22e   : > { %1427 = vmatmul.mubr.f32.gmra.mxu1 %v5658_v55  ;;  %1271 = vmatprep.mubr.f32.mxu0 %v8780_v29 }
 0x22f   : > { %1432 = vmatprep.mubr.f32.mxu1 %v8780_v29  ;;  %4577 = vmatpush3.msra.mxu0 %v1127_v22  ;;  %v1660_v22 = vld [vmem:[%s6921_s30 + $0x70] sm:$0xff] }
 0x230   : > { %4578 = vmatprep.subr.mxu0 %v1122_v51  ;;  %4626 = vmatprep.subr.mxu1 %v1660_v22 }
 0x231   : > { %1272 = vmatmul.mubr.f32.gmra.mxu0 %v5654_v10  ;;  %4627 = vmatpush3.msra.mxu1 %v1660_v22  ;;  %v1647_v22 = vld [vmem:[%s6921_s30 + $0x8] sm:$0xff] }
 0x232   : > { %1433 = vmatmul.mubr.f32.gmra.mxu1 %v5654_v10  ;;  %1277 = vmatprep.mubr.f32.mxu0 %v8780_v29 }
 0x233   : > { %1438 = vmatprep.mubr.f32.mxu1 %v8780_v29  ;;  %4579 = vmatpush3.msra.mxu0 %v1122_v51  ;;  %v1659_v51 = vld [vmem:[%s6921_s30 + $0x68] sm:$0xff] }
 0x234   : > { %4580 = vmatprep.subr.mxu0 %v1117_v21  ;;  %4628 = vmatprep.subr.mxu1 %v1659_v51 }
 0x235   : > { %1278 = vmatmul.mubr.f32.gmra.mxu0 %v5650_v56  ;;  %4629 = vmatpush3.msra.mxu1 %v1659_v51  ;;  %v1646_v51 = vld [vmem:[%s6921_s30] sm:$0xff] }
 0x236   : > { %1439 = vmatmul.mubr.f32.gmra.mxu1 %v5650_v56  ;;  %1283 = vmatprep.mubr.f32.mxu0 %v8780_v29 }
 0x237   : > { %1444 = vmatprep.mubr.f32.mxu1 %v8780_v29  ;;  %4581 = vmatpush3.msra.mxu0 %v1117_v21  ;;  %v1658_v21 = vld [vmem:[%s6921_s30 + $0x60] sm:$0xff] }
 0x238   : > { %4582 = vmatprep.subr.mxu0 %v1112_v53  ;;  %4630 = vmatprep.subr.mxu1 %v1658_v21 }
 0x239   : > { %1284 = vmatmul.mubr.f32.gmra.mxu0 %v5646_v15  ;;  %4631 = vmatpush3.msra.mxu1 %v1658_v21 }
 0x23a   : > { %1445 = vmatmul.mubr.f32.gmra.mxu1 %v5646_v15  ;;  %1289 = vmatprep.mubr.f32.mxu0 %v8780_v29 }
 0x23b   : > { %1450 = vmatprep.mubr.f32.mxu1 %v8780_v29  ;;  %4583 = vmatpush3.msra.mxu0 %v1112_v53  ;;  %v1657_v53 = vld [vmem:[%s6921_s30 + $0x58] sm:$0xff] }
 0x23c   : > { %4584 = vmatprep.subr.mxu0 %v1107_v45  ;;  %4632 = vmatprep.subr.mxu1 %v1657_v53 }
 0x23d   : > { %1290 = vmatmul.mubr.f32.gmra.mxu0 %v5642_v57  ;;  %4633 = vmatpush3.msra.mxu1 %v1657_v53 }
 0x23e   : > { %1451 = vmatmul.mubr.f32.gmra.mxu1 %v5642_v57  ;;  %1295 = vmatprep.mubr.f32.mxu0 %v8780_v29 }
 0x23f   : > { %1456 = vmatprep.mubr.f32.mxu1 %v8780_v29  ;;  %4585 = vmatpush3.msra.mxu0 %v1107_v45  ;;  %v1656_v45 = vld [vmem:[%s6921_s30 + $0x50] sm:$0xff] }
 0x240   : > { %4586 = vmatprep.subr.mxu0 %v1102_v2  ;;  %4634 = vmatprep.subr.mxu1 %v1656_v45 }
 0x241   : > { %1296 = vmatmul.mubr.f32.gmra.mxu0 %v5638_v27  ;;  %4635 = vmatpush3.msra.mxu1 %v1656_v45 }
 0x242   : > { %1457 = vmatmul.mubr.f32.gmra.mxu1 %v5638_v27  ;;  %1301 = vmatprep.mubr.f32.mxu0 %v8780_v29 }
 0x243   : > { %1462 = vmatprep.mubr.f32.mxu1 %v8780_v29  ;;  %4587 = vmatpush3.msra.mxu0 %v1102_v2  ;;  %v1655_v2 = vld [vmem:[%s6921_s30 + $0x48] sm:$0xff] }
 0x244   : > { %4588 = vmatprep.subr.mxu0 %v1097_v60  ;;  %4636 = vmatprep.subr.mxu1 %v1655_v2 }
 0x245   : > { %1302 = vmatmul.mubr.f32.gmra.mxu0 %v5634_v43  ;;  %4637 = vmatpush3.msra.mxu1 %v1655_v2 }
 0x246   : > { %1463 = vmatmul.mubr.f32.gmra.mxu1 %v5634_v43  ;;  %1307 = vmatprep.mubr.f32.mxu0 %v8780_v29 }
 0x247   : > { %1468 = vmatprep.mubr.f32.mxu1 %v8780_v29  ;;  %4589 = vmatpush3.msra.mxu0 %v1097_v60  ;;  %v1654_v60 = vld [vmem:[%s6921_s30 + $0x40] sm:$0xff] }
 0x248   : > { %4590 = vmatprep.subr.mxu0 %v1092_v3  ;;  %4638 = vmatprep.subr.mxu1 %v1654_v60 }
 0x249   : > { %1308 = vmatmul.mubr.f32.gmra.mxu0 %v5630_v28  ;;  %4639 = vmatpush3.msra.mxu1 %v1654_v60 }
 0x24a   : > { %1469 = vmatmul.mubr.f32.gmra.mxu1 %v5630_v28  ;;  %1313 = vmatprep.mubr.f32.mxu0 %v8780_v29 }
 0x24b   : > { %1474 = vmatprep.mubr.f32.mxu1 %v8780_v29  ;;  %4591 = vmatpush3.msra.mxu0 %v1092_v3  ;;  %v1653_v3 = vld [vmem:[%s6921_s30 + $0x38] sm:$0xff] }
 0x24c   : > { %4592 = vmatprep.subr.mxu0 %v1087_v46  ;;  %4640 = vmatprep.subr.mxu1 %v1653_v3 }
 0x24d   : > { %1314 = vmatmul.mubr.f32.gmra.mxu0 %v5626_v50  ;;  %4641 = vmatpush3.msra.mxu1 %v1653_v3 }
 0x24e   : > { %1475 = vmatmul.mubr.f32.gmra.mxu1 %v5626_v50  ;;  %1319 = vmatprep.mubr.f32.mxu0 %v8780_v29 }
 0x24f   : > { %1480 = vmatprep.mubr.f32.mxu1 %v8780_v29  ;;  %4593 = vmatpush3.msra.mxu0 %v1087_v46  ;;  %v1652_v46 = vld [vmem:[%s6921_s30 + $0x30] sm:$0xff] }
 0x250   : > { %4594 = vmatprep.subr.mxu0 %v1082_v47  ;;  %4642 = vmatprep.subr.mxu1 %v1652_v46 }
 0x251   : > { %1320 = vmatmul.mubr.f32.gmra.mxu0 %v5622_v58  ;;  %4643 = vmatpush3.msra.mxu1 %v1652_v46 }
 0x252   : > { %1481 = vmatmul.mubr.f32.gmra.mxu1 %v5622_v58  ;;  %1325 = vmatprep.mubr.f32.mxu0 %v8780_v29 }
 0x253   : > { %1486 = vmatprep.mubr.f32.mxu1 %v8780_v29  ;;  %4595 = vmatpush3.msra.mxu0 %v1082_v47  ;;  %v1651_v47 = vld [vmem:[%s6921_s30 + $0x28] sm:$0xff] }
 0x254   : > { %4596 = vmatprep.subr.mxu0 %v1077_v6  ;;  %4644 = vmatprep.subr.mxu1 %v1651_v47 }
 0x255   : > { %1326 = vmatmul.mubr.f32.gmra.mxu0 %v5618_v33  ;;  %4645 = vmatpush3.msra.mxu1 %v1651_v47 }
 0x256   : > { %1487 = vmatmul.mubr.f32.gmra.mxu1 %v5618_v33  ;;  %1331 = vmatprep.mubr.f32.mxu0 %v8780_v29 }
 0x257   : > { %1492 = vmatprep.mubr.f32.mxu1 %v8780_v29  ;;  %4597 = vmatpush3.msra.mxu0 %v1077_v6  ;;  %v1650_v6 = vld [vmem:[%s6921_s30 + $0x20] sm:$0xff] }
 0x258   : > { %4598 = vmatprep.subr.mxu0 %v1072_v30  ;;  %4646 = vmatprep.subr.mxu1 %v1650_v6 }
 0x259   : > { %1332 = vmatmul.mubr.f32.gmra.mxu0 %v5614_v31  ;;  %4647 = vmatpush3.msra.mxu1 %v1650_v6 }
 0x25a   : > { %1493 = vmatmul.mubr.f32.gmra.mxu1 %v5614_v31  ;;  %4600 = vmatprep.mubr.f32.mxu0 %v5674_v23 }
 0x25b   : > { %4599 = vmatpush3.msra.mxu0 %v1072_v30  ;;  %v1649_v30 = vld [vmem:[%s6921_s30 + $0x18] sm:$0xff]  ;;  %4656 = vmatprep.mubr.f32.mxu1 %v5610_v54 }
 0x25c   : > { %4648 = vmatprep.subr.mxu1 %v1649_v30 }
 0x25d   : > { %4601 = vmatmul.mubr.f32.vlgmr.msra.gmra.mxu0 %v5670_v40  ;;  %4649 = vmatpush3.msra.mxu1 %v1649_v30 }
 0x25e   : > { %4603 = vmatprep.mubr.f32.mxu0 %v5666_v52  ;;  %4650 = vmatprep.subr.mxu1 %v1648_v41 }
 0x25f   : > { %4651 = vmatpush3.msra.mxu1 %v1648_v41 }
 0x260   : > { %4652 = vmatprep.subr.mxu1 %v1647_v22 }
 0x261   : > { %4604 = vmatmul.mubr.f32.gmra.mxu0 %v5662_v26  ;;  %4653 = vmatpush3.msra.mxu1 %v1647_v22 }
 0x262   : > { %4606 = vmatprep.mubr.f32.mxu0 %v5658_v55  ;;  %4654 = vmatprep.subr.mxu1 %v1646_v51 }
 0x263   : > { %4655 = vmatpush3.msra.mxu1 %v1646_v51 }
 0x264   : > { %4657 = vmatmul.mubr.f32.vlgmr.msra.gmra.mxu1 %v5606_v19  ;;  %v8800_v19 = vlaneseq }
 0x265   : > { %4607 = vmatmul.mubr.f32.gmra.mxu0 %v5654_v10  ;;  %4659 = vmatprep.mubr.f32.mxu1 %v5602_v20 }
 0x266   : > { %4609 = vmatprep.mubr.f32.mxu0 %v5650_v56  ;;  %v7050_v54 = vshrl.u32 %v8800_v19, 7 }
 0x268   : > { %4660 = vmatmul.mubr.f32.gmra.mxu1 %v5598_v8  ;;  %8801 = vst [vmem:[#allocation117_spill] sm:$0xff] %v7050_v54 }
 0x269   : > { %4610 = vmatmul.mubr.f32.gmra.mxu0 %v5646_v15  ;;  %4662 = vmatprep.mubr.f32.mxu1 %v5594_v44 }
 0x26a   : > { %4612 = vmatprep.mubr.f32.mxu0 %v5642_v57 }
 0x26c   : > { %4663 = vmatmul.mubr.f32.gmra.mxu1 %v5590_v18 }
 0x26d   : > { %4613 = vmatmul.mubr.f32.gmra.mxu0 %v5638_v27  ;;  %4665 = vmatprep.mubr.f32.mxu1 %v5586_v1 }
 0x26e   : > { %4615 = vmatprep.mubr.f32.mxu0 %v5634_v43 }
 0x270   : > { %4666 = vmatmul.mubr.f32.gmra.mxu1 %v5582_v59 }
 0x271   : > { %4616 = vmatmul.mubr.f32.gmra.mxu0 %v5630_v28  ;;  %4668 = vmatprep.mubr.f32.mxu1 %v5578_v39 }
 0x272   : > { %4618 = vmatprep.mubr.f32.mxu0 %v5626_v50 }
 0x274   : > { %4669 = vmatmul.mubr.f32.gmra.mxu1 %v5574_v35 }
 0x275   : > { %4619 = vmatmul.mubr.f32.gmra.mxu0 %v5622_v58  ;;  %4671 = vmatprep.mubr.f32.mxu1 %v5570_v34 }
 0x276   : > { %4621 = vmatprep.mubr.f32.mxu0 %v5618_v33 }
 0x278   : > { %4672 = vmatmul.mubr.f32.gmra.mxu1 %v5566_v38 }
 0x279   : > { %4622 = vmatmul.mubr.f32.gmra.mxu0 %v5614_v31  ;;  %4674 = vmatprep.mubr.f32.mxu1 %v5562_v7 }
 0x27a   : > { %1879 = vmatprep.mubr.f32.mxu0 %v8780_v29 }
 0x27c   : > { %4675 = vmatmul.mubr.f32.gmra.mxu1 %v5558_v32 }
 0x27d   : > { %4677 = vmatprep.mubr.f32.mxu1 %v5554_v4 }
 0x280   : > { %4678 = vmatmul.mubr.f32.gmra.mxu1 %v5550_v9 }
 0x281   : > { %2040 = vmatprep.mubr.f32.mxu1 %v8780_v29 }
 0x2dd   : > { %v6956_v21 = vpop.f32.mrf.mxu0 }
 0x2de   : > { %8782 = vst [vmem:[#allocation99_spill] sm:$0xff] %v6956_v21  ;;  %v6958_v53 = vpop.f32.mrf.mxu1 }
 0x2df   : > { %v6960_v45 = vpop.f32.mrf.mxu0 }
 0x2e0   : > { %v6962_v2 = vpop.f32.mrf.mxu1 }
 0x2e1   : > { %8783 = vst [vmem:[#allocation100_spill] sm:$0xff] %v6962_v2  ;;  %v6964_v60 = vpop.f32.mrf.mxu0 }
 0x2e2   : > { %8784 = vst [vmem:[#allocation101_spill] sm:$0xff] %v6964_v60  ;;  %v6966_v3 = vpop.f32.mrf.mxu1 }
 0x2e3   : > { %v6968_v46 = vpop.f32.mrf.mxu0 }
 0x2e4   : > { %v6970_v47 = vpop.f32.mrf.mxu1 }
 0x2e5   : > { %8785 = vst [vmem:[#allocation102_spill] sm:$0xff] %v6970_v47  ;;  %v6972_v6 = vpop.f32.mrf.mxu0 }
 0x2e6   : > { %8786 = vst [vmem:[#allocation103_spill] sm:$0xff] %v6972_v6  ;;  %v6974_v30 = vpop.f32.mrf.mxu1 }
 0x2e7   : > { %v6976_v41 = vpop.f32.mrf.mxu0 }
 0x2e8   : > { %v6978_v22 = vpop.f32.mrf.mxu1 }
 0x2e9   : > { %8787 = vst [vmem:[#allocation104_spill] sm:$0xff] %v6978_v22  ;;  %v6980_v51 = vpop.f32.mrf.mxu0 }
 0x2ea   : > { %8788 = vst [vmem:[#allocation105_spill] sm:$0xff] %v6980_v51  ;;  %v6982_v31 = vpop.f32.mrf.mxu1 }
 0x2eb   : > { %v6984_v33 = vpop.f32.mrf.mxu0 }
 0x2ec   : > { %v6986_v58 = vpop.f32.mrf.mxu1 }
 0x2ed   : > { %8789 = vst [vmem:[#allocation106_spill] sm:$0xff] %v6986_v58  ;;  %v6988_v50 = vpop.f32.mrf.mxu0 }
 0x2ee   : > { %8790 = vst [vmem:[#allocation107_spill] sm:$0xff] %v6988_v50  ;;  %v6990_v28 = vpop.f32.mrf.mxu1 }
 0x2ef   : > { %v6992_v43 = vpop.f32.mrf.mxu0 }
 0x2f0   : > { %v6994_v27 = vpop.f32.mrf.mxu1 }
 0x2f1   : > { %v6996_v57 = vpop.f32.mrf.mxu0 }
 0x2f2   : > { %8791 = vst [vmem:[#allocation108_spill] sm:$0xff] %v6996_v57  ;;  %v6998_v15 = vpop.f32.mrf.mxu1 }
 0x2f3   : > { %v7000_v56 = vpop.f32.mrf.mxu0 }
 0x2f4   : > { %v7002_v10 = vpop.f32.mrf.mxu1 }
 0x2f5   : > { %v7004_v55 = vpop.f32.mrf.mxu0 }
 0x2f6   : > { %8792 = vst [vmem:[#allocation109_spill] sm:$0xff] %v7004_v55  ;;  %v7006_v26 = vpop.f32.mrf.mxu1 }
 0x2f7   : > { %v7008_v52 = vpop.f32.mrf.mxu0 }
 0x2f8   : > { %v7010_v50 = vpop.f32.mrf.mxu1 }
 0x2f9   : > { %v7012_v40 = vpop.f32.mrf.mxu0 }
 0x2fa   : > { %8793 = vst [vmem:[#allocation110_spill] sm:$0xff] %v7012_v40  ;;  %v7014_v51 = vpop.f32.mrf.mxu1 }
 0x2fb   : > { %v7016_v23 = vpop.f32.mrf.mxu0 }
 0x2fc   : > { %v7018_v57 = vpop.f32.mrf.mxu1 }
 0x2fd   : > { %v7020_v6 = vpop.f32.mrf.mxu0 }
 0x2fe   : > { %8794 = vst [vmem:[#allocation111_spill] sm:$0xff] %v7020_v6  ;;  %v7022_v60 = vpop.f32.mrf.mxu1 }
 0x2ff   : > { %v7024_v21 = vpop.f32.mrf.mxu0 }
 0x300   : > { %v7026_v55 = vpop.f32.mrf.mxu1 }
 0x301   : > { %v7028_v9 = vpop.f32.mrf.mxu0 }
 0x302   : > { %8795 = vst [vmem:[#allocation112_spill] sm:$0xff] %v7028_v9  ;;  %v1458_v4 = vpop.f32.mrf.mxu1 }
 0x303   : > { %v7030_v32 = vpop.f32.mrf.mxu0 }
 0x304   : > { %v7032_v40 = vpop.f32.mrf.mxu1 }
 0x305   : > { %v7034_v7 = vpop.f32.mrf.mxu0 }
 0x306   : > { %8796 = vst [vmem:[#allocation113_spill] sm:$0xff] %v7034_v7  ;;  %v1464_v38 = vpop.f32.mrf.mxu1 }
 0x307   : > { %v1305_v34 = vpop.f32.mrf.mxu0 }
 0x308   : > { %v7036_v35 = vpop.f32.mrf.mxu1 }
 0x309   : > { %v7038_v6 = vpop.f32.mrf.mxu0 }
 0x30a   : > { %8797 = vst [vmem:[#allocation114_spill] sm:$0xff] %v7038_v6  ;;  %v1470_v39 = vpop.f32.mrf.mxu1 }
 0x30b   : > { %v1311_v59 = vpop.f32.mrf.mxu0 }
 0x30c   : > { %v7040_v1 = vpop.f32.mrf.mxu1 }
 0x30d   : > { %v7042_v18 = vpop.f32.mrf.mxu0 }
 0x30e   : > { %8798 = vst [vmem:[#allocation115_spill] sm:$0xff] %v7042_v18  ;;  %v1476_v9 = vpop.f32.mrf.mxu1  ;;  %v1162_v18 = vsub.s32 2, %v7050_v54 }
 0x30f   : > { %v1317_v44 = vpop.f32.mrf.mxu0 }
 0x310   : > { %v7044_v8 = vpop.f32.mrf.mxu1  ;;  %v7069_v62 = vrot.slane %v7064_v14, %v1162_v18 }
 0x311   : > { %v7047_v20 = vpop.f32.mrf.mxu0 }
 0x312   : > { %8799 = vst [vmem:[#allocation116_spill] sm:$0xff] %v7047_v20  ;;  %v1482_v7 = vpop.f32.mrf.mxu1  ;;  %v1158_v20 = vsub.s32 1, %v7050_v54 }
 0x313   : > { %v1323_v42 = vpop.f32.mrf.mxu0  ;;  %v1483_v49 = vadd.f32 %v1482_v7, %v7069_v62  ;;  %v1465_v7 = vadd.f32 %v1464_v38, %v7069_v62 }
 0x314   : > { %v7052_v13 = vpop.f32.mrf.mxu1  ;;  %v7074_v0 = vrot.slane %v7064_v14, %v1158_v20 }
 0x315   : > { %v7060_v6 = vpop.f32.mrf.mxu0 }
 0x316   : > { %8803 = vst [vmem:[#allocation118_spill] sm:$0xff] %v7060_v6  ;;  %v1488_v16 = vpop.f32.mrf.mxu1  ;;  %v1324_v20 = vadd.f32 %v1323_v42, %v7074_v0  ;;  %v1306_v42 = vadd.f32 %v1305_v34, %v7074_v0  ;;  %v1294_v38 = vadd.f32 %v7024_v21, %v7074_v0  ;;  %v1447_v34 = vadd.f32 %v7014_v51, %v7069_v62 }
 0x317   : > { %v1329_v19 = vpop.f32.mrf.mxu0  ;;  %v1489_v6 = vadd.f32 %v1488_v16, %v7069_v62  ;;  %v1282_v21 = vadd.f32 %v7008_v52, %v7074_v0  ;;  %v1435_v51 = vadd.f32 %v6998_v15, %v7069_v62  ;;  %v1423_v52 = vadd.f32 %v6982_v31, %v7069_v62 }
 0x318   : > { %v7066_v17 = vpop.f32.mrf.mxu1  ;;  %v1330_v18 = vadd.f32 %v1329_v19, %v7074_v0  ;;  %v1411_v31 = vadd.f32 %v6966_v3, %v7069_v62  ;;  %v1246_v3 = vadd.f32 %v6960_v45, %v7074_v0 }
 0x319   : > { %v7071_v61 = vpop.f32.mrf.mxu0 }
 0x31a   : > { %8804 = vst [vmem:[#allocation119_spill] sm:$0xff] %v7071_v61  ;;  %v1494_v63 = vpop.f32.mrf.mxu1  ;;  %v1477_v61 = vadd.f32 %v1476_v9, %v7069_v62  ;;  %v1312_v9 = vadd.f32 %v1311_v59, %v7074_v0 }
 0x31b   : > { %v1495_v48 = vadd.f32 %v1494_v63, %v7069_v62  ;;  %v1335_v2 = vpop.f32.mrf.mxu0  ;;  %v1471_v63 = vadd.f32 %v1470_v39, %v7069_v62  ;;  %v1459_v39 = vadd.f32 %v1458_v4, %v7069_v62 }
 0x31c   : > { %v1336_v47 = vadd.f32 %v1335_v2, %v7074_v0 }
 0x31d   : > { %1815 = vmatprep.subr.mxu0 %v1495_v48  ;;  %v7080_v22 = vpop.f32.mrf.mxu0  ;;  %v1318_v48 = vadd.f32 %v1317_v44, %v7074_v0  ;;  %v1300_v44 = vadd.f32 %v7030_v32, %v7074_v0  ;;  %v1288_v32 = vadd.f32 %v7016_v23, %v7074_v0  ;;  %v1276_v23 = vadd.f32 %v7000_v56, %v7074_v0 }
 0x31e   : > { %1816 = vmatpush1.msra.mxu0 %v1336_v47  ;;  %v1170_v56 = vsub.s32 4, %v7050_v54 }
 0x31f   : > { %v7084_v58 = vpop.f32.mrf.mxu0  ;;  %1817 = vmatprep.subr.mxu0 %v1489_v6 }
 0x320   : > { %1818 = vmatpush1.msra.mxu0 %v1330_v18 }
 0x321   : > { %v7088_v16 = vpop.f32.mrf.mxu0  ;;  %1819 = vmatprep.subr.mxu0 %v1483_v49 }
 0x322   : > { %1820 = vmatpush1.msra.mxu0 %v1324_v20  ;;  %v1270_v20 = vadd.f32 %v6992_v43, %v7074_v0  ;;  %v1258_v43 = vadd.f32 %v6976_v41, %v7074_v0 }
 0x323   : > { %v7092_v2 = vpop.f32.mrf.mxu0  ;;  %1821 = vmatprep.subr.mxu0 %v1477_v61  ;;  %v1453_v61 = vadd.f32 %v7022_v60, %v7069_v62  ;;  %v1441_v60 = vadd.f32 %v7006_v26, %v7069_v62  ;;  %v1429_v26 = vadd.f32 %v6990_v28, %v7069_v62  ;;  %v1417_v28 = vadd.f32 %v6974_v30, %v7069_v62 }
 0x324   : > { %1822 = vmatpush1.msra.mxu0 %v1318_v48  ;;  %v1166_v48 = vsub.s32 3, %v7050_v54  ;;  %v1405_v30 = vadd.f32 %v6958_v53, %v7069_v62 }
 0x325   : > { %v7095_v47 = vpop.f32.mrf.mxu0  ;;  %1823 = vmatprep.subr.mxu0 %v1471_v63  ;;  %v1264_v63 = vadd.f32 %v6984_v33, %v7074_v0  ;;  %v1252_v33 = vadd.f32 %v6968_v46, %v7074_v0 }
 0x326   : > { %1824 = vmatpush1.msra.mxu0 %v1312_v9 }
 0x327   : > { %v7099_v49 = vpop.f32.mrf.mxu0  ;;  %1825 = vmatprep.subr.mxu0 %v1465_v7 }
 0x328   : > { %1826 = vmatpush1.msra.mxu0 %v1306_v42  ;;  %v7146_v42 = vrot.slane %v7064_v14, %v1170_v56  ;;  %v8816_v56 = vld [vmem:[#allocation15_spill] sm:$0xff] }
 0x329   : > { %v7105_v59 = vpop.f32.mrf.mxu0  ;;  %1827 = vmatprep.subr.mxu0 %v1459_v39  ;;  %v1496_v39 = vpop.f32.mrf.mxu1  ;;  %vm8817_vm6 = vcmp.eq.s32.totalorder %v8746_v5, %v8816_v56  ;;  %v8880_v56 = vld [vmem:[#allocation58_spill] sm:$0xff] }
 0x32a   : > { %1828 = vmatpush1.msra.mxu0 %v1300_v44  ;;  %v7151_v44 = vrot.slane %v7064_v14, %v1166_v48  ;;  %v5683_v14 = vmov 1.0   ;;  %v8882_v48 = vld [vmem:[#allocation57_spill] sm:$0xff] }
 0x32b   : > { %v7111_v4 = vpop.f32.mrf.mxu0  ;;  %1829 = vmatprep.subr.mxu0 %v1453_v61 }
 0x32c   : > { %1830 = vmatpush1.msra.mxu0 %v1294_v38  ;;  %v1497_v46 = vadd.f32 %v1496_v39, %v7151_v44  ;;  %v1491_v62 = vadd.f32 %v7066_v17, %v7151_v44  ;;  %v1485_v53 = vadd.f32 %v7052_v13, %v7151_v44  ;;  %v1479_v17 = vadd.f32 %v7044_v8, %v7151_v44  ;;  %v8836_v39 = vld [vmem:[#allocation43_spill] sm:$0xff] }
 0x32d   : > { %v7117_v6 = vpop.f32.mrf.mxu0  ;;  %1831 = vmatprep.subr.mxu0 %v1447_v34  ;;  %v1473_v13 = vadd.f32 %v7040_v1, %v7151_v44  ;;  %v1467_v8 = vadd.f32 %v7036_v35, %v7151_v44  ;;  %v1461_v1 = vadd.f32 %v7032_v40, %v7151_v44  ;;  %v1455_v35 = vadd.f32 %v7026_v55, %v7151_v44 }
 0x32e   : > { %1832 = vmatpush1.msra.mxu0 %v1288_v32  ;;  %v1449_v40 = vadd.f32 %v7018_v57, %v7151_v44  ;;  %v1443_v55 = vadd.f32 %v7010_v50, %v7151_v44  ;;  %v1437_v57 = vadd.f32 %v7002_v10, %v7151_v44  ;;  %v1431_v50 = vadd.f32 %v6994_v27, %v7151_v44  ;;  %v8811_v10 = vld [vmem:[#allocation106_spill] sm:$0xff]  ;;  %v8812_v27 = vld [vmem:[#allocation104_spill] sm:$0xff] }
 0x32f   : > { %v7123_v19 = vpop.f32.mrf.mxu0  ;;  %1833 = vmatprep.subr.mxu0 %v1441_v60 }
 0x330   : > { %1834 = vmatpush1.msra.mxu0 %v1282_v21  ;;  %v1611_v21 = vadd.f32 %v7117_v6, %v7146_v42  ;;  %v1601_v6 = vadd.f32 %v7105_v59, %v7146_v42  ;;  %v1591_v59 = vadd.f32 %v7095_v47, %v7146_v42  ;;  %v1581_v47 = vadd.f32 %v7088_v16, %v7146_v42 }
 0x331   : > { %v4617_v18 = vpop.f32.mrf.mxu0  ;;  %1835 = vmatprep.subr.mxu0 %v1435_v51  ;;  %v1606_v51 = vadd.f32 %v7123_v19, %v7146_v42  ;;  %v1596_v19 = vadd.f32 %v7111_v4, %v7146_v42  ;;  %v1586_v4 = vadd.f32 %v7099_v49, %v7146_v42  ;;  %v1576_v49 = vadd.f32 %v7092_v2, %v7146_v42 }
 0x332   : > { %1836 = vmatpush1.msra.mxu0 %v1276_v23  ;;  %v1621_v32 = vadd.f32 %v4617_v18, %v7146_v42  ;;  %v1425_v23 = vadd.f32 %v8811_v10, %v7151_v44  ;;  %v1571_v16 = vadd.f32 %v7080_v22, %v7146_v42  ;;  %v1566_v2 = vadd.f32 %v7084_v58, %v7146_v42  ;;  %v8819_v58 = vld [vmem:[#allocation20_spill] sm:$0xff]  ;;  %v8872_v10 = vld [vmem:[#allocation50_spill] sm:$0xff] }
 0x333   : > { %v1615_v15 = vpop.f32.mrf.mxu0  ;;  %1837 = vmatprep.subr.mxu0 %v1429_v26  ;;  %v1419_v26 = vadd.f32 %v8812_v27, %v7151_v44  ;;  %vm8820_vm9 = vcmp.eq.s32.totalorder %v8746_v5, %v8819_v58  ;;  %v8874_v27 = vld [vmem:[#allocation49_spill] sm:$0xff]  ;;  %v8881_v22 = vld [vmem:[#allocation26_spill] sm:$0xff] }
 0x334   : > { %1838 = vmatpush1.msra.mxu0 %v1270_v20  ;;  %v1616_v60 = vadd.f32 %v1615_v15, %v7146_v42  ;;  %v8814_v20 = vld [vmem:[#allocation102_spill] sm:$0xff]  ;;  %v8815_v15 = vld [vmem:[#allocation100_spill] sm:$0xff]  ;;  %v5195_v58 = vpack.i.bf16 %v8881_v22, %v8880_v56 }
 0x335   : > { %v4620_v7 = vpop.f32.mrf.mxu0  ;;  %1839 = vmatprep.subr.mxu0 %v1423_v52  ;;  %v1413_v52 = vadd.f32 %v8814_v20, %v7151_v44  ;;  %v8877_v20 = vld [vmem:[#allocation22_spill] sm:$0xff] }
 0x336   : > { %1840 = vmatpush1.msra.mxu0 %v1264_v63  ;;  %v1631_v0 = vadd.f32 %v4620_v7, %v7146_v42  ;;  %v1407_v63 = vadd.f32 %v8815_v15, %v7151_v44  ;;  %v8824_v7 = vld [vmem:[#allocation40_spill] sm:$0xff]  ;;  %v8879_v15 = vld [vmem:[#allocation21_spill] sm:$0xff] }
 0x337   : > { %v1625_v9 = vpop.f32.mrf.mxu0  ;;  %1841 = vmatprep.subr.mxu0 %v1417_v28  ;;  %v8822_v28 = vld [vmem:[#allocation19_spill] sm:$0xff]  ;;  %v8840_v44 = vld [vmem:[#allocation48_spill] sm:$0xff] }
 0x338   : > { %1842 = vmatpush1.msra.mxu0 %v1258_v43  ;;  %v1626_v45 = vadd.f32 %v1625_v9, %v7146_v42  ;;  %vm8823_vm8 = vcmp.eq.s32.totalorder %v8746_v5, %v8822_v28  ;;  %v8826_v43 = vld [vmem:[#allocation24_spill] sm:$0xff]  ;;  %v8830_v9 = vld [vmem:[#allocation23_spill] sm:$0xff]  ;;  %v8883_v28 = vld [vmem:[#allocation25_spill] sm:$0xff] }
 0x339   : > { %v4623_v41 = vpop.f32.mrf.mxu0  ;;  %1843 = vmatprep.subr.mxu0 %v1411_v31  ;;  %v8828_v31 = vld [vmem:[#allocation39_spill] sm:$0xff] }
 0x33a   : > { %v1641_v61 = vadd.f32 %v4623_v41, %v7146_v42  ;;  %1844 = vmatpush1.msra.mxu0 %v1252_v33  ;;  %v8832_v33 = vld [vmem:[#allocation44_spill] sm:$0xff] }
 0x33b   : > { %v1635_v38 = vpop.f32.mrf.mxu0  ;;  %1845 = vmatprep.subr.mxu0 %v1405_v30  ;;  %v8838_v30 = vld [vmem:[#allocation27_spill] sm:$0xff]  ;;  %v8842_v41 = vld [vmem:[#allocation32_spill] sm:$0xff] }
 0x33c   : > { %v1636_v34 = vadd.f32 %v1635_v38, %v7146_v42  ;;  %1846 = vmatpush1.msra.mxu0 %v1246_v3  ;;  %1976 = vmatprep.subr.mxu1 %v1641_v61  ;;  %v8834_v42 = vld [vmem:[#allocation28_spill] sm:$0xff]  ;;  %v8844_v3 = vld [vmem:[#allocation47_spill] sm:$0xff] }
 0x33d   : > { %1977 = vmatpush1.msra.mxu1 %v1497_v46  ;;  %3861 = vmatmul.mubr.msk.f32.vlgmr.msra.gmra.mxu0 %vm867_vm1, %v5683_v14  ;;  %v8846_v61 = vld [vmem:[#allocation31_spill] sm:$0xff]  ;;  %v8848_v46 = vld [vmem:[#allocation52_spill] sm:$0xff] }
 0x33e   : > { %1978 = vmatprep.subr.mxu1 %v1636_v34  ;;  %1885 = vmatprep.mubr.f32.mxu0 %v8780_v29  ;;  %v8850_v38 = vld [vmem:[#allocation51_spill] sm:$0xff]  ;;  %v8852_v34 = vld [vmem:[#allocation56_spill] sm:$0xff] }
 0x33f   : > { %1979 = vmatpush1.msra.mxu1 %v1491_v62  ;;  %v8854_v62 = vld [vmem:[#allocation55_spill] sm:$0xff] }
 0x340   : > { %1980 = vmatprep.subr.mxu1 %v1631_v0 }
 0x341   : > { %1981 = vmatpush1.msra.mxu1 %v1485_v53  ;;  %3862 = vmatmul.mubr.msk.f32.gmra.mxu0 %vm868_vm3, %v5683_v14 }
 0x342   : > { %1982 = vmatprep.subr.mxu1 %v1626_v45  ;;  %1891 = vmatprep.mubr.f32.mxu0 %v8780_v29 }
 0x343   : > { %1983 = vmatpush1.msra.mxu1 %v1479_v17 }
 0x344   : > { %1984 = vmatprep.subr.mxu1 %v1621_v32  ;;  %v8860_v32 = vld [vmem:[#allocation38_spill] sm:$0xff] }
 0x345   : > { %1985 = vmatpush1.msra.mxu1 %v1473_v13  ;;  %3863 = vmatmul.mubr.msk.f32.gmra.mxu0 %vm869_vm0, %v5683_v14  ;;  %v8861_v13 = vld [vmem:[#allocation6_spill] sm:$0xff] }
 0x346   : > { %1986 = vmatprep.subr.mxu1 %v1616_v60  ;;  %1897 = vmatprep.mubr.f32.mxu0 %v8780_v29  ;;  %v5175_v60 = vpack.i.bf16 %v8861_v13, %v8860_v32 }
 0x347   : > { %1987 = vmatpush1.msra.mxu1 %v1467_v8  ;;  %v8862_v8 = vld [vmem:[#allocation37_spill] sm:$0xff] }
 0x348   : > { %1988 = vmatprep.subr.mxu1 %v1611_v21  ;;  %5176 = vxpose.xlu0.b32.start [1/16] %v5175_v60, 128  ;;  %v8863_v21 = vld [vmem:[#allocation10_spill] sm:$0xff] }
 0x349   : > { %1989 = vmatpush1.msra.mxu1 %v1461_v1  ;;  %3864 = vmatmul.mubr.msk.f32.gmra.mxu0 %vm870_vm2, %v5683_v14  ;;  %v5177_v1 = vpack.i.bf16 %v8863_v21, %v8862_v8 }
 0x34a   : > { %1990 = vmatprep.subr.mxu1 %v1606_v51  ;;  %1903 = vmatprep.mubr.f32.mxu0 %v8780_v29  ;;  %v8864_v51 = vld [vmem:[#allocation42_spill] sm:$0xff] }
 0x34b   : > { %1991 = vmatpush1.msra.mxu1 %v1455_v35  ;;  %v8865_v35 = vld [vmem:[#allocation5_spill] sm:$0xff] }
 0x34c   : > { %1992 = vmatprep.subr.mxu1 %v1601_v6  ;;  %5178 = vxpose.xlu0.b32.cont [2/16] %v5177_v1, 128  ;;  %v5179_v6 = vpack.i.bf16 %v8865_v35, %v8864_v51 }
 0x34d   : > { %1993 = vmatpush1.msra.mxu1 %v1449_v40  ;;  %3865 = vmatmul.mubr.msk.f32.gmra.mxu0 %vm871_vm5, %v5683_v14  ;;  %v8866_v40 = vld [vmem:[#allocation41_spill] sm:$0xff] }
 0x34e   : > { %1994 = vmatprep.subr.mxu1 %v1596_v19  ;;  %1909 = vmatprep.mubr.f32.mxu0 %v8780_v29  ;;  %v8867_v19 = vld [vmem:[#allocation9_spill] sm:$0xff] }
 0x34f   : > { %1995 = vmatpush1.msra.mxu1 %v1443_v55  ;;  %v5181_v55 = vpack.i.bf16 %v8867_v19, %v8866_v40 }
 0x350   : > { %1996 = vmatprep.subr.mxu1 %v1591_v59  ;;  %5180 = vxpose.xlu0.b32.cont [3/16] %v5179_v6, 128  ;;  %v8868_v59 = vld [vmem:[#allocation46_spill] sm:$0xff] }
 0x351   : > { %1997 = vmatpush1.msra.mxu1 %v1437_v57  ;;  %3866 = vmatmul.mubr.msk.f32.gmra.mxu0 %vm872_vm4, %v5683_v14 }
 0x352   : > { %1998 = vmatprep.subr.mxu1 %v1586_v4  ;;  %1915 = vmatprep.mubr.f32.mxu0 %v8780_v29  ;;  %v8870_v4 = vld [vmem:[#allocation45_spill] sm:$0xff] }
 0x353   : > { %1999 = vmatpush1.msra.mxu1 %v1431_v50  ;;  %v8871_v50 = vld [vmem:[#allocation13_spill] sm:$0xff] }
 0x354   : > { %2000 = vmatprep.subr.mxu1 %v1581_v47  ;;  %5182 = vxpose.xlu0.b32.cont [4/16] %v5181_v55, 128  ;;  %v5185_v47 = vpack.i.bf16 %v8871_v50, %v8870_v4 }
 0x355   : > { %2001 = vmatpush1.msra.mxu1 %v1425_v23  ;;  %3867 = vmatmul.mubr.msk.f32.gmra.mxu0 %vm873_vm7, %v5683_v14  ;;  %v8873_v23 = vld [vmem:[#allocation18_spill] sm:$0xff] }
 0x356   : > { %2002 = vmatprep.subr.mxu1 %v1576_v49  ;;  %1921 = vmatprep.mubr.f32.mxu0 %v8780_v29  ;;  %v5187_v49 = vpack.i.bf16 %v8873_v23, %v8872_v10 }
 0x357   : > { %2003 = vmatpush1.msra.mxu1 %v1419_v26  ;;  %v8875_v26 = vld [vmem:[#allocation17_spill] sm:$0xff] }
 0x358   : > { %2004 = vmatprep.subr.mxu1 %v1571_v16  ;;  %v5189_v18 = vpack.i.bf16 %v8875_v26, %v8874_v27  ;;  %v8876_v16 = vld [vmem:[#allocation54_spill] sm:$0xff] }
 0x359   : > { %2005 = vmatpush1.msra.mxu1 %v1413_v52  ;;  %3868 = vmatmul.mubr.msk.f32.gmra.mxu0 %vm8817_vm6, %v5683_v14  ;;  %vm8827_vm6 = vcmp.eq.s32.totalorder %v8746_v5, %v8826_v43  ;;  %v5191_v52 = vpack.i.bf16 %v8877_v20, %v8876_v16  ;;  %v8884_v43 = vld [vmem:[#allocation62_spill] sm:$0xff] }
 0x35a   : > { %2006 = vmatprep.subr.mxu1 %v1566_v2  ;;  %1927 = vmatprep.mubr.f32.mxu0 %v8780_v29  ;;  %v8878_v2 = vld [vmem:[#allocation53_spill] sm:$0xff]  ;;  %v7454_v20 = vld [vmem:[%s1662_s13] ss:$0 sm:$0xff] }
 0x35b   : > { %2007 = vmatpush1.msra.mxu1 %v1407_v63  ;;  %v5193_v63 = vpack.i.bf16 %v8879_v15, %v8878_v2 }
 0x35c   : > { %3877 = vmatmul.mubr.msk.f32.vlgmr.msra.gmra.mxu1 %vm979_vm12, %v5683_v14 }
 0x35d   : > { %2046 = vmatprep.mubr.f32.mxu1 %v8780_v29  ;;  %3869 = vmatmul.mubr.msk.f32.gmra.mxu0 %vm8820_vm9, %v5683_v14  ;;  %vm8825_vm9 = vcmp.eq.s32.totalorder %v8746_v5, %v8824_v7  ;;  %v5197_v7 = vpack.i.bf16 %v8883_v28, %v8882_v48 }
 0x35e   : > { %1933 = vmatprep.mubr.f32.mxu0 %v8780_v29 }
 0x360   : > { %3878 = vmatmul.mubr.msk.f32.gmra.mxu1 %vm980_vm14, %v5683_v14 }
 0x361   : > { %2052 = vmatprep.mubr.f32.mxu1 %v8780_v29  ;;  %3870 = vmatmul.mubr.msk.f32.gmra.mxu0 %vm8823_vm8, %v5683_v14  ;;  %vm8829_vm8 = vcmp.eq.s32.totalorder %v8746_v5, %v8828_v31  ;;  %v8885_v31 = vld [vmem:[#allocation30_spill] sm:$0xff] }
 0x362   : > { %1939 = vmatprep.mubr.f32.mxu0 %v8780_v29 }
 0x364   : > { %3879 = vmatmul.mubr.msk.f32.gmra.mxu1 %vm8825_vm9, %v5683_v14  ;;  %vm8831_vm9 = vcmp.eq.s32.totalorder %v8746_v5, %v8830_v9  ;;  %v5199_v9 = vpack.i.bf16 %v8885_v31, %v8884_v43 }
 0x365   : > { %2058 = vmatprep.mubr.f32.mxu1 %v8780_v29  ;;  %3871 = vmatmul.mubr.msk.f32.gmra.mxu0 %vm8827_vm6, %v5683_v14  ;;  %vm8833_vm6 = vcmp.eq.s32.totalorder %v8746_v5, %v8832_v33  ;;  %v8886_v33 = vld [vmem:[#allocation61_spill] sm:$0xff] }
 0x366   : > { %1945 = vmatprep.mubr.f32.mxu0 %v8780_v29 }
 0x368   : > { %3880 = vmatmul.mubr.msk.f32.gmra.mxu1 %vm8829_vm8, %v5683_v14  ;;  %vm8835_vm8 = vcmp.eq.s32.totalorder %v8746_v5, %v8834_v42  ;;  %v8887_v42 = vld [vmem:[#allocation29_spill] sm:$0xff] }
 0x369   : > { %2064 = vmatprep.mubr.f32.mxu1 %v8780_v29  ;;  %3872 = vmatmul.mubr.msk.f32.gmra.mxu0 %vm8831_vm9, %v5683_v14  ;;  %vm8837_vm9 = vcmp.eq.s32.totalorder %v8746_v5, %v8836_v39  ;;  %v5201_v39 = vpack.i.bf16 %v8887_v42, %v8886_v33  ;;  %v8893_v42 = vld [vmem:[#allocation82_spill] sm:$0xff] }
 0x36a   : > { %1951 = vmatprep.mubr.f32.mxu0 %v8780_v29 }
 0x36c   : > { %3881 = vmatmul.mubr.msk.f32.gmra.mxu1 %vm8833_vm6, %v5683_v14  ;;  %vm8839_vm6 = vcmp.eq.s32.totalorder %v8746_v5, %v8838_v30  ;;  %v8888_v30 = vld [vmem:[#allocation66_spill] sm:$0xff] }
 0x36d   : > { %2070 = vmatprep.mubr.f32.mxu1 %v8780_v29  ;;  %3873 = vmatmul.mubr.msk.f32.gmra.mxu0 %vm8835_vm8, %v5683_v14  ;;  %vm8841_vm8 = vcmp.eq.s32.totalorder %v8746_v5, %v8840_v44  ;;  %v8889_v44 = vld [vmem:[#allocation34_spill] sm:$0xff] }
 0x36e   : > { %1957 = vmatprep.mubr.f32.mxu0 %v8780_v29 }
 0x370   : > { %3882 = vmatmul.mubr.msk.f32.gmra.mxu1 %vm8837_vm9, %v5683_v14  ;;  %vm8843_vm9 = vcmp.eq.s32.totalorder %v8746_v5, %v8842_v41  ;;  %v5203_v41 = vpack.i.bf16 %v8889_v44, %v8888_v30 }
 0x371   : > { %2076 = vmatprep.mubr.f32.mxu1 %v8780_v29  ;;  %3874 = vmatmul.mubr.msk.f32.gmra.mxu0 %vm8839_vm6, %v5683_v14  ;;  %vm8845_vm6 = vcmp.eq.s32.totalorder %v8746_v5, %v8844_v3  ;;  %v4658_v3 = vpop.f32.mrf.mxu1 }
 0x372   : > { %1963 = vmatprep.mubr.f32.mxu0 %v8780_v29  ;;  %v1742_v43 = vadd.f32 %v4658_v3, %v7454_v20 }
 0x374   : > { %3883 = vmatmul.mubr.msk.f32.gmra.mxu1 %vm8841_vm8, %v5683_v14  ;;  %vm8847_vm8 = vcmp.eq.s32.totalorder %v8746_v5, %v8846_v61  ;;  %v8890_v61 = vld [vmem:[#allocation65_spill] sm:$0xff] }
 0x375   : > { %2082 = vmatprep.mubr.f32.mxu1 %v8780_v29  ;;  %3875 = vmatmul.mubr.msk.f32.gmra.mxu0 %vm8843_vm9, %v5683_v14  ;;  %vm8849_vm9 = vcmp.eq.s32.totalorder %v8746_v5, %v8848_v46  ;;  %v8891_v46 = vld [vmem:[#allocation33_spill] sm:$0xff] }
 0x376   : > { %1969 = vmatprep.mubr.f32.mxu0 %v8780_v29 }
 0x378   : > { %3884 = vmatmul.mubr.msk.f32.gmra.mxu1 %vm8845_vm6, %v5683_v14  ;;  %vm8851_vm6 = vcmp.eq.s32.totalorder %v8746_v5, %v8850_v38  ;;  %v5205_v38 = vpack.i.bf16 %v8891_v46, %v8890_v61 }
 0x379   : > { %2088 = vmatprep.mubr.f32.mxu1 %v8780_v29  ;;  %3876 = vmatmul.mubr.msk.f32.gmra.mxu0 %vm8847_vm8, %v5683_v14  ;;  %vm8853_vm8 = vcmp.eq.s32.totalorder %v8746_v5, %v8852_v34  ;;  %v1736_v34 = vpop.f32.mrf.mxu1 }
 0x37a   : > { %2409 = vmatprep.mubr.f32.mxu0 %v8780_v29 }
 0x37c   : > { %3885 = vmatmul.mubr.msk.f32.gmra.mxu1 %vm8849_vm9, %v5683_v14  ;;  %vm8855_vm9 = vcmp.eq.s32.totalorder %v8746_v5, %v8854_v62  ;;  %v4661_v62 = vpop.f32.mrf.mxu1 }
 0x37d   : > { %2094 = vmatprep.mubr.f32.mxu1 %v8780_v29 }
 0x37e   : > { %v1746_v0 = vpop.f32.mrf.mxu1 }
 0x37f   : > { %v1747_v61 = vadd.f32 %v7454_v20, %v1746_v0 }
 0x380   : > { %3886 = vmatmul.mubr.msk.f32.gmra.mxu1 %vm8851_vm6, %v5683_v14  ;;  %v7404_v53 = vpop.f32.mrf.mxu1 }
 0x381   : > { %2100 = vmatprep.mubr.f32.mxu1 %v8780_v29 }
 0x382   : > { %v7406_v45 = vpop.f32.mrf.mxu1 }
 0x384   : > { %3887 = vmatmul.mubr.msk.f32.gmra.mxu1 %vm8853_vm8, %v5683_v14  ;;  %v7408_v17 = vpop.f32.mrf.mxu1 }
 0x385   : > { %2106 = vmatprep.mubr.f32.mxu1 %v8780_v29 }
 0x386   : > { %v7410_v32 = vpop.f32.mrf.mxu1 }
 0x388   : > { %3888 = vmatmul.mubr.msk.f32.gmra.mxu1 %vm8855_vm9, %v5683_v14  ;;  %v7414_v60 = vpop.f32.mrf.mxu1 }
 0x389   : > { %2112 = vmatprep.mubr.f32.mxu1 %v8780_v29 }
 0x38a   : > { %v7418_v1 = vpop.f32.mrf.mxu1 }
 0x38c   : > { %3889 = vmatmul.mubr.msk.f32.gmra.mxu1 %vm991_vm13, %v5683_v14  ;;  %v7422_v6 = vpop.f32.mrf.mxu1 }
 0x38d   : > { %2118 = vmatprep.mubr.f32.mxu1 %v8780_v29 }
 0x38e   : > { %v7426_v55 = vpop.f32.mrf.mxu1 }
 0x390   : > { %3890 = vmatmul.mubr.msk.f32.gmra.mxu1 %vm992_vm15, %v5683_v14 }
 0x391   : > { %2124 = vmatprep.mubr.f32.mxu1 %v8780_v29 }
 0x394   : > { %3891 = vmatmul.mubr.msk.f32.gmra.mxu1 %vm993_vm10, %v5683_v14 }
 0x395   : > { %2130 = vmatprep.mubr.f32.mxu1 %v8780_v29 }
 0x398   : > { %3892 = vmatmul.mubr.msk.f32.gmra.mxu1 %vm994_vm11, %v5683_v14  ;;  %v8869_v14 = vld [vmem:[#allocation14_spill] sm:$0xff] }
 0x399   : > { %2618 = vmatprep.mubr.f32.mxu1 %v8780_v29  ;;  %v5183_v57 = vpack.i.bf16 %v8869_v14, %v8868_v59 }
 0x39b   : > { %5184 = vxpose.xlu0.b32.cont [5/16] %v5183_v57, 128  ;;  %v7430_v57 = vpop.f32.mrf.mxu1 }
 0x39f   : > { %5186 = vxpose.xlu0.b32.cont [6/16] %v5185_v47, 128  ;;  %v7434_v47 = vpop.f32.mrf.mxu1 }
 0x3a3   : > { %5188 = vxpose.xlu0.b32.cont [7/16] %v5187_v49, 128  ;;  %v7440_v49 = vpop.f32.mrf.mxu1 }
 0x3a7   : > { %5190 = vxpose.xlu0.b32.cont [8/16] %v5189_v18, 128  ;;  %v7450_v18 = vpop.f32.mrf.mxu1 }
 0x3ab   : > { %5192 = vxpose.xlu0.b32.cont [9/16] %v5191_v52, 128 }
 0x3af   : > { %5194 = vxpose.xlu0.b32.cont [10/16] %v5193_v63, 128  ;;  %v1737_v63 = vadd.f32 %v7454_v20, %v1736_v34 }
 0x3b3   : > { %5196 = vxpose.xlu0.b32.cont [11/16] %v5195_v58, 128 }
 0x3b7   : > { %5198 = vxpose.xlu0.b32.cont [12/16] %v5197_v7, 128 }
 0x3bb   : > { %5200 = vxpose.xlu0.b32.cont [13/16] %v5199_v9, 128 }
 0x3bf   : > { %5202 = vxpose.xlu0.b32.cont [14/16] %v5201_v39, 128 }
 0x3c3   : > { %5204 = vxpose.xlu0.b32.cont [15/16] %v5203_v41, 128 }
 0x3c7   : > { %5206 = vxpose.xlu0.b32.end [16/16] %v5205_v38, 128 }
 0x3fd   : > { %v7412_v13 = vpop.f32.mrf.mxu0 }
 0x3ff   : > { %v1883_v8 = vpop.f32.mrf.mxu0 }
 0x401   : > { %v7416_v21 = vpop.f32.mrf.mxu0 }
 0x403   : > { %v1889_v51 = vpop.f32.mrf.mxu0 }
 0x405   : > { %v7420_v35 = vpop.f32.mrf.mxu0 }
 0x407   : > { %v1895_v40 = vpop.f32.mrf.mxu0  ;;  %v7465_v7 = vpop.trf.xlu0 }
 0x409   : > { %v7424_v19 = vpop.f32.mrf.mxu0 }
 0x40b   : > { %v1901_v59 = vpop.f32.mrf.mxu0  ;;  %v7476_v38 = vpop.trf.xlu0 }
 0x40d   : > { %v7428_v14 = vpop.f32.mrf.mxu0 }
 0x40f   : > { %v1907_v4 = vpop.f32.mrf.mxu0  ;;  %v7487_v0 = vpop.trf.xlu0 }
 0x410   : > { %8898 = vst [vmem:[#allocation106_spill] sm:$0xff] %v7487_v0 }
 0x411   : > { %v7432_v50 = vpop.f32.mrf.mxu0 }
 0x413   : > { %v7436_v10 = vpop.f32.mrf.mxu0 }
 0x415   : > { %v7438_v23 = vpop.f32.mrf.mxu0 }
 0x417   : > { %v7442_v27 = vpop.f32.mrf.mxu0 }
 0x419   : > { %v7448_v26 = vpop.f32.mrf.mxu0 }
 0x41b   : > { %v7452_v16 = vpop.f32.mrf.mxu0 }
 0x41c   : > { %v7456_v52 = vpop.f32.mrf.mxu1 }
 0x41d   : > { %v7458_v2 = vpop.f32.mrf.mxu0 }
 0x41e   : > { %v2044_v15 = vpop.f32.mrf.mxu1 }
 0x41f   : > { %v2137_v56 = vadd.f32 %v2044_v15, %v1883_v8  ;;  %v7463_v48 = vpop.f32.mrf.mxu0 }
 0x420   : > { %v7461_v22 = vpop.f32.mrf.mxu1 }
 0x421   : > { %v2153_v58 = vadd.f32 %v2137_v56, %v1737_v63  ;;  %v7473_v41 = vpop.f32.mrf.mxu0 }
 0x422   : > { %v2050_v28 = vpop.f32.mrf.mxu1 }
 0x423   : > { %v2169_v31 = vmax.f32 %v2153_v58, 0.0  ;;  %v2138_v9 = vadd.f32 %v2050_v28, %v1889_v51  ;;  %v8896_v51 = vld [vmem:[#allocation81_spill] sm:$0xff]  ;;  %v7484_v58 = vpop.f32.mrf.mxu0  ;;  %v1752_v28 = vadd.f32 %v4661_v62, %v7454_v20 }
 0x424   : > { %v7468_v33 = vpop.f32.mrf.mxu1 }
 0x425   : > { %v7471_v39 = vadd.f32 %v8893_v42, %v2169_v31   ;;  %v2154_v44 = vadd.f32 %v2138_v9, %v1742_v43 }
 0x426   : > { %v2056_v46 = vpop.f32.mrf.mxu1 }
 0x427   : > { %8894 = vst [vmem:[#allocation120_spill] sm:$0xff] %v7471_v39  ;;  %v8895_v30 = vmov %v7471_v39  ;;  %v2170_v8 = vmax.f32 %v2154_v44, 0.0  ;;  %v2139_v15 = vadd.f32 %v2056_v46, %v1895_v40  ;;  %v8899_v40 = vld [vmem:[#allocation80_spill] sm:$0xff] }
 0x428   : > { %v3893_v34 = vmul.f32 -1.442695, %v8895_v30  ;;  %v7479_v3 = vpop.f32.mrf.mxu1 }
 0x429   : > { %v7482_v63 = vadd.f32 %v8896_v51, %v2170_v8   ;;  %v2155_v56 = vadd.f32 %v2139_v15, %v1747_v61  ;;  %v7495_v8 = vpop.f32.mrf.mxu0  ;;  %v1757_v61 = vadd.f32 %v7454_v20, %v7406_v45  ;;  %v7499_v15 = vpop.trf.xlu0 }
 0x42a   : > { %5287 = vpow2.f32 %v3893_v34  ;;  %v2062_v43 = vpop.f32.mrf.mxu1 }
 0x42b   : > { %8897 = vst [vmem:[#allocation121_spill] sm:$0xff] %v7482_v63  ;;  %v3894_v31 = vmul.f32 -1.442695, %v7482_v63  ;;  %v2171_v9 = vmax.f32 %v2155_v56, 0.0  ;;  %v2140_v42 = vadd.f32 %v2062_v43, %v1901_v59  ;;  %v8902_v43 = vld [vmem:[#allocation79_spill] sm:$0xff] }
 0x42c   : > { %v7490_v39 = vpop.f32.mrf.mxu1 }
 0x42d   : > { %5289 = vpow2.f32 %v3894_v31  ;;  %v7493_v44 = vadd.f32 %v8899_v40, %v2171_v9   ;;  %v2156_v34 = vadd.f32 %v2140_v42, %v1752_v28  ;;  %v7507_v28 = vpop.f32.mrf.mxu0  ;;  %v1762_v42 = vadd.f32 %v7404_v53, %v7454_v20  ;;  %v7511_v40 = vpop.trf.xlu0 }
 0x42e   : > { %v2068_v62 = vpop.f32.mrf.mxu1  ;;  %8905 = vst [vmem:[#allocation104_spill] sm:$0xff] %v7511_v40  ;;  %v1767_v53 = vadd.f32 %v7454_v20, %v7410_v32  ;;  %v1772_v32 = vadd.f32 %v7408_v17, %v7454_v20 }
 0x42f   : > { %8900 = vst [vmem:[#allocation122_spill] sm:$0xff] %v7493_v44  ;;  %v8901_v46 = vmov %v7493_v44  ;;  %v2172_v36 = vmax.f32 %v2156_v34, 0.0  ;;  %v2141_v56 = vadd.f32 %v2068_v62, %v1907_v4  ;;  %v8906_v62 = vld [vmem:[#allocation78_spill] sm:$0xff] }
 0x430   : > { %v3895_v51 = vmul.f32 -1.442695, %v8901_v46  ;;  %v7502_v59 = vpop.f32.mrf.mxu1 }
 0x431   : > { %v7505_v31 = vadd.f32 %v8902_v43, %v2172_v36   ;;  %v2157_v9 = vadd.f32 %v2141_v56, %v1757_v61 }
 0x432   : > { %5291 = vpow2.f32 %v3895_v51  ;;  %v2074_v45 = vpop.f32.mrf.mxu1  ;;  %v7520_v51 = vpop.f32.mrf.mxu0 }
 0x433   : > { %8903 = vst [vmem:[#allocation123_spill] sm:$0xff] %v7505_v31  ;;  %v8904_v37 = vmov %v7505_v31  ;;  %v2173_v24 = vmax.f32 %v2157_v9, 0.0  ;;  %v2142_v4 = vadd.f32 %v2074_v45, %v7436_v10  ;;  %v7524_v31 = vpop.trf.xlu0 }
 0x434   : > { %v3896_v44 = vmul.f32 -1.442695, %v8904_v37  ;;  %v7515_v34 = vpop.f32.mrf.mxu1  ;;  %8909 = vst [vmem:[#allocation102_spill] sm:$0xff] %v7524_v31 }
 0x435   : > { %v2158_v61 = vadd.f32 %v2142_v4, %v1762_v42  ;;  %v7533_v4 = vpop.f32.mrf.mxu0 }
 0x436   : > { %5293 = vpow2.f32 %v3896_v44  ;;  %v7518_v44 = vadd.f32 %v8906_v62, %v2173_v24   ;;  %v2080_v43 = vpop.f32.mrf.mxu1  ;;  %v8910_v24 = vld [vmem:[#allocation77_spill] sm:$0xff] }
 0x437   : > { %v5288_v56 = vpop.eup %5287  ;;  %v2174_v10 = vmax.f32 %v2158_v61, 0.0  ;;  %v2143_v45 = vadd.f32 %v2080_v43, %v7442_v27  ;;  %v7537_v12 = vpop.trf.xlu0 }
 0x438   : > { %8907 = vst [vmem:[#allocation124_spill] sm:$0xff] %v7518_v44  ;;  %v8908_v36 = vmov %v7518_v44  ;;  %v2249_v11 = vadd.f32 1.0, %v5288_v56  ;;  %v7528_v25 = vpop.f32.mrf.mxu1  ;;  %8912 = vst [vmem:[#allocation100_spill] sm:$0xff] %v7537_v12  ;;  %v7546_v30 = vpop.f32.mrf.mxu0 }
 0x439   : > { %v3897_v9 = vmul.f32 -1.442695, %v8908_v36  ;;  %v7531_v42 = vadd.f32 %v8910_v24, %v2174_v10   ;;  %v2159_v44 = vadd.f32 %v2143_v45, %v1767_v53  ;;  %v8913_v53 = vld [vmem:[#allocation76_spill] sm:$0xff] }
 0x43a   : > { %5295 = vrcp.f32 %v2249_v11  ;;  %v5290_v62 = vpop.eup %5289  ;;  %v2086_v56 = vpop.f32.mrf.mxu1 }
 0x43b   : > { %8911 = vst [vmem:[#allocation125_spill] sm:$0xff] %v7531_v42  ;;  %5297 = vpow2.f32 %v3897_v9  ;;  %v2250_v61 = vadd.f32 1.0, %v5290_v62  ;;  %v3898_v27 = vmul.f32 -1.442695, %v7531_v42  ;;  %v2175_v43 = vmax.f32 %v2159_v44, 0.0  ;;  %v7550_v63 = vpop.trf.xlu0 }
 0x43c   : > { %v2144_v11 = vadd.f32 %v2086_v56, %v7452_v16  ;;  %v7541_v5 = vpop.f32.mrf.mxu1  ;;  %v1777_v9 = vadd.f32 %v7454_v20, %v7418_v1  ;;  %8916 = vst [vmem:[#allocation82_spill] sm:$0xff] %v7550_v63  ;;  %v1782_v1 = vadd.f32 %v7414_v60, %v7454_v20 }
 0x43d   : > { %5299 = vrcp.f32 %v2250_v61  ;;  %v7544_v10 = vadd.f32 %v8913_v53, %v2175_v43  }
 0x43e   : > { %v2160_v24 = vadd.f32 %v2144_v11, %v1772_v32  ;;  %5301 = vpow2.f32 %v3898_v27  ;;  %v2092_v62 = vpop.f32.mrf.mxu1  ;;  %v8917_v32 = vld [vmem:[#allocation75_spill] sm:$0xff] }
 0x43f   : > { %8914 = vst [vmem:[#allocation126_spill] sm:$0xff] %v7544_v10  ;;  %v8915_v45 = vmov %v7544_v10  ;;  %v5292_v17 = vpop.eup %5291  ;;  %v2145_v61 = vadd.f32 %v2092_v62, %v7463_v48  ;;  %v1955_v10 = vpop.f32.mrf.mxu0 }
 0x440   : > { %v2251_v44 = vadd.f32 1.0, %v5292_v17  ;;  %v3899_v16 = vmul.f32 -1.442695, %v8915_v45  ;;  %v2176_v56 = vmax.f32 %v2160_v24, 0.0  ;;  %v7554_v46 = vpop.f32.mrf.mxu1  ;;  %v7561_v17 = vpop.trf.xlu0 }
 0x441   : > { %v2161_v53 = vadd.f32 %v2145_v61, %v1777_v9  ;;  %8920 = vst [vmem:[#allocation81_spill] sm:$0xff] %v7561_v17 }
 0x442   : > { %5303 = vrcp.f32 %v2251_v44  ;;  %v7557_v43 = vadd.f32 %v8917_v32, %v2176_v56   ;;  %v2098_v27 = vpop.f32.mrf.mxu1  ;;  %v8921_v56 = vld [vmem:[#allocation74_spill] sm:$0xff] }
 0x443   : > { %v5294_v37 = vpop.eup %5293  ;;  %5305 = vpow2.f32 %v3899_v16  ;;  %v2177_v48 = vmax.f32 %v2161_v53, 0.0  ;;  %v2146_v62 = vadd.f32 %v2098_v27, %v7484_v58  ;;  %v1787_v53 = vadd.f32 %v7454_v20, %v7426_v55 }
 0x444   : > { %8918 = vst [vmem:[#allocation127_spill] sm:$0xff] %v7557_v43  ;;  %v8919_v11 = vmov %v7557_v43  ;;  %v2252_v36 = vadd.f32 1.0, %v5294_v37  ;;  %v7565_v44 = vpop.f32.mrf.mxu1  ;;  %v7570_v43 = vpop.f32.mrf.mxu0 }
 0x445   : > { %v3900_v24 = vmul.f32 -1.442695, %v8919_v11  ;;  %v7568_v9 = vadd.f32 %v8921_v56, %v2177_v48   ;;  %v2162_v32 = vadd.f32 %v2146_v62, %v1782_v1  ;;  %v7574_v42 = vpop.trf.xlu0 }
 0x446   : > { %5307 = vrcp.f32 %v2252_v36  ;;  %v2104_v16 = vpop.f32.mrf.mxu1  ;;  %8924 = vst [vmem:[#allocation80_spill] sm:$0xff] %v7574_v42  ;;  %v1961_v45 = vpop.f32.mrf.mxu0 }
 0x447   : > { %8922 = vst [vmem:[#allocation128_spill] sm:$0xff] %v7568_v9  ;;  %v8923_v61 = vmov %v7568_v9  ;;  %v7572_v60 = vpop.eup %5295  ;;  %5309 = vpow2.f32 %v3900_v24  ;;  %v2178_v27 = vmax.f32 %v2162_v32, 0.0  ;;  %v2147_v36 = vadd.f32 %v2104_v16, %v7507_v28  ;;  %v8925_v24 = vld [vmem:[#allocation73_spill] sm:$0xff] }
 0x448   : > { %v5298_v37 = vpop.eup %5297  ;;  %v3901_v58 = vmul.f32 -1.442695, %v8923_v61  ;;  %v7580_v56 = vpop.f32.mrf.mxu1  ;;  %v7584_v1 = vmul.f32 %v7572_v60, %v7456_v52  ;;  %v1792_v16 = vadd.f32 %v7422_v6, %v7454_v20 }
 0x449   : > { %v2253_v48 = vadd.f32 1.0, %v5298_v37  ;;  %v7587_v62 = vadd.f32 %v8925_v24, %v2178_v27   ;;  %v2163_v9 = vadd.f32 %v2147_v36, %v1787_v53  ;;  %v7591_v32 = vpop.trf.xlu0  ;;  %v8928_v36 = vld [vmem:[#allocation72_spill] sm:$0xff]  ;;  %v7606_v54 = vpop.f32.mrf.mxu0 }
 0x44a   : > { %5311 = vpow2.f32 %v3901_v58  ;;  %v7589_v11 = vpop.eup %5299  ;;  %v2110_v55 = vpop.f32.mrf.mxu1  ;;  %8927 = vst [vmem:[#allocation79_spill] sm:$0xff] %v7591_v32 }
 0x44b   : > { %8926 = vst [vmem:[#allocation129_spill] sm:$0xff] %v7587_v62  ;;  %5313 = vrcp.f32 %v2253_v48  ;;  %v5302_v28 = vpop.eup %5301  ;;  %v3902_v37 = vmul.f32 -1.442695, %v7587_v62  ;;  %v2179_v52 = vmax.f32 %v2163_v9, 0.0  ;;  %v2148_v58 = vadd.f32 %v2110_v55, %v7533_v4 }
 0x44c   : > { %v2254_v61 = vadd.f32 1.0, %v5302_v28  ;;  %v7597_v27 = vpop.f32.mrf.mxu1  ;;  %v7601_v53 = vmul.f32 %v7589_v11, %v7461_v22 }
 0x44d   : > { %5315 = vpow2.f32 %v3902_v37  ;;  %v7604_v48 = vadd.f32 %v8928_v36, %v2179_v52   ;;  %v2164_v24 = vadd.f32 %v2148_v58, %v1792_v16  ;;  %v7610_v62 = vpop.trf.xlu0  ;;  %v1797_v16 = vadd.f32 %v7454_v20, %v7434_v47  ;;  %v1967_v58 = vpop.f32.mrf.mxu0 }
 0x44e   : > { %5317 = vrcp.f32 %v2254_v61  ;;  %v2116_v9 = vpop.f32.mrf.mxu1  ;;  %8930 = vst [vmem:[#allocation78_spill] sm:$0xff] %v7610_v62  ;;  %v8931_v61 = vld [vmem:[#allocation71_spill] sm:$0xff] }
 0x44f   : > { %8929 = vst [vmem:[#allocation130_spill] sm:$0xff] %v7604_v48  ;;  %v7608_v6 = vpop.eup %5303  ;;  %v3903_v55 = vmul.f32 -1.442695, %v7604_v48  ;;  %v2180_v28 = vmax.f32 %v2164_v24, 0.0  ;;  %v2149_v32 = vadd.f32 %v2116_v9, %v1955_v10 }
 0x450   : > { %v5306_v4 = vpop.eup %5305  ;;  %v7613_v42 = vpop.f32.mrf.mxu1  ;;  %v7617_v37 = vmul.f32 %v7608_v6, %v7468_v33 }
 0x451   : > { %v2255_v22 = vadd.f32 1.0, %v5306_v4  ;;  %5319 = vpow2.f32 %v3903_v55  ;;  %v7622_v52 = vadd.f32 %v8931_v61, %v2180_v28   ;;  %v7626_v10 = vpop.trf.xlu0  ;;  %v1802_v4 = vadd.f32 %v7430_v57, %v7454_v20  ;;  %v7637_v61 = vpop.f32.mrf.mxu0 }
 0x452   : > { %v2122_v24 = vpop.f32.mrf.mxu1  ;;  %8934 = vst [vmem:[#allocation77_spill] sm:$0xff] %v7626_v10  ;;  %v2165_v48 = vadd.f32 %v2149_v32, %v1797_v16 }
 0x453   : > { %8932 = vst [vmem:[#allocation131_spill] sm:$0xff] %v7622_v52  ;;  %v8933_v36 = vmov %v7622_v52  ;;  %v7624_v62 = vpop.eup %5307  ;;  %5321 = vrcp.f32 %v2255_v22  ;;  %v2150_v17 = vadd.f32 %v2122_v24, %v1961_v45  ;;  %v1807_v45 = vadd.f32 %v7454_v20, %v7450_v18 }
 0x454   : > { %v5310_v9 = vpop.eup %5309  ;;  %v3904_v33 = vmul.f32 -1.442695, %v8933_v36  ;;  %v7631_v55 = vpop.f32.mrf.mxu1  ;;  %v7635_v28 = vmul.f32 %v7624_v62, %v7479_v3  ;;  %v2181_v16 = vmax.f32 %v2165_v48, 0.0  ;;  %v1812_v36 = vadd.f32 %v7440_v49, %v7454_v20  ;;  %v8943_v49 = vld [vmem:[#allocation68_spill] sm:$0xff] }
 0x455   : > { %v2256_v47 = vadd.f32 1.0, %v5310_v9  ;;  %v2166_v22 = vadd.f32 %v2150_v17, %v1802_v4  ;;  %v7639_v63 = vpop.trf.xlu0 }
 0x456   : > { %5323 = vpow2.f32 %v3904_v33  ;;  %v2128_v10 = vpop.f32.mrf.mxu1  ;;  %8935 = vst [vmem:[#allocation76_spill] sm:$0xff] %v7639_v63  ;;  %v1973_v33 = vpop.f32.mrf.mxu0 }
 0x457   : > { %v5312_v52 = vpop.eup %5311  ;;  %5325 = vrcp.f32 %v2256_v47  ;;  %v2151_v24 = vadd.f32 %v2128_v10, %v1967_v58  ;;  %v2182_v9 = vmax.f32 %v2166_v22, 0.0  ;;  %v8937_v58 = vld [vmem:[#allocation70_spill] sm:$0xff] }
 0x458   : > { %v7641_v57 = vpop.eup %5313  ;;  %v2257_v32 = vadd.f32 1.0, %v5312_v52  ;;  %v7645_v3 = vpop.f32.mrf.mxu1  ;;  %v7658_v10 = vadd.f32 %v8937_v58, %v2181_v16  }
 0x459   : > { %v7649_v17 = vmul.f32 %v7641_v57, %v7490_v39  ;;  %v2167_v4 = vadd.f32 %v2151_v24, %v1807_v45  ;;  %v7653_v12 = vpop.trf.xlu0  ;;  %v8940_v39 = vld [vmem:[#allocation69_spill] sm:$0xff] }
 0x45a   : > { %5327 = vrcp.f32 %v2257_v32  ;;  %v5316_v47 = vpop.eup %5315  ;;  %v2134_v63 = vpop.f32.mrf.mxu1  ;;  %8936 = vst [vmem:[#allocation75_spill] sm:$0xff] %v7653_v12  ;;  %8938 = vst [vmem:[#allocation132_spill] sm:$0xff] %v7658_v10  ;;  %v8939_v22 = vmov %v7658_v10  ;;  %v7661_v32 = vadd.f32 %v8940_v39, %v2182_v9  }
 0x45b   : > { %v7655_v18 = vpop.eup %5317  ;;  %v2258_v48 = vadd.f32 1.0, %v5316_v47  ;;  %v2183_v52 = vmax.f32 %v2167_v4, 0.0  ;;  %v2152_v31 = vadd.f32 %v2134_v63, %v1973_v33  ;;  %v3905_v63 = vmul.f32 -1.442695, %v8939_v22 }
 0x45c   : > { %8941 = vst [vmem:[#allocation133_spill] sm:$0xff] %v7661_v32  ;;  %v8942_v0 = vmov %v7661_v32  ;;  %v7665_v45 = vmul.f32 %v7655_v18, %v7502_v59 }
 0x45d   : > { %5329 = vrcp.f32 %v2258_v48  ;;  %v7668_v4 = vadd.f32 %v8943_v49, %v2183_v52   ;;  %v2168_v20 = vadd.f32 %v2152_v31, %v1812_v36  ;;  %v7670_v40 = vpop.trf.xlu0  ;;  %v3906_v33 = vmul.f32 -1.442695, %v8942_v0 }
 0x45e   : > { %v5320_v12 = vpop.eup %5319 }
 0x45f   : > { %v8944_v24 = vmov %v7668_v4  ;;  %v2259_v16 = vadd.f32 1.0, %v5320_v12  ;;  %v2184_v32 = vmax.f32 %v2168_v20, 0.0  ;;  %v8945_v4 = vld [vmem:[#allocation67_spill] sm:$0xff] }
 0x460   : > { %v7672_v47 = vpop.eup %5321  ;;  %v3907_v9 = vmul.f32 -1.442695, %v8944_v24 }
 0x461   : > { %v7679_v59 = vmul.f32 %v7672_v47, %v7515_v34  ;;  %5331 = vrcp.f32 %v2259_v16  ;;  %v7682_v31 = vadd.f32 %v8945_v4, %v2184_v32  }
 0x462   : > { %5333 = vpow2.f32 %v3907_v9 }
 0x463   : > { %v8946_v36 = vmov %v7682_v31  ;;  %v5324_v48 = vpop.eup %5323  ;;  %5335 = vpow2.f32 %v3905_v63 }
 0x464   : > { %v7684_v58 = vpop.eup %5325  ;;  %v2260_v12 = vadd.f32 1.0, %v5324_v48  ;;  %v3908_v10 = vmul.f32 -1.442695, %v8946_v36  ;;  %5337 = vpow2.f32 %v3906_v33 }
 0x465   : > { %v7689_v52 = vmul.f32 %v7684_v58, %v7528_v25 }
 0x466   : > { %5339 = vrcp.f32 %v2260_v12 }
 0x467   : > { %v7691_v34 = vpop.eup %5327  ;;  %5341 = vpow2.f32 %v3908_v10 }
 0x468   : > { %v7695_v39 = vmul.f32 %v7691_v34, %v7541_v5 }
 0x46a   : > { %v5330_v49 = vpop.eup %5329 }
 0x46b   : > { %v2515_v20 = vmul.f32 %v5330_v49, %v7554_v46 }
 0x46e   : > { %v5332_v16 = vpop.eup %5331 }
 0x46f   : > { %v5334_v63 = vpop.eup %5333  ;;  %v2516_v9 = vmul.f32 %v5332_v16, %v7565_v44 }
 0x470   : > { %v5336_v32 = vpop.eup %5335  ;;  %v2263_v4 = vadd.f32 1.0, %v5334_v63 }
 0x471   : > { %v5338_v33 = vpop.eup %5337  ;;  %v2261_v22 = vadd.f32 1.0, %v5336_v32 }
 0x472   : > { %v2262_v12 = vadd.f32 1.0, %v5338_v33  ;;  %5343 = vrcp.f32 %v2263_v4 }
 0x473   : > { %v5340_v25 = vpop.eup %5339 }
 0x474   : > { %v5342_v31 = vpop.eup %5341  ;;  %v2517_v48 = vmul.f32 %v5340_v25, %v7580_v56 }
 0x475   : > { %v2264_v10 = vadd.f32 1.0, %v5342_v31  ;;  %v8956_v31 = vld [vmem:[#allocation77_spill] sm:$0xff] }
 0x477   : > { %5345 = vrcp.f32 %v2264_v10  ;;  %v8957_v10 = vld [vmem:[#allocation76_spill] sm:$0xff] }
 0x478   : > { %5347 = vrcp.f32 %v2262_v12  ;;  %v5271_v12 = vunpack.i.h.bf16 %v8956_v31 }
 0x479   : > { %5349 = vrcp.f32 %v2261_v22 }
 0x47f   : > { %v5344_v5 = vpop.eup %5343 }
 0x480   : > { %v2311_v56 = vmul.f32 %v5344_v5, %v7606_v54  ;;  %v2520_v33 = vmul.f32 %v5344_v5, %v7631_v55  ;;  %v2308_v54 = vmul.f32 %v5340_v25, %v7520_v51  ;;  %v5208_v51 = vunpack.i.l.bf16 %v7465_v7  ;;  %v8950_v55 = vld [vmem:[#allocation100_spill] sm:$0xff] }
 0x484   : > { %v5346_v46 = vpop.eup %5345 }
 0x485   : > { %2345 = vmatprep.subr.mxu0 %v5346_v46  ;;  %2554 = vmatprep.subr.mxu1 %v5346_v46  ;;  %v2312_v44 = vmul.f32 %v5346_v46, %v7637_v61  ;;  %v2521_v0 = vmul.f32 %v5346_v46, %v7645_v3  ;;  %v5348_v63 = vpop.eup %5347  ;;  %v8951_v3 = vld [vmem:[#allocation82_spill] sm:$0xff]  ;;  %v5276_v46 = vunpack.i.h.bf16 %v8957_v10 }
 0x486   : > { %v5350_v4 = vpop.eup %5349  ;;  %v2310_v22 = vmul.f32 %v5348_v63, %v7570_v43  ;;  %v2519_v32 = vmul.f32 %v5348_v63, %v7613_v42  ;;  %v2307_v42 = vmul.f32 %v5332_v16, %v7495_v8  ;;  %v2305_v43 = vmul.f32 %v7691_v34, %v7458_v2 }
 0x487   : > { %2346 = vmatpush1.msra.mxu0 %v2312_v44  ;;  %2555 = vmatpush1.msra.mxu1 %v2521_v0  ;;  %v2309_v61 = vmul.f32 %v5350_v4, %v7546_v30  ;;  %v2518_v0 = vmul.f32 %v5350_v4, %v7597_v27  ;;  %v2306_v30 = vmul.f32 %v5330_v49, %v7473_v41  ;;  %v5211_v41 = vunpack.i.h.bf16 %v7465_v7  ;;  %v8958_v44 = vld [vmem:[#allocation75_spill] sm:$0xff] }
 0x488   : > { %2347 = vmatprep.subr.mxu0 %v5344_v5  ;;  %2556 = vmatprep.subr.mxu1 %v5344_v5  ;;  %v2304_v8 = vmul.f32 %v7684_v58, %v7448_v26  ;;  %v2303_v2 = vmul.f32 %v7672_v47, %v7438_v23  ;;  %v2302_v26 = vmul.f32 %v7655_v18, %v7432_v50  ;;  %v5273_v5 = vunpack.i.l.bf16 %v8957_v10 }
 0x489   : > { %2348 = vmatpush1.msra.mxu0 %v2311_v56  ;;  %2557 = vmatpush1.msra.mxu1 %v2520_v33  ;;  %v2301_v23 = vmul.f32 %v7641_v57, %v7428_v14  ;;  %v2300_v50 = vmul.f32 %v7624_v62, %v7424_v19  ;;  %v2299_v14 = vmul.f32 %v7608_v6, %v7420_v35  ;;  %v5281_v56 = vunpack.i.h.bf16 %v8958_v44 }
 0x48a   : > { %2349 = vmatprep.subr.mxu0 %v5348_v63  ;;  %2558 = vmatprep.subr.mxu1 %v5348_v63  ;;  %v2298_v19 = vmul.f32 %v7589_v11, %v7416_v21  ;;  %v2297_v35 = vmul.f32 %v7572_v60, %v7412_v13  ;;  %v5213_v21 = vunpack.i.l.bf16 %v7476_v38  ;;  %v8947_v13 = vld [vmem:[#allocation106_spill] sm:$0xff]  ;;  %v5278_v63 = vunpack.i.l.bf16 %v8958_v44 }
 0x48b   : > { %2350 = vmatpush1.msra.mxu0 %v2310_v22  ;;  %2559 = vmatpush1.msra.mxu1 %v2519_v32  ;;  %v5218_v7 = vunpack.i.l.bf16 %v8947_v13  ;;  %v5286_v33 = vunpack.i.h.bf16 %v7670_v40 }
 0x48c   : > { %2351 = vmatprep.subr.mxu0 %v5350_v4  ;;  %2560 = vmatprep.subr.mxu1 %v5350_v4  ;;  %v5283_v4 = vunpack.i.l.bf16 %v7670_v40 }
 0x48d   : > { %2352 = vmatpush1.msra.mxu0 %v2309_v61  ;;  %2561 = vmatpush1.msra.mxu1 %v2518_v0 }
 0x48e   : > { %2353 = vmatprep.subr.mxu0 %v5340_v25  ;;  %2562 = vmatprep.subr.mxu1 %v5340_v25 }
 0x48f   : > { %2354 = vmatpush1.msra.mxu0 %v2308_v54  ;;  %2563 = vmatpush1.msra.mxu1 %v2517_v48  ;;  %v5268_v48 = vunpack.i.l.bf16 %v8956_v31 }
 0x490   : > { %2355 = vmatprep.subr.mxu0 %v5332_v16  ;;  %2564 = vmatprep.subr.mxu1 %v5332_v16  ;;  %v8955_v16 = vld [vmem:[#allocation78_spill] sm:$0xff] }
 0x491   : > { %2356 = vmatpush1.msra.mxu0 %v2307_v42  ;;  %2565 = vmatpush1.msra.mxu1 %v2516_v9  ;;  %v5263_v9 = vunpack.i.l.bf16 %v8955_v16  ;;  %v5266_v25 = vunpack.i.h.bf16 %v8955_v16 }
 0x492   : > { %2357 = vmatprep.subr.mxu0 %v5330_v49  ;;  %2566 = vmatprep.subr.mxu1 %v5330_v49 }
 0x493   : > { %2358 = vmatpush1.msra.mxu0 %v2306_v30  ;;  %2567 = vmatpush1.msra.mxu1 %v2515_v20 }
 0x494   : > { %2359 = vmatprep.subr.mxu0 %v7691_v34  ;;  %2568 = vmatprep.subr.mxu1 %v7691_v34 }
 0x495   : > { %2360 = vmatpush1.msra.mxu0 %v2305_v43  ;;  %2569 = vmatpush1.msra.mxu1 %v7695_v39  ;;  %v8954_v39 = vld [vmem:[#allocation79_spill] sm:$0xff] }
 0x496   : > { %2361 = vmatprep.subr.mxu0 %v7684_v58  ;;  %2570 = vmatprep.subr.mxu1 %v7684_v58  ;;  %v8953_v58 = vld [vmem:[#allocation80_spill] sm:$0xff]  ;;  %v5258_v49 = vunpack.i.l.bf16 %v8954_v39  ;;  %v5261_v20 = vunpack.i.h.bf16 %v8954_v39 }
 0x497   : > { %2362 = vmatpush1.msra.mxu0 %v2304_v8  ;;  %2571 = vmatpush1.msra.mxu1 %v7689_v52  ;;  %v5253_v52 = vunpack.i.l.bf16 %v8953_v58  ;;  %v5256_v34 = vunpack.i.h.bf16 %v8953_v58 }
 0x498   : > { %2363 = vmatprep.subr.mxu0 %v7672_v47  ;;  %2572 = vmatprep.subr.mxu1 %v7672_v47 }
 0x499   : > { %2364 = vmatpush1.msra.mxu0 %v2303_v2  ;;  %2573 = vmatpush1.msra.mxu1 %v7679_v59 }
 0x49a   : > { %2365 = vmatprep.subr.mxu0 %v7655_v18  ;;  %2574 = vmatprep.subr.mxu1 %v7655_v18  ;;  %v5246_v18 = vunpack.i.h.bf16 %v8951_v3 }
 0x49b   : > { %2366 = vmatpush1.msra.mxu0 %v2302_v26  ;;  %2575 = vmatpush1.msra.mxu1 %v7665_v45  ;;  %v8952_v45 = vld [vmem:[#allocation81_spill] sm:$0xff] }
 0x49c   : > { %2367 = vmatprep.subr.mxu0 %v7641_v57  ;;  %2576 = vmatprep.subr.mxu1 %v7641_v57  ;;  %v5241_v57 = vunpack.i.h.bf16 %v8950_v55  ;;  %v5248_v47 = vunpack.i.l.bf16 %v8952_v45  ;;  %v5251_v59 = vunpack.i.h.bf16 %v8952_v45 }
 0x49d   : > { %2368 = vmatpush1.msra.mxu0 %v2301_v23  ;;  %2577 = vmatpush1.msra.mxu1 %v7649_v17  ;;  %v5243_v17 = vunpack.i.l.bf16 %v8951_v3 }
 0x49e   : > { %2369 = vmatprep.subr.mxu0 %v7624_v62  ;;  %2578 = vmatprep.subr.mxu1 %v7624_v62  ;;  %v5221_v62 = vunpack.i.h.bf16 %v8947_v13 }
 0x49f   : > { %2370 = vmatpush1.msra.mxu0 %v2300_v50  ;;  %2579 = vmatpush1.msra.mxu1 %v7635_v28  ;;  %v5238_v28 = vunpack.i.l.bf16 %v8950_v55 }
 0x4a0   : > { %2371 = vmatprep.subr.mxu0 %v7608_v6  ;;  %2580 = vmatprep.subr.mxu1 %v7608_v6  ;;  %v8949_v6 = vld [vmem:[#allocation102_spill] sm:$0xff] }
 0x4a1   : > { %2372 = vmatpush1.msra.mxu0 %v2299_v14  ;;  %2581 = vmatpush1.msra.mxu1 %v7617_v37  ;;  %v5233_v37 = vunpack.i.l.bf16 %v8949_v6 }
 0x4a2   : > { %2373 = vmatprep.subr.mxu0 %v7589_v11  ;;  %2582 = vmatprep.subr.mxu1 %v7589_v11  ;;  %v5216_v11 = vunpack.i.h.bf16 %v7476_v38  ;;  %v5226_v38 = vunpack.i.h.bf16 %v7499_v15 }
 0x4a3   : > { %2374 = vmatpush1.msra.mxu0 %v2298_v19  ;;  %2583 = vmatpush1.msra.mxu1 %v7601_v53  ;;  %v8959_v19 = vld [vmem:[#allocation117_spill] sm:$0xff] }
 0x4a4   : > { %2375 = vmatprep.subr.mxu0 %v7572_v60  ;;  %2584 = vmatprep.subr.mxu1 %v7572_v60  ;;  %v5223_v60 = vunpack.i.l.bf16 %v7499_v15  ;;  %v5236_v15 = vunpack.i.h.bf16 %v8949_v6 }
 0x4a5   : > { %2376 = vmatpush1.msra.mxu0 %v2297_v35  ;;  %2585 = vmatpush1.msra.mxu1 %v7584_v1  ;;  %v8948_v1 = vld [vmem:[#allocation104_spill] sm:$0xff] }
 0x4a6   : > { %2410 = vmatmul.mubr.f32.vlgmr.msra.gmra.mxu0 %v5208_v51  ;;  %2619 = vmatmul.mubr.f32.vlgmr.msra.gmra.mxu1 %v5211_v41  ;;  %v5228_v27 = vunpack.i.l.bf16 %v8948_v1  ;;  %v5231_v53 = vunpack.i.h.bf16 %v8948_v1  ;;  %v1154_v41 = vsub.s32 0, %v8959_v19  ;;  %v8964_v19 = vld [vmem:[#allocation105_spill] sm:$0xff] }
 0x4a7   : > { %2415 = vmatprep.mubr.f32.mxu0 %v8780_v29  ;;  %2624 = vmatprep.mubr.f32.mxu1 %v8780_v29 }
 0x4aa   : > { %2416 = vmatmul.mubr.f32.gmra.mxu0 %v5213_v21  ;;  %2625 = vmatmul.mubr.f32.gmra.mxu1 %v5216_v11 }
 0x4ab   : > { %2421 = vmatprep.mubr.f32.mxu0 %v8780_v29  ;;  %2630 = vmatprep.mubr.f32.mxu1 %v8780_v29 }
 0x4ae   : > { %2422 = vmatmul.mubr.f32.gmra.mxu0 %v5218_v7  ;;  %2631 = vmatmul.mubr.f32.gmra.mxu1 %v5221_v62  ;;  %v5415_v62 = vld [vmem:[%s7057_s12] sm:$0x1f] }
 0x4af   : > { %2427 = vmatprep.mubr.f32.mxu0 %v8780_v29  ;;  %2636 = vmatprep.mubr.f32.mxu1 %v8780_v29 }
 0x4b2   : > { %2428 = vmatmul.mubr.f32.gmra.mxu0 %v5223_v60  ;;  %2637 = vmatmul.mubr.f32.gmra.mxu1 %v5226_v38  ;;  %v7826_v60 = vrot.slane %v5415_v62, %v1154_v41 }
 0x4b3   : > { %2433 = vmatprep.mubr.f32.mxu0 %v8780_v29  ;;  %2642 = vmatprep.mubr.f32.mxu1 %v8780_v29 }
 0x4b4   : > { %v1262_v41 = vadd.f32 %v8964_v19, %v7826_v60  ;;  %v8973_v19 = vld [vmem:[#allocation109_spill] sm:$0xff] }
 0x4b6   : > { %2434 = vmatmul.mubr.f32.gmra.mxu0 %v5228_v27  ;;  %2643 = vmatmul.mubr.f32.gmra.mxu1 %v5231_v53 }
 0x4b7   : > { %2439 = vmatprep.mubr.f32.mxu0 %v8780_v29  ;;  %2648 = vmatprep.mubr.f32.mxu1 %v8780_v29 }
 0x4ba   : > { %2440 = vmatmul.mubr.f32.gmra.mxu0 %v5233_v37  ;;  %2649 = vmatmul.mubr.f32.gmra.mxu1 %v5236_v15 }
 0x4bb   : > { %2445 = vmatprep.mubr.f32.mxu0 %v8780_v29  ;;  %2654 = vmatprep.mubr.f32.mxu1 %v8780_v29 }
 0x4be   : > { %2446 = vmatmul.mubr.f32.gmra.mxu0 %v5238_v28  ;;  %2655 = vmatmul.mubr.f32.gmra.mxu1 %v5241_v57  ;;  %v8960_v28 = vld [vmem:[#allocation99_spill] sm:$0xff] }
 0x4bf   : > { %2451 = vmatprep.mubr.f32.mxu0 %v8780_v29  ;;  %2660 = vmatprep.mubr.f32.mxu1 %v8780_v29  ;;  %v1244_v57 = vadd.f32 %v8960_v28, %v7826_v60 }
 0x4c2   : > { %2452 = vmatmul.mubr.f32.gmra.mxu0 %v5243_v17  ;;  %2661 = vmatmul.mubr.f32.gmra.mxu1 %v5246_v18 }
 0x4c3   : > { %2457 = vmatprep.mubr.f32.mxu0 %v8780_v29  ;;  %2666 = vmatprep.mubr.f32.mxu1 %v8780_v29 }
 0x4c6   : > { %2458 = vmatmul.mubr.f32.gmra.mxu0 %v5248_v47  ;;  %2667 = vmatmul.mubr.f32.gmra.mxu1 %v5251_v59 }
 0x4c7   : > { %2463 = vmatprep.mubr.f32.mxu0 %v8780_v29  ;;  %2672 = vmatprep.mubr.f32.mxu1 %v8780_v29 }
 0x4ca   : > { %2464 = vmatmul.mubr.f32.gmra.mxu0 %v5253_v52  ;;  %2673 = vmatmul.mubr.f32.gmra.mxu1 %v5256_v34  ;;  %v8961_v34 = vld [vmem:[#allocation101_spill] sm:$0xff] }
 0x4cb   : > { %2469 = vmatprep.mubr.f32.mxu0 %v8780_v29  ;;  %2678 = vmatprep.mubr.f32.mxu1 %v8780_v29  ;;  %v1250_v39 = vadd.f32 %v8961_v34, %v7826_v60 }
 0x4ce   : > { %2470 = vmatmul.mubr.f32.gmra.mxu0 %v5258_v49  ;;  %2679 = vmatmul.mubr.f32.gmra.mxu1 %v5261_v20 }
 0x4cf   : > { %2475 = vmatprep.mubr.f32.mxu0 %v8780_v29  ;;  %2684 = vmatprep.mubr.f32.mxu1 %v8780_v29 }
 0x4d2   : > { %2476 = vmatmul.mubr.f32.gmra.mxu0 %v5263_v9  ;;  %2685 = vmatmul.mubr.f32.gmra.mxu1 %v5266_v25 }
 0x4d3   : > { %2481 = vmatprep.mubr.f32.mxu0 %v8780_v29  ;;  %2690 = vmatprep.mubr.f32.mxu1 %v8780_v29 }
 0x4d6   : > { %2482 = vmatmul.mubr.f32.gmra.mxu0 %v5268_v48  ;;  %2691 = vmatmul.mubr.f32.gmra.mxu1 %v5271_v12 }
 0x4d7   : > { %2487 = vmatprep.mubr.f32.mxu0 %v8780_v29  ;;  %2696 = vmatprep.mubr.f32.mxu1 %v8780_v29 }
 0x4da   : > { %2488 = vmatmul.mubr.f32.gmra.mxu0 %v5273_v5  ;;  %2697 = vmatmul.mubr.f32.gmra.mxu1 %v5276_v46 }
 0x4db   : > { %2493 = vmatprep.mubr.f32.mxu0 %v8780_v29  ;;  %2702 = vmatprep.mubr.f32.mxu1 %v8780_v29 }
 0x4de   : > { %2494 = vmatmul.mubr.f32.gmra.mxu0 %v5278_v63  ;;  %2703 = vmatmul.mubr.f32.gmra.mxu1 %v5281_v56  ;;  %v8962_v56 = vld [vmem:[#allocation103_spill] sm:$0xff] }
 0x4df   : > { %2499 = vmatprep.mubr.f32.mxu0 %v8780_v29  ;;  %2708 = vmatprep.mubr.f32.mxu1 %v8780_v29 }
 0x4e2   : > { %2500 = vmatmul.mubr.f32.gmra.mxu0 %v5283_v4  ;;  %2709 = vmatmul.mubr.f32.gmra.mxu1 %v5286_v33  ;;  %v1256_v33 = vadd.f32 %v8962_v56, %v7826_v60 }
 0x566   : > { %v2411_v22 = vpop.f32.mrf.mxu0  ;;  %v2620_v32 = vpop.f32.mrf.mxu1 }
 0x568   : > { %v2413_v61 = vpop.f32.mrf.mxu0  ;;  %v2622_v0 = vpop.f32.mrf.mxu1 }
 0x569   : > { %v2715_v54 = vadd.f32 1e-06, %v2413_v61  ;;  %v2763_v42 = vadd.f32 1e-06, %v2622_v0  ;;  %v8963_v61 = vld [vmem:[#allocation98_spill] sm:$0xff] }
 0x56a   : > { %v2417_v30 = vpop.f32.mrf.mxu0  ;;  %v2626_v43 = vpop.f32.mrf.mxu1 }
 0x56b   : > { %5351 = vrcp.f32 %v2715_v54 }
 0x56c   : > { %5353 = vrcp.f32 %v2763_v42  ;;  %v2419_v8 = vpop.f32.mrf.mxu0  ;;  %v2628_v2 = vpop.f32.mrf.mxu1 }
 0x56d   : > { %v2716_v40 = vadd.f32 1e-06, %v2419_v8  ;;  %v2764_v26 = vadd.f32 1e-06, %v2628_v2 }
 0x56e   : > { %v2423_v23 = vpop.f32.mrf.mxu0  ;;  %v7818_v50 = vpop.f32.mrf.mxu1 }
 0x56f   : > { %5355 = vrcp.f32 %v2716_v40 }
 0x570   : > { %5357 = vrcp.f32 %v2764_v26  ;;  %v2425_v29 = vpop.f32.mrf.mxu0  ;;  %v2634_v14 = vpop.f32.mrf.mxu1 }
 0x571   : > { %v2717_v51 = vadd.f32 1e-06, %v2425_v29  ;;  %v2765_v35 = vadd.f32 1e-06, %v2634_v14 }
 0x572   : > { %v7821_v21 = vpop.f32.mrf.mxu0  ;;  %v7823_v11 = vpop.f32.mrf.mxu1 }
 0x573   : > { %5359 = vrcp.f32 %v2717_v51 }
 0x574   : > { %5361 = vrcp.f32 %v2765_v35  ;;  %v2431_v13 = vpop.f32.mrf.mxu0  ;;  %v2640_v7 = vpop.f32.mrf.mxu1 }
 0x575   : > { %v2718_v38 = vadd.f32 1e-06, %v2431_v13  ;;  %v2766_v1 = vadd.f32 1e-06, %v2640_v7 }
 0x576   : > { %v7828_v27 = vpop.f32.mrf.mxu0  ;;  %v7830_v53 = vpop.f32.mrf.mxu1 }
 0x577   : > { %5363 = vrcp.f32 %v2718_v38 }
 0x578   : > { %v5352_v6 = vpop.eup %5351  ;;  %5365 = vrcp.f32 %v2766_v1  ;;  %v2437_v37 = vpop.f32.mrf.mxu0 }
 0x579   : > { %v2646_v15 = vpop.f32.mrf.mxu1  ;;  %v5354_v55 = vpop.eup %5353  ;;  %v2732_v3 = vmul.f32 %v5352_v6, %v2411_v22  ;;  %v2719_v17 = vadd.f32 1e-06, %v2437_v37 }
 0x57a   : > { %v2767_v18 = vadd.f32 1e-06, %v2646_v15  ;;  %v7834_v45 = vpop.f32.mrf.mxu0  ;;  %v2780_v58 = vmul.f32 %v5354_v55, %v2620_v32 }
 0x57b   : > { %v7836_v47 = vpop.f32.mrf.mxu1  ;;  %v2811_v59 = vadd.f32 %v2732_v3, %v1244_v57  ;;  %5367 = vrcp.f32 %v2719_v17  ;;  %v8967_v17 = vld [vmem:[#allocation107_spill] sm:$0xff] }
 0x57c   : > { %v5356_v52 = vpop.eup %5355  ;;  %5369 = vrcp.f32 %v2767_v18  ;;  %v2443_v49 = vpop.f32.mrf.mxu0  ;;  %v1268_v18 = vadd.f32 %v8967_v17, %v7826_v60  ;;  %v8976_v17 = vld [vmem:[#allocation110_spill] sm:$0xff] }
 0x57d   : > { %v2652_v20 = vpop.f32.mrf.mxu1  ;;  %v5358_v16 = vpop.eup %5357  ;;  %v2827_v9 = vadd.f32 %v2811_v59, %v2780_v58  ;;  %v2734_v25 = vmul.f32 %v5356_v52, %v2417_v30  ;;  %v2720_v31 = vadd.f32 1e-06, %v2443_v49 }
 0x57e   : > { %v2768_v48 = vadd.f32 1e-06, %v2652_v20  ;;  %v7840_v12 = vpop.f32.mrf.mxu0  ;;  %v2782_v44 = vmul.f32 %v5358_v16, %v2626_v43 }
 0x57f   : > { %v7842_v10 = vpop.f32.mrf.mxu1  ;;  %v2843_v5 = vmax.f32 %v2827_v9, 0.0  ;;  %v2812_v46 = vadd.f32 %v2734_v25, %v1250_v39  ;;  %5371 = vrcp.f32 %v2720_v31 }
 0x580   : > { %v5360_v63 = vpop.eup %5359  ;;  %5373 = vrcp.f32 %v2768_v48  ;;  %v2449_v4 = vpop.f32.mrf.mxu0 }
 0x581   : > { %v2658_v22 = vpop.f32.mrf.mxu1  ;;  %v5362_v32 = vpop.eup %5361  ;;  %v7847_v0 = vadd.f32 %v8963_v61, %v2843_v5   ;;  %v2828_v54 = vadd.f32 %v2812_v46, %v2782_v44  ;;  %v2736_v42 = vmul.f32 %v5360_v63, %v2423_v23  ;;  %v2721_v30 = vadd.f32 1e-06, %v2449_v4  ;;  %v8965_v23 = vld [vmem:[#allocation97_spill] sm:$0xff]  ;;  %v8970_v44 = vld [vmem:[#allocation108_spill] sm:$0xff] }
 0x582   : > { %v7849_v8 = vpop.f32.mrf.mxu0  ;;  %v2769_v2 = vadd.f32 1e-06, %v2658_v22  ;;  %v2784_v29 = vmul.f32 %v5362_v32, %v7818_v50  ;;  %v1274_v63 = vadd.f32 %v8970_v44, %v7826_v60  ;;  %v8979_v44 = vld [vmem:[#allocation111_spill] sm:$0xff] }
 0x583   : > { %v7851_v40 = vpop.f32.mrf.mxu1  ;;  %v2844_v43 = vmax.f32 %v2828_v54, 0.0  ;;  %v2813_v26 = vadd.f32 %v2736_v42, %v1256_v33  ;;  %5375 = vrcp.f32 %v2721_v30 }
 0x584   : > { %v5364_v14 = vpop.eup %5363  ;;  %5377 = vrcp.f32 %v2769_v2  ;;  %v2455_v51 = vpop.f32.mrf.mxu0 }
 0x585   : > { %v2664_v35 = vpop.f32.mrf.mxu1  ;;  %v5366_v13 = vpop.eup %5365  ;;  %v7857_v7 = vadd.f32 %v8965_v23, %v2844_v43   ;;  %v2829_v38 = vadd.f32 %v2813_v26, %v2784_v29  ;;  %v2738_v1 = vmul.f32 %v5364_v14, %v7821_v21  ;;  %v2722_v6 = vadd.f32 1e-06, %v2455_v51  ;;  %v8968_v21 = vld [vmem:[#allocation96_spill] sm:$0xff] }
 0x586   : > { %v7860_v37 = vpop.f32.mrf.mxu0  ;;  %v2770_v15 = vadd.f32 1e-06, %v2664_v35  ;;  %v2786_v57 = vmul.f32 %v5366_v13, %v7823_v11 }
 0x587   : > { %v8966_v62 = vmov %v7857_v7  ;;  %v7862_v50 = vpop.f32.mrf.mxu1  ;;  %v2845_v55 = vmax.f32 %v2829_v38, 0.0  ;;  %v2814_v28 = vadd.f32 %v2738_v1, %v1262_v41  ;;  %5379 = vrcp.f32 %v2722_v6 }
 0x588   : > { %v5368_v3 = vpop.eup %5367  ;;  %5381 = vrcp.f32 %v2770_v15  ;;  %v2461_v59 = vpop.f32.mrf.mxu0  ;;  %v1280_v41 = vadd.f32 %v8973_v19, %v7826_v60 }
 0x589   : > { %v2670_v58 = vpop.f32.mrf.mxu1  ;;  %v5370_v52 = vpop.eup %5369  ;;  %v7868_v34 = vadd.f32 %v8968_v21, %v2845_v55   ;;  %v2830_v39 = vadd.f32 %v2814_v28, %v2786_v57  ;;  %v2740_v20 = vmul.f32 %v5368_v3, %v7828_v27  ;;  %v2723_v16 = vadd.f32 1e-06, %v2461_v59  ;;  %v8971_v27 = vld [vmem:[#allocation95_spill] sm:$0xff] }
 0x58a   : > { %v7871_v9 = vpop.f32.mrf.mxu0  ;;  %v2771_v25 = vadd.f32 1e-06, %v2670_v58  ;;  %v2788_v5 = vmul.f32 %v5370_v52, %v7830_v53 }
 0x58b   : > { %v8969_v49 = vmov %v7868_v34  ;;  %v7873_v11 = vpop.f32.mrf.mxu1  ;;  %v2846_v31 = vmax.f32 %v2830_v39, 0.0  ;;  %v2815_v48 = vadd.f32 %v2740_v20, %v1268_v18  ;;  %5383 = vrcp.f32 %v2723_v16 }
 0x58c   : > { %v5372_v46 = vpop.eup %5371  ;;  %5385 = vrcp.f32 %v2771_v25  ;;  %v2467_v56 = vpop.f32.mrf.mxu0  ;;  %v1286_v18 = vadd.f32 %v8976_v17, %v7826_v60 }
 0x58d   : > { %v2676_v33 = vpop.f32.mrf.mxu1  ;;  %v5374_v4 = vpop.eup %5373  ;;  %v7879_v26 = vadd.f32 %v8971_v27, %v2846_v31   ;;  %v2831_v32 = vadd.f32 %v2815_v48, %v2788_v5  ;;  %v2742_v61 = vmul.f32 %v5372_v46, %v7834_v45  ;;  %v2724_v54 = vadd.f32 1e-06, %v2467_v56  ;;  %v8974_v45 = vld [vmem:[#allocation94_spill] sm:$0xff] }
 0x58e   : > { %v7882_v42 = vpop.f32.mrf.mxu0  ;;  %v2772_v30 = vadd.f32 1e-06, %v2676_v33  ;;  %v2790_v29 = vmul.f32 %v5374_v4, %v7836_v47 }
 0x58f   : > { %v8972_v22 = vmov %v7879_v26  ;;  %v7884_v53 = vpop.f32.mrf.mxu1  ;;  %v2847_v2 = vmax.f32 %v2831_v32, 0.0  ;;  %v2816_v43 = vadd.f32 %v2742_v61, %v1274_v63  ;;  %5387 = vrcp.f32 %v2724_v54 }
 0x590   : > { %v5376_v14 = vpop.eup %5375  ;;  %5389 = vrcp.f32 %v2772_v30  ;;  %v2473_v26 = vpop.f32.mrf.mxu0  ;;  %v1292_v63 = vadd.f32 %v8979_v44, %v7826_v60 }
 0x591   : > { %v2682_v51 = vpop.f32.mrf.mxu1  ;;  %v5378_v35 = vpop.eup %5377  ;;  %v7890_v55 = vadd.f32 %v8974_v45, %v2847_v2   ;;  %v2832_v23 = vadd.f32 %v2816_v43, %v2790_v29  ;;  %v2744_v7 = vmul.f32 %v5376_v14, %v7840_v12  ;;  %v2725_v38 = vadd.f32 1e-06, %v2473_v26  ;;  %v8977_v12 = vld [vmem:[#allocation93_spill] sm:$0xff] }
 0x592   : > { %v7893_v1 = vpop.f32.mrf.mxu0  ;;  %v2773_v6 = vadd.f32 1e-06, %v2682_v51  ;;  %v2792_v57 = vmul.f32 %v5378_v35, %v7842_v10 }
 0x593   : > { %v8975_v13 = vmov %v7890_v55  ;;  %v7895_v47 = vpop.f32.mrf.mxu1  ;;  %v2848_v15 = vmax.f32 %v2832_v23, 0.0  ;;  %v2817_v28 = vadd.f32 %v2744_v7, %v1280_v41  ;;  %5391 = vrcp.f32 %v2725_v38  ;;  %v8982_v41 = vld [vmem:[#allocation112_spill] sm:$0xff] }
 0x594   : > { %v5380_v3 = vpop.eup %5379  ;;  %5393 = vrcp.f32 %v2773_v6  ;;  %v2479_v55 = vpop.f32.mrf.mxu0  ;;  %v1298_v26 = vadd.f32 %v8982_v41, %v7826_v60 }
 0x595   : > { %v2688_v59 = vpop.f32.mrf.mxu1  ;;  %v5382_v58 = vpop.eup %5381  ;;  %v7901_v10 = vadd.f32 %v8977_v12, %v2848_v15   ;;  %v2833_v52 = vadd.f32 %v2817_v28, %v2792_v57  ;;  %v2746_v34 = vmul.f32 %v5380_v3, %v7849_v8  ;;  %v2726_v39 = vadd.f32 1e-06, %v2479_v55  ;;  %v8980_v8 = vld [vmem:[#allocation92_spill] sm:$0xff] }
 0x596   : > { %v7904_v20 = vpop.f32.mrf.mxu0  ;;  %v2774_v16 = vadd.f32 1e-06, %v2688_v59  ;;  %v2794_v5 = vmul.f32 %v5382_v58, %v7851_v40  ;;  %v8985_v59 = vld [vmem:[#allocation113_spill] sm:$0xff] }
 0x597   : > { %v8978_v21 = vmov %v7901_v10  ;;  %v7906_v25 = vpop.f32.mrf.mxu1  ;;  %v2849_v31 = vmax.f32 %v2833_v52, 0.0  ;;  %v2818_v48 = vadd.f32 %v2746_v34, %v1286_v18  ;;  %5395 = vrcp.f32 %v2726_v39 }
 0x598   : > { %v5384_v46 = vpop.eup %5383  ;;  %5397 = vrcp.f32 %v2774_v16  ;;  %v2485_v10 = vpop.f32.mrf.mxu0  ;;  %v1304_v58 = vadd.f32 %v8985_v59, %v7826_v60  ;;  %v8995_v59 = vld [vmem:[#allocation87_spill] sm:$0xff] }
 0x599   : > { %v2694_v56 = vpop.f32.mrf.mxu1  ;;  %v5386_v33 = vpop.eup %5385  ;;  %v7912_v4 = vadd.f32 %v8980_v8, %v2849_v31   ;;  %v2834_v27 = vadd.f32 %v2818_v48, %v2794_v5  ;;  %v2748_v32 = vmul.f32 %v5384_v46, %v7860_v37  ;;  %v2727_v54 = vadd.f32 1e-06, %v2485_v10  ;;  %v8983_v37 = vld [vmem:[#allocation91_spill] sm:$0xff] }
 0x59a   : > { %v7915_v30 = vpop.f32.mrf.mxu0  ;;  %v2775_v2 = vadd.f32 1e-06, %v2694_v56  ;;  %v2796_v14 = vmul.f32 %v5386_v33, %v7862_v50  ;;  %v8988_v56 = vld [vmem:[#allocation114_spill] sm:$0xff] }
 0x59b   : > { %v8981_v61 = vmov %v7912_v4  ;;  %v7917_v40 = vpop.f32.mrf.mxu1  ;;  %v2850_v43 = vmax.f32 %v2834_v27, 0.0  ;;  %v2819_v29 = vadd.f32 %v2748_v32, %v1292_v63  ;;  %5399 = vrcp.f32 %v2727_v54  ;;  %v8989_v32 = vld [vmem:[#allocation89_spill] sm:$0xff] }
 0x59c   : > { %v5388_v19 = vpop.eup %5387  ;;  %5401 = vrcp.f32 %v2775_v2  ;;  %v2491_v51 = vpop.f32.mrf.mxu0  ;;  %v1310_v33 = vadd.f32 %v8988_v56, %v7826_v60 }
 0x59d   : > { %v2700_v35 = vpop.f32.mrf.mxu1  ;;  %v5390_v45 = vpop.eup %5389  ;;  %v7923_v15 = vadd.f32 %v8983_v37, %v2850_v43   ;;  %v2835_v23 = vadd.f32 %v2819_v29, %v2796_v14  ;;  %v2750_v7 = vmul.f32 %v5388_v19, %v7871_v9  ;;  %v2728_v38 = vadd.f32 1e-06, %v2491_v51  ;;  %v8986_v9 = vld [vmem:[#allocation90_spill] sm:$0xff]  ;;  %v8992_v37 = vld [vmem:[#allocation88_spill] sm:$0xff] }
 0x59e   : > { %v7926_v28 = vpop.f32.mrf.mxu0  ;;  %v2776_v57 = vadd.f32 1e-06, %v2700_v35  ;;  %v2798_v18 = vmul.f32 %v5390_v45, %v7873_v11  ;;  %v8991_v35 = vld [vmem:[#allocation115_spill] sm:$0xff] }
 0x59f   : > { %v8984_v6 = vmov %v7923_v15  ;;  %v7928_v50 = vpop.f32.mrf.mxu1  ;;  %v2851_v3 = vmax.f32 %v2835_v23, 0.0  ;;  %v2820_v17 = vadd.f32 %v2750_v7, %v1298_v26  ;;  %5403 = vrcp.f32 %v2728_v38 }
 0x5a0   : > { %v5392_v55 = vpop.eup %5391  ;;  %5405 = vrcp.f32 %v2776_v57  ;;  %v2497_v15 = vpop.f32.mrf.mxu0  ;;  %v1316_v45 = vadd.f32 %v8991_v35, %v7826_v60  ;;  %v9003_v35 = vld [vmem:[#allocation83_spill] sm:$0xff] }
 0x5a1   : > { %v2706_v12 = vpop.f32.mrf.mxu1  ;;  %v5394_v52 = vpop.eup %5393  ;;  %v7934_v57 = vadd.f32 %v8986_v9, %v2851_v3   ;;  %v2836_v34 = vadd.f32 %v2820_v17, %v2798_v18  ;;  %v2752_v39 = vmul.f32 %v5392_v55, %v7882_v42  ;;  %v2729_v31 = vadd.f32 1e-06, %v2497_v15 }
 0x5a2   : > { %v2501_v48 = vpop.f32.mrf.mxu0  ;;  %v2777_v5 = vadd.f32 1e-06, %v2706_v12  ;;  %v2800_v63 = vmul.f32 %v5394_v52, %v7884_v53 }
 0x5a3   : > { %v8987_v16 = vmov %v7934_v57  ;;  %v2710_v46 = vpop.f32.mrf.mxu1  ;;  %v2852_v11 = vmax.f32 %v2836_v34, 0.0  ;;  %v2821_v44 = vadd.f32 %v2752_v39, %v1304_v58  ;;  %5407 = vrcp.f32 %v2729_v31 }
 0x5a4   : > { %v5396_v10 = vpop.eup %5395  ;;  %5409 = vrcp.f32 %v2777_v5  ;;  %v2503_v8 = vpop.f32.mrf.mxu0  ;;  %v8997_v5 = vld [vmem:[#allocation118_spill] sm:$0xff] }
 0x5a5   : > { %v2712_v4 = vpop.f32.mrf.mxu1  ;;  %v5398_v27 = vpop.eup %5397  ;;  %v7941_v54 = vadd.f32 %v8989_v32, %v2852_v11   ;;  %v2837_v2 = vadd.f32 %v2821_v44, %v2800_v63  ;;  %v2754_v43 = vmul.f32 %v5396_v10, %v7893_v1  ;;  %v2730_v29 = vadd.f32 1e-06, %v2503_v8  ;;  %v8998_v11 = vld [vmem:[#allocation86_spill] sm:$0xff]  ;;  %v9000_v32 = vld [vmem:[#allocation119_spill] sm:$0xff] }
 0x5a6   : > { %v2778_v14 = vadd.f32 1e-06, %v2712_v4  ;;  %v2802_v53 = vmul.f32 %v5398_v27, %v7895_v47  ;;  %v8994_v47 = vld [vmem:[#allocation116_spill] sm:$0xff] }
 0x5a7   : > { %v8990_v42 = vmov %v7941_v54  ;;  %v2853_v19 = vmax.f32 %v2837_v2, 0.0  ;;  %v2822_v41 = vadd.f32 %v2754_v43, %v1310_v33  ;;  %5411 = vrcp.f32 %v2730_v29  ;;  %v9001_v54 = vld [vmem:[#allocation85_spill] sm:$0xff] }
 0x5a8   : > { %v5400_v26 = vpop.eup %5399  ;;  %5413 = vrcp.f32 %v2778_v14  ;;  %v1322_v55 = vadd.f32 %v8994_v47, %v7826_v60  ;;  %v9055_v47 = vld [vmem:[#allocation48_spill] sm:$0xff] (%p7974_p0) }
 0x5a9   : > { %v5402_v51 = vpop.eup %5401  ;;  %v7948_v43 = vadd.f32 %v8992_v37, %v2853_v19   ;;  %v2838_v23 = vadd.f32 %v2822_v41, %v2802_v53  ;;  %v2756_v7 = vmul.f32 %v5400_v26, %v7904_v20  ;;  %v9002_v53 = vld [vmem:[#allocation84_spill] sm:$0xff]  ;;  %v3200_v37 = vld [vmem:[%s8542_s16 + $0x118] sm:$0xff] (%p7974_p0) }
 0x5aa   : > { %v2804_v57 = vmul.f32 %v5402_v51, %v7906_v25  ;;  %v1328_v25 = vadd.f32 %v8997_v5, %v7826_v60  ;;  %v9068_v5 = vld [vmem:[#allocation19_spill] sm:$0xff] (%p7974_p0) }
 0x5ab   : > { %v8993_v3 = vmov %v7948_v43  ;;  %v2854_v1 = vmax.f32 %v2838_v23, 0.0  ;;  %v2823_v38 = vadd.f32 %v2756_v7, %v1316_v45  ;;  %v9008_v7 = vld [vmem:[#allocation132_spill] sm:$0xff]  ;;  %v9036_v23 = vmov %v7847_v0 }
 0x5ac   : > { %v5404_v17 = vpop.eup %5403  ;;  %v9049_v23 = vld [vmem:[#allocation44_spill] sm:$0xff] (%p7974_p0) }
 0x5ad   : > { %v5406_v18 = vpop.eup %5405  ;;  %v7955_v58 = vadd.f32 %v8995_v59, %v2854_v1   ;;  %v2839_v15 = vadd.f32 %v2823_v38, %v2804_v57  ;;  %v2758_v52 = vmul.f32 %v5404_v17, %v7915_v30  ;;  %v9009_v38 = vld [vmem:[#allocation131_spill] sm:$0xff]  ;;  %v9014_v1 = vld [vmem:[#allocation126_spill] sm:$0xff]  ;;  %v9028_v57 = vmov %v8987_v16  ;;  %v3199_v7 = vld [vmem:[%s8542_s16 + $0x110] sm:$0xff] (%p7974_p0) }
 0x5ae   : > { %v2806_v39 = vmul.f32 %v5406_v18, %v7917_v40  ;;  %v1334_v40 = vadd.f32 %v9000_v32, %v7826_v60  ;;  %v9007_v32 = vld [vmem:[#allocation133_spill] sm:$0xff]  ;;  %v9013_v59 = vld [vmem:[#allocation127_spill] sm:$0xff]  ;;  %v5684_v60 = vmov (%p7974_p0), 1.0   ;;  %v3194_v1 = vld [vmem:[%s8542_s16 + $0xe8] sm:$0xff] (%p7974_p0) }
 0x5af   : > { %v8996_v12 = vmov %v7955_v58  ;;  %v2855_v9 = vmax.f32 %v2839_v15, 0.0  ;;  %v2824_v34 = vadd.f32 %v2758_v52, %v1322_v55  ;;  %v9015_v18 = vld [vmem:[#allocation125_spill] sm:$0xff]  ;;  %v9029_v15 = vmov %v8984_v6  ;;  %4712 = vmatprep.mubr.msk.f32.mxu0 (%p7974_p0), %vm867_vm1, %v5684_v60  ;;  %4768 = vmatprep.mubr.msk.f32.mxu1 (%p7974_p0), %vm979_vm12, %v5684_v60  ;;  %v3210_v38 = vld [vmem:[%s8542_s16 + $0x168] sm:$0xff] (%p7974_p0)  ;;  %v3193_v59 = vld [vmem:[%s8542_s16 + $0xe0] sm:$0xff] (%p7974_p0) }
 0x5b0   : > { %v5408_v20 = vpop.eup %5407  ;;  %v9032_v55 = vmov %v8975_v13  ;;  %v9034_v52 = vmov %v8969_v49  ;;  %v9052_v57 = vld [vmem:[#allocation43_spill] sm:$0xff] (%p7974_p0)  ;;  %v9091_v17 = vld [vmem:[#allocation121_spill] sm:$0xff] (%p7974_p0) }
 0x5b1   : > { %v5410_v31 = vpop.eup %5409  ;;  %v7962_v44 = vadd.f32 %v8998_v11, %v2855_v9   ;;  %v2840_v10 = vadd.f32 %v2824_v34, %v2806_v39  ;;  %v2760_v56 = vmul.f32 %v5408_v20, %v7926_v28  ;;  %v9005_v9 = vmov %v8946_v36  ;;  %v9010_v34 = vld [vmem:[#allocation130_spill] sm:$0xff]  ;;  %v9012_v39 = vld [vmem:[#allocation128_spill] sm:$0xff]  ;;  %v3177_v52 = vld [vmem:[%s8542_s16 + $0x60] sm:$0xff] (%p7974_p0) }
 0x5b2   : > { %v2808_v4 = vmul.f32 %v5410_v31, %v7928_v50  ;;  %v9018_v20 = vld [vmem:[#allocation122_spill] sm:$0xff]  ;;  %v3178_v18 = vld [vmem:[%s8542_s16 + $0x68] sm:$0xff] (%p7974_p0)  ;;  %v9062_v9 = vld [vmem:[#allocation52_spill] sm:$0xff] (%p7974_p0) }
 0x5b3   : > { %v8999_v63 = vmov %v7962_v44  ;;  %v2856_v33 = vmax.f32 %v2840_v10, 0.0  ;;  %v2825_v8 = vadd.f32 %v2760_v56, %v1328_v25  ;;  %v9016_v44 = vld [vmem:[#allocation124_spill] sm:$0xff]  ;;  %v9030_v56 = vmov %v8981_v61  ;;  %v9064_v34 = vld [vmem:[#allocation20_spill] sm:$0xff] (%p7974_p0)  ;;  %v3192_v39 = vld [vmem:[%s8542_s16 + $0xd8] sm:$0xff] (%p7974_p0) }
 0x5b4   : > { %v5412_v30 = vpop.eup %5411  ;;  %v9024_v50 = vmov %v8999_v63  ;;  %v9031_v10 = vmov %v8978_v21  ;;  %v9060_v15 = vld [vmem:[#allocation15_spill] sm:$0xff] (%p7974_p0)  ;;  %v3208_v20 = vld [vmem:[%s8542_s16 + $0x158] sm:$0xff] (%p7974_p0)  ;;  %v9070_v11 = vld [vmem:[#allocation56_spill] sm:$0xff] (%p7974_p0) }
 0x5b5   : > { %v5414_v27 = vpop.eup %5413  ;;  %v2872_v2 = vadd.f32 %v9001_v54, %v2856_v33   ;;  %v2841_v43 = vadd.f32 %v2825_v8, %v2808_v4  ;;  %v2762_v29 = vmul.f32 %v5412_v30, %v2501_v48  ;;  %v9006_v4 = vmov %v8944_v24  ;;  %v9017_v8 = vld [vmem:[#allocation123_spill] sm:$0xff]  ;;  %v9020_v54 = vld [vmem:[#allocation120_spill] sm:$0xff]  ;;  %v9043_v50 = vld [vmem:[#allocation40_spill] sm:$0xff] (%p7974_p0) }
 0x5b6   : > { %v2810_v41 = vmul.f32 %v5414_v27, %v2710_v46  ;;  %v9027_v27 = vmov %v8990_v42  ;;  %v3195_v48 = vld [vmem:[%s8542_s16 + $0xf0] sm:$0xff] (%p7974_p0)  ;;  %v3176_v25 = vld [vmem:[%s8542_s16 + $0x58] sm:$0xff] (%p7974_p0)  ;;  %v9074_v56 = vld [vmem:[#allocation55_spill] sm:$0xff] (%p7974_p0) }
 0x5b7   : > { %v2857_v14 = vmax.f32 %v2841_v43, 0.0  ;;  %v2826_v19 = vadd.f32 %v2762_v29, %v1334_v40  ;;  %v9023_v58 = vmov %v2872_v2  ;;  %v9026_v43 = vmov %v8993_v3  ;;  %v3211_v46 = vld [vmem:[%s8542_s16 + $0x170] sm:$0xff] (%p7974_p0)  ;;  %v3190_v27 = vld [vmem:[%s8542_s16 + $0xc8] sm:$0xff] (%p7974_p0) }
 0x5b8   : > { %v9035_v40 = vmov %v8966_v62  ;;  %v3209_v58 = vld [vmem:[%s8542_s16 + $0x160] sm:$0xff] (%p7974_p0)  ;;  %v9072_v44 = vld [vmem:[#allocation24_spill] sm:$0xff] (%p7974_p0)  ;;  %v3206_v32 = vld [vmem:[%s8542_s16 + $0x148] sm:$0xff] (%p7974_p0) }
 0x5b9   : > { %v2873_v51 = vadd.f32 %v9002_v53, %v2857_v14   ;;  %v2842_v26 = vadd.f32 %v2826_v19, %v2810_v41  ;;  %v9019_v19 = vld [vmem:[#allocation121_spill] sm:$0xff]  ;;  %v9082_v54 = vld [vmem:[#allocation27_spill] sm:$0xff] (%p7974_p0)  ;;  %v3189_v14 = vld [vmem:[%s8542_s16 + $0xc0] sm:$0xff] (%p7974_p0) }
 0x5ba   :  { %v3207_v10 = vld [vmem:[%s8542_s16 + $0x150] sm:$0xff] (%p7974_p0)  ;;  %v3205_v19 = vld [vmem:[%s8542_s16 + $0x140] sm:$0xff] (%p7974_p0)  ;;  %v9094_v55 = vld [vmem:[#allocation124_spill] sm:$0xff] (%p7974_p0) }
 0x5bb   : > { %v2858_v28 = vmax.f32 %v2842_v26, 0.0  ;;  %v9022_v33 = vmov %v2873_v51  ;;  %v9033_v26 = vmov %v8972_v22  ;;  %1031 = sbr.rel (!%p7974_p0) target bundleno = 501 (0x1f5), region = 111  ;;  %v3175_v8 = vld [vmem:[%s8542_s16 + $0x50] sm:$0xff] (%p7974_p0)  ;;  %v3173_v41 = vld [vmem:[%s8542_s16 + $0x40] sm:$0xff] (%p7974_p0) }
 0x5bc   :  { %v9076_v33 = vld [vmem:[#allocation23_spill] sm:$0xff] (%p7974_p0)  ;;  %v9079_v30 = vld [vmem:[#allocation28_spill] sm:$0xff] (%p7974_p0)  ;;  %v3188_v26 = vld [vmem:[%s8542_s16 + $0xb8] sm:$0xff] (%p7974_p0) }
 0x5bd   : > { %v2874_v45 = vadd.f32 %v9003_v35, %v2858_v28   ;;  %v9011_v35 = vld [vmem:[#allocation129_spill] sm:$0xff]  ;;  %v9025_v28 = vmov %v8996_v12 }
 0x5be   :  { %v9085_v29 = vld [vmem:[#allocation32_spill] sm:$0xff] (%p7974_p0)  ;;  %v3204_v28 = vld [vmem:[%s8542_s16 + $0x138] sm:$0xff] (%p7974_p0) }
 0x5bf   : > { %v9021_v31 = vmov %v2874_v45  ;;  %4680 = vmatprep.subr.mxu0 (%p7974_p0), %v2874_v45  ;;  %4736 = vmatprep.subr.mxu1 (%p7974_p0), %v2874_v45  ;;  %v3172_v35 = vld [vmem:[%s8542_s16 + $0x38] sm:$0xff] (%p7974_p0) }
 0x5c0   :  { %4681 = vmatpush3.msra.mxu0 %v2874_v45  ;;  %4737 = vmatpush3.msra.mxu1 %v2874_v45  ;;  %v9066_v31 = vld [vmem:[#allocation51_spill] sm:$0xff]  ;;  %v3187_v45 = vld [vmem:[%s8542_s16 + $0xb0] sm:$0xff] }
 0x5c1   :  { %4682 = vmatprep.subr.mxu0 %v2873_v51  ;;  %4738 = vmatprep.subr.mxu1 %v2873_v51 }
 0x5c2   :  { %4683 = vmatpush3.msra.mxu0 %v2873_v51  ;;  %4739 = vmatpush3.msra.mxu1 %v2873_v51  ;;  %v9088_v51 = vld [vmem:[#allocation31_spill] sm:$0xff] }
 0x5c3   :  { %4684 = vmatprep.subr.mxu0 %v2872_v2  ;;  %4740 = vmatprep.subr.mxu1 %v2872_v2 }
 0x5c4   :  { %4685 = vmatpush3.msra.mxu0 %v2872_v2  ;;  %4741 = vmatpush3.msra.mxu1 %v2872_v2  ;;  %v3174_v2 = vld [vmem:[%s8542_s16 + $0x48] sm:$0xff] }
 0x5c5   :  { %4686 = vmatprep.subr.mxu0 %v8999_v63  ;;  %4742 = vmatprep.subr.mxu1 %v8999_v63 }
 0x5c6   :  { %4687 = vmatpush3.msra.mxu0 %v8999_v63  ;;  %4743 = vmatpush3.msra.mxu1 %v8999_v63  ;;  %v3191_v63 = vld [vmem:[%s8542_s16 + $0xd0] sm:$0xff] }
 0x5c7   :  { %4688 = vmatprep.subr.mxu0 %v8996_v12  ;;  %4744 = vmatprep.subr.mxu1 %v8996_v12 }
 0x5c8   :  { %4689 = vmatpush3.msra.mxu0 %v8996_v12  ;;  %4745 = vmatpush3.msra.mxu1 %v8996_v12  ;;  %v9058_v12 = vld [vmem:[#allocation47_spill] sm:$0xff] }
 0x5c9   :  { %4690 = vmatprep.subr.mxu0 %v8993_v3  ;;  %4746 = vmatprep.subr.mxu1 %v8993_v3 }
 0x5ca   :  { %4691 = vmatpush3.msra.mxu0 %v8993_v3  ;;  %4747 = vmatpush3.msra.mxu1 %v8993_v3  ;;  %v3179_v3 = vld [vmem:[%s8542_s16 + $0x70] sm:$0xff] }
 0x5cb   :  { %4692 = vmatprep.subr.mxu0 %v8990_v42  ;;  %4748 = vmatprep.subr.mxu1 %v8990_v42 }
 0x5cc   :  { %4693 = vmatpush3.msra.mxu0 %v8990_v42  ;;  %4749 = vmatpush3.msra.mxu1 %v8990_v42  ;;  %v9046_v42 = vld [vmem:[#allocation39_spill] sm:$0xff] }
 0x5cd   :  { %4694 = vmatprep.subr.mxu0 %v8987_v16  ;;  %4750 = vmatprep.subr.mxu1 %v8987_v16 }
 0x5ce   :  { %4695 = vmatpush3.msra.mxu0 %v8987_v16  ;;  %4751 = vmatpush3.msra.mxu1 %v8987_v16  ;;  %v3183_v16 = vld [vmem:[%s8542_s16 + $0x90] sm:$0xff] }
 0x5cf   :  { %4696 = vmatprep.subr.mxu0 %v8984_v6  ;;  %4752 = vmatprep.subr.mxu1 %v8984_v6 }
 0x5d0   :  { %4697 = vmatpush3.msra.mxu0 %v8984_v6  ;;  %4753 = vmatpush3.msra.mxu1 %v8984_v6  ;;  %v3180_v6 = vld [vmem:[%s8542_s16 + $0x78] sm:$0xff] }
 0x5d1   :  { %4698 = vmatprep.subr.mxu0 %v8981_v61  ;;  %4754 = vmatprep.subr.mxu1 %v8981_v61 }
 0x5d2   :  { %4699 = vmatpush3.msra.mxu0 %v8981_v61  ;;  %4755 = vmatpush3.msra.mxu1 %v8981_v61  ;;  %v3201_v61 = vld [vmem:[%s8542_s16 + $0x120] sm:$0xff] }
 0x5d3   :  { %4700 = vmatprep.subr.mxu0 %v8978_v21  ;;  %4756 = vmatprep.subr.mxu1 %v8978_v21 }
 0x5d4   :  { %4701 = vmatpush3.msra.mxu0 %v8978_v21  ;;  %4757 = vmatpush3.msra.mxu1 %v8978_v21  ;;  %v3212_v21 = vld [vmem:[%s8542_s16 + $0x178] sm:$0xff] }
 0x5d5   :  { %4702 = vmatprep.subr.mxu0 %v8975_v13  ;;  %4758 = vmatprep.subr.mxu1 %v8975_v13 }
 0x5d6   :  { %4703 = vmatpush3.msra.mxu0 %v8975_v13  ;;  %4759 = vmatpush3.msra.mxu1 %v8975_v13  ;;  %v3186_v13 = vld [vmem:[%s8542_s16 + $0xa8] sm:$0xff] }
 0x5d7   :  { %4704 = vmatprep.subr.mxu0 %v8972_v22  ;;  %4760 = vmatprep.subr.mxu1 %v8972_v22 }
 0x5d8   :  { %4705 = vmatpush3.msra.mxu0 %v8972_v22  ;;  %4761 = vmatpush3.msra.mxu1 %v8972_v22  ;;  %v9038_v22 = vld [vmem:[#allocation2_spill] sm:$0xff] }
 0x5d9   :  { %4706 = vmatprep.subr.mxu0 %v8969_v49  ;;  %4762 = vmatprep.subr.mxu1 %v8969_v49  ;;  %vm9044_vm1 = vcmp.eq.s32.totalorder %v9038_v22, %v9043_v50  ;;  %vm9063_vm12 = vcmp.eq.s32.totalorder %v9038_v22, %v9062_v9  ;;  %vm9067_vm6 = vcmp.eq.s32.totalorder %v9038_v22, %v9066_v31  ;;  %v3168_v50 = vld [vmem:[%s8542_s16 + $0x18] sm:$0xff] }
 0x5da   :  { %4707 = vmatpush3.msra.mxu0 %v8969_v49  ;;  %4763 = vmatpush3.msra.mxu1 %v8969_v49  ;;  %vm9069_vm8 = vcmp.eq.s32.totalorder %v9038_v22, %v9068_v5  ;;  %vm9071_vm9 = vcmp.eq.s32.totalorder %v9038_v22, %v9070_v11  ;;  %v3202_v49 = vld [vmem:[%s8542_s16 + $0x128] sm:$0xff]  ;;  %v9100_v9 = vld [vmem:[#allocation130_spill] sm:$0xff]  ;;  %v3540_v5 = vld [vmem:[%s8544_s18 + $0x70] sm:$0xff] }
 0x5db   :  { %4708 = vmatprep.subr.mxu0 %v8966_v62  ;;  %4764 = vmatprep.subr.mxu1 %v8966_v62  ;;  %v3541_v31 = vld [vmem:[%s8544_s18 + $0x78] sm:$0xff]  ;;  %v3536_v11 = vld [vmem:[%s8544_s18 + $0x50] sm:$0xff] }
 0x5dc   :  { %4709 = vmatpush3.msra.mxu0 %v8966_v62  ;;  %4765 = vmatpush3.msra.mxu1 %v8966_v62  ;;  %v3196_v62 = vld [vmem:[%s8542_s16 + $0xf8] sm:$0xff] }
 0x5dd   :  { %4710 = vmatprep.subr.mxu0 %v7847_v0  ;;  %4766 = vmatprep.subr.mxu1 %v7847_v0 }
 0x5de   :  { %4711 = vmatpush3.msra.mxu0 %v7847_v0  ;;  %4767 = vmatpush3.msra.mxu1 %v7847_v0  ;;  %v3169_v0 = vld [vmem:[%s8542_s16 + $0x20] sm:$0xff] }
 0x5df   :  { %4713 = vmatmul.mubr.msk.f32.vlgmr.msra.gmra.mxu0 %vm868_vm3, %v5684_v60  ;;  %4769 = vmatmul.mubr.msk.f32.vlgmr.msra.gmra.mxu1 %vm980_vm14, %v5684_v60  ;;  %vm9047_vm3 = vcmp.eq.s32.totalorder %v9038_v22, %v9046_v42  ;;  %vm9065_vm14 = vcmp.eq.s32.totalorder %v9038_v22, %v9064_v34  ;;  %v3182_v42 = vld [vmem:[%s8542_s16 + $0x88] sm:$0xff]  ;;  %v9101_v34 = vld [vmem:[#allocation131_spill] sm:$0xff] }
 0x5e0   :  { %4771 = vmatprep.mubr.msk.f32.mxu1 %vm9044_vm1, %v5684_v60  ;;  %4715 = vmatprep.mubr.msk.f32.mxu0 %vm869_vm0, %v5684_v60  ;;  %vm9050_vm0 = vcmp.eq.s32.totalorder %v9038_v22, %v9049_v23  ;;  %vm9073_vm1 = vcmp.eq.s32.totalorder %v9038_v22, %v9072_v44  ;;  %v3181_v23 = vld [vmem:[%s8542_s16 + $0x80] sm:$0xff]  ;;  %v3535_v44 = vld [vmem:[%s8544_s18 + $0x48] sm:$0xff] }
 0x5e1   :  { %4200 = vmatprep.subr.mxu0 %v3196_v62  ;;  %4792 = vmatprep.subr.mxu1 %v3212_v21  ;;  %v3170_v62 = vld [vmem:[%s8542_s16 + $0x28] sm:$0xff] }
 0x5e2   :  { %4201 = vmatpush3.msra.mxu0 %v3180_v6  ;;  %4793 = vmatpush3.msra.mxu1 %v3212_v21  ;;  %v3185_v21 = vld [vmem:[%s8542_s16 + $0xa0] sm:$0xff]  ;;  %v3184_v6 = vld [vmem:[%s8542_s16 + $0x98] sm:$0xff] }
 0x5e3   :  { %4772 = vmatmul.mubr.msk.f32.gmra.mxu1 %vm9047_vm3, %v5684_v60  ;;  %4716 = vmatmul.mubr.msk.f32.gmra.mxu0 %vm870_vm2, %v5684_v60  ;;  %vm9053_vm2 = vcmp.eq.s32.totalorder %v9038_v22, %v9052_v57  ;;  %vm9075_vm3 = vcmp.eq.s32.totalorder %v9038_v22, %v9074_v56  ;;  %v3197_v57 = vld [vmem:[%s8542_s16 + $0x100] sm:$0xff] }
 0x5e4   :  { %4774 = vmatprep.mubr.msk.f32.mxu1 %vm9050_vm0, %v5684_v60  ;;  %4718 = vmatprep.mubr.msk.f32.mxu0 %vm871_vm5, %v5684_v60  ;;  %vm9056_vm5 = vcmp.eq.s32.totalorder %v9038_v22, %v9055_v47  ;;  %vm9077_vm0 = vcmp.eq.s32.totalorder %v9038_v22, %v9076_v33  ;;  %v9093_v47 = vld [vmem:[#allocation123_spill] sm:$0xff] }
 0x5e5   :  { %4202 = vmatprep.subr.mxu0 %v3195_v48  ;;  %4794 = vmatprep.subr.mxu1 %v3211_v46  ;;  %v3167_v48 = vld [vmem:[%s8542_s16 + $0x10] sm:$0xff] }
 0x5e6   :  { %4203 = vmatpush3.msra.mxu0 %v3179_v3  ;;  %4795 = vmatpush3.msra.mxu1 %v3211_v46  ;;  %v9090_v46 = vld [vmem:[#allocation120_spill] sm:$0xff] }
 0x5e7   :  { %4775 = vmatmul.mubr.msk.f32.gmra.mxu1 %vm9053_vm2, %v5684_v60  ;;  %4719 = vmatmul.mubr.msk.f32.gmra.mxu0 %vm872_vm4, %v5684_v60  ;;  %vm9059_vm4 = vcmp.eq.s32.totalorder %v9038_v22, %v9058_v12  ;;  %vm9080_vm2 = vcmp.eq.s32.totalorder %v9038_v22, %v9079_v30  ;;  %v3166_v3 = vld [vmem:[%s8542_s16 + $0x8] sm:$0xff]  ;;  %v9097_v12 = vld [vmem:[#allocation127_spill] sm:$0xff] }
 0x5e8   :  { %4777 = vmatprep.mubr.msk.f32.mxu1 %vm9056_vm5, %v5684_v60  ;;  %4721 = vmatprep.mubr.msk.f32.mxu0 %vm873_vm7, %v5684_v60  ;;  %vm9061_vm7 = vcmp.eq.s32.totalorder %v9038_v22, %v9060_v15  ;;  %vm9086_vm5 = vcmp.eq.s32.totalorder %v9038_v22, %v9085_v29  ;;  %v9098_v15 = vld [vmem:[#allocation128_spill] sm:$0xff] }
 0x5e9   :  { %4204 = vmatprep.subr.mxu0 %v3194_v1  ;;  %4796 = vmatprep.subr.mxu1 %v3210_v38  ;;  %v3165_v1 = vld [vmem:[%s8542_s16] sm:$0xff] }
 0x5ea   :  { %4205 = vmatpush3.msra.mxu0 %v3178_v18  ;;  %4797 = vmatpush3.msra.mxu1 %v3210_v38  ;;  %v3198_v38 = vld [vmem:[%s8542_s16 + $0x108] sm:$0xff]  ;;  %v9092_v18 = vld [vmem:[#allocation122_spill] sm:$0xff] }
 0x5eb   :  { %4778 = vmatmul.mubr.msk.f32.gmra.mxu1 %vm9059_vm4, %v5684_v60  ;;  %4722 = vmatmul.mubr.msk.f32.gmra.mxu0 %vm9061_vm7, %v5684_v60 }
 0x5ec   :  { %4780 = vmatprep.mubr.msk.f32.mxu1 %vm9063_vm12, %v5684_v60  ;;  %4724 = vmatprep.mubr.msk.f32.mxu0 %vm9065_vm14, %v5684_v60 }
 0x5ed   :  { %4206 = vmatprep.subr.mxu0 %v3193_v59  ;;  %4798 = vmatprep.subr.mxu1 %v3209_v58  ;;  %v9095_v59 = vld [vmem:[#allocation125_spill] sm:$0xff] }
 0x5ee   :  { %4207 = vmatpush3.msra.mxu0 %v3177_v52  ;;  %4799 = vmatpush3.msra.mxu1 %v3209_v58  ;;  %v9096_v58 = vld [vmem:[#allocation126_spill] sm:$0xff]  ;;  %v9099_v52 = vld [vmem:[#allocation129_spill] sm:$0xff] }
 0x5ef   :  { %4781 = vmatmul.mubr.msk.f32.gmra.mxu1 %vm9067_vm6, %v5684_v60  ;;  %4725 = vmatmul.mubr.msk.f32.gmra.mxu0 %vm9069_vm8, %v5684_v60 }
 0x5f0   :  { %4783 = vmatprep.mubr.msk.f32.mxu1 %vm9071_vm9, %v5684_v60  ;;  %4727 = vmatprep.mubr.msk.f32.mxu0 %vm9073_vm1, %v5684_v60 }
 0x5f1   :  { %4208 = vmatprep.subr.mxu0 %v3192_v39  ;;  %4800 = vmatprep.subr.mxu1 %v3208_v20  ;;  %v9102_v39 = vld [vmem:[#allocation132_spill] sm:$0xff] }
 0x5f2   :  { %4209 = vmatpush3.msra.mxu0 %v3176_v25  ;;  %4801 = vmatpush3.msra.mxu1 %v3208_v20  ;;  %v9103_v20 = vld [vmem:[#allocation133_spill] sm:$0xff]  ;;  %v3539_v25 = vld [vmem:[%s8544_s18 + $0x68] sm:$0xff] }
 0x5f3   :  { %4784 = vmatmul.mubr.msk.f32.gmra.mxu1 %vm9075_vm3, %v5684_v60  ;;  %4728 = vmatmul.mubr.msk.f32.gmra.mxu0 %vm9077_vm0, %v5684_v60 }
 0x5f4   :  { %4786 = vmatprep.mubr.msk.f32.mxu1 %vm991_vm13, %v5684_v60  ;;  %4730 = vmatprep.mubr.msk.f32.mxu0 %vm9080_vm2, %v5684_v60  ;;  %vm9083_vm13 = vcmp.eq.s32.totalorder %v9038_v22, %v9082_v54 }
 0x5f5   :  { %4210 = vmatprep.subr.mxu0 %v3191_v63  ;;  %4802 = vmatprep.subr.mxu1 %v3207_v10  ;;  %v3534_v63 = vld [vmem:[%s8544_s18 + $0x40] sm:$0xff] }
 0x5f6   :  { %4211 = vmatpush3.msra.mxu0 %v3175_v8  ;;  %4803 = vmatpush3.msra.mxu1 %v3207_v10  ;;  %v3533_v10 = vld [vmem:[%s8544_s18 + $0x38] sm:$0xff] }
 0x5f7   :  { %4787 = vmatmul.mubr.msk.f32.gmra.mxu1 %vm992_vm15, %v5684_v60  ;;  %4731 = vmatmul.mubr.msk.f32.gmra.mxu0 %vm9083_vm13, %v5684_v60 }
 0x5f8   :  { %4789 = vmatprep.mubr.msk.f32.mxu1 %vm993_vm10, %v5684_v60  ;;  %4733 = vmatprep.mubr.msk.f32.mxu0 %vm9086_vm5, %v5684_v60  ;;  %vm9089_vm10 = vcmp.eq.s32.totalorder %v9038_v22, %v9088_v51  ;;  %v3171_v22 = vld [vmem:[%s8542_s16 + $0x30] sm:$0xff] }
 0x5f9   :  { %4212 = vmatprep.subr.mxu0 %v3190_v27  ;;  %4804 = vmatprep.subr.mxu1 %v3206_v32 }
 0x5fa   :  { %4213 = vmatpush3.msra.mxu0 %v3174_v2  ;;  %4805 = vmatpush3.msra.mxu1 %v3206_v32 }
 0x5fb   :  { %4790 = vmatmul.mubr.msk.f32.gmra.mxu1 %vm994_vm11, %v5684_v60  ;;  %4734 = vmatmul.mubr.msk.f32.gmra.mxu0 %vm9089_vm10, %v5684_v60  ;;  %v3203_v60 = vld [vmem:[%s8542_s16 + $0x130] sm:$0xff] }
 0x5fc   :  { %4214 = vmatprep.subr.mxu0 %v3189_v14  ;;  %4806 = vmatprep.subr.mxu1 %v3205_v19 }
 0x5fd   :  { %4215 = vmatpush3.msra.mxu0 %v3173_v41  ;;  %4807 = vmatpush3.msra.mxu1 %v3205_v19 }
 0x5fe   :  { %4216 = vmatprep.subr.mxu0 %v3188_v26  ;;  %4808 = vmatprep.subr.mxu1 %v3204_v28 }
 0x5ff   :  { %4217 = vmatpush3.msra.mxu0 %v3172_v35  ;;  %4809 = vmatpush3.msra.mxu1 %v3204_v28 }
 0x600   :  { %4218 = vmatprep.subr.mxu0 %v3187_v45  ;;  %4810 = vmatprep.subr.mxu1 %v3203_v60 }
 0x601   :  { %4219 = vmatpush3.msra.mxu0 %v3171_v22  ;;  %4811 = vmatpush3.msra.mxu1 %v3203_v60 }
 0x602   :  { %4220 = vmatprep.subr.mxu0 %v3186_v13  ;;  %4812 = vmatprep.subr.mxu1 %v3202_v49 }
 0x603   :  { %4221 = vmatpush3.msra.mxu0 %v3170_v62  ;;  %4813 = vmatpush3.msra.mxu1 %v3202_v49 }
 0x604   :  { %4222 = vmatprep.subr.mxu0 %v3185_v21  ;;  %4814 = vmatprep.subr.mxu1 %v3201_v61 }
 0x605   :  { %4223 = vmatpush3.msra.mxu0 %v3169_v0  ;;  %4815 = vmatpush3.msra.mxu1 %v3201_v61 }
 0x606   :  { %4224 = vmatprep.subr.mxu0 %v3184_v6  ;;  %4824 = vmatprep.mubr.f32.mxu1 %v9090_v46  ;;  %v3531_v46 = vld [vmem:[%s8544_s18 + $0x28] sm:$0xff] }
 0x607   :  { %4225 = vmatpush3.msra.mxu0 %v3168_v50  ;;  %4816 = vmatprep.subr.mxu1 %v3200_v37 }
 0x608   :  { %4226 = vmatprep.subr.mxu0 %v3183_v16  ;;  %4817 = vmatpush3.msra.mxu1 %v3200_v37  ;;  %v3529_v37 = vld [vmem:[%s8544_s18 + $0x18] sm:$0xff] }
 0x609   :  { %4227 = vmatpush3.msra.mxu0 %v3167_v48  ;;  %4818 = vmatprep.subr.mxu1 %v3199_v7  ;;  %v3532_v48 = vld [vmem:[%s8544_s18 + $0x30] sm:$0xff] }
 0x60a   :  { %4228 = vmatprep.subr.mxu0 %v3182_v42  ;;  %4819 = vmatpush3.msra.mxu1 %v3199_v7  ;;  %v3530_v42 = vld [vmem:[%s8544_s18 + $0x20] sm:$0xff] }
 0x60b   :  { %4229 = vmatpush3.msra.mxu0 %v3166_v3  ;;  %4820 = vmatprep.subr.mxu1 %v3198_v38  ;;  %v3528_v3 = vld [vmem:[%s8544_s18 + $0x10] sm:$0xff]  ;;  %v3526_v7 = vld [vmem:[%s8544_s18] sm:$0xff] }
 0x60c   :  { %4230 = vmatprep.subr.mxu0 %v3181_v23  ;;  %4821 = vmatpush3.msra.mxu1 %v3198_v38  ;;  %v3527_v23 = vld [vmem:[%s8544_s18 + $0x8] sm:$0xff] }
 0x60d   :  { %4231 = vmatpush3.msra.mxu0 %v3165_v1  ;;  %4822 = vmatprep.subr.mxu1 %v3197_v57 }
 0x60e   :  { %4823 = vmatpush3.msra.mxu1 %v3197_v57 }
 0x60f   :  { %4825 = vmatmul.mubr.f32.vlgmr.msra.gmra.mxu1 %v9091_v17  ;;  %4848 = vmatprep.subr.mxu1 %v3541_v31  ;;  %v8468_v17 = vld [vmem:[%s8543_s17] ss:$0 sm:$0xff] }
 0x610   :  { %4827 = vmatprep.mubr.f32.mxu1 %v9092_v18  ;;  %4849 = vmatpush3.msra.mxu1 %v3541_v31 }
 0x611   :  { %4850 = vmatprep.subr.mxu1 %v3540_v5 }
 0x612   :  { %4851 = vmatpush3.msra.mxu1 %v3540_v5 }
 0x613   :  { %4828 = vmatmul.mubr.f32.gmra.mxu1 %v9093_v47  ;;  %4852 = vmatprep.subr.mxu1 %v3539_v25 }
 0x614   :  { %4830 = vmatprep.mubr.f32.mxu1 %v9094_v55  ;;  %4853 = vmatpush3.msra.mxu1 %v3539_v25 }
 0x617   :  { %4831 = vmatmul.mubr.f32.gmra.mxu1 %v9095_v59 }
 0x618   :  { %4833 = vmatprep.mubr.f32.mxu1 %v9096_v58 }
 0x61b   :  { %4834 = vmatmul.mubr.f32.gmra.mxu1 %v9097_v12 }
 0x61c   :  { %4836 = vmatprep.mubr.f32.mxu1 %v9098_v15 }
 0x61f   :  { %4837 = vmatmul.mubr.f32.gmra.mxu1 %v9099_v52 }
 0x620   :  { %4839 = vmatprep.mubr.f32.mxu1 %v9100_v9 }
 0x623   :  { %4840 = vmatmul.mubr.f32.gmra.mxu1 %v9101_v34 }
 0x624   :  { %4842 = vmatprep.mubr.f32.mxu1 %v9102_v39 }
 0x627   :  { %4843 = vmatmul.mubr.f32.gmra.mxu1 %v9103_v20 }
 0x628   :  { %4845 = vmatprep.mubr.f32.mxu1 %v8944_v24  ;;  %v3538_v24 = vld [vmem:[%s8544_s18 + $0x60] sm:$0xff] }
 0x629   :  { %4854 = vmatprep.subr.mxu1 %v3538_v24 }
 0x62a   :  { %4855 = vmatpush3.msra.mxu1 %v3538_v24 }
 0x62b   :  { %4846 = vmatmul.mubr.f32.gmra.mxu1 %v8946_v36  ;;  %v3537_v36 = vld [vmem:[%s8544_s18 + $0x58] sm:$0xff] }
 0x62c   :  { %4856 = vmatprep.subr.mxu1 %v3537_v36 }
 0x62d   :  { %4857 = vmatpush3.msra.mxu1 %v3537_v36 }
 0x62e   :  { %4858 = vmatprep.subr.mxu1 %v3536_v11 }
 0x62f   :  { %4859 = vmatpush3.msra.mxu1 %v3536_v11 }
 0x630   :  { %4860 = vmatprep.subr.mxu1 %v3535_v44 }
 0x631   :  { %4861 = vmatpush3.msra.mxu1 %v3535_v44 }
 0x632   :  { %4862 = vmatprep.subr.mxu1 %v3534_v63 }
 0x633   :  { %4863 = vmatpush3.msra.mxu1 %v3534_v63 }
 0x634   :  { %4864 = vmatprep.subr.mxu1 %v3533_v10 }
 0x635   :  { %4865 = vmatpush3.msra.mxu1 %v3533_v10 }
 0x636   :  { %4866 = vmatprep.subr.mxu1 %v3532_v48 }
 0x637   :  { %4867 = vmatpush3.msra.mxu1 %v3532_v48 }
 0x638   :  { %4868 = vmatprep.subr.mxu1 %v3531_v46 }
 0x639   :  { %4869 = vmatpush3.msra.mxu1 %v3531_v46 }
 0x63a   :  { %4870 = vmatprep.subr.mxu1 %v3530_v42 }
 0x63b   :  { %4871 = vmatpush3.msra.mxu1 %v3530_v42 }
 0x63c   :  { %4872 = vmatprep.subr.mxu1 %v3529_v37 }
 0x63d   :  { %4873 = vmatpush3.msra.mxu1 %v3529_v37 }
 0x63e   :  { %4874 = vmatprep.subr.mxu1 %v3528_v3 }
 0x63f   :  { %4875 = vmatpush3.msra.mxu1 %v3528_v3 }
 0x640   :  { %4876 = vmatprep.subr.mxu1 %v3527_v23 }
 0x641   :  { %4877 = vmatpush3.msra.mxu1 %v3527_v23 }
 0x642   :  { %4878 = vmatprep.subr.mxu1 %v3526_v7 }
 0x643   :  { %4879 = vmatpush3.msra.mxu1 %v3526_v7 }
 0x69f   :  { %v4714_v56 = vpop.f32.mrf.mxu0  ;;  %v4770_v33 = vpop.f32.mrf.mxu1 }
 0x6a1   :  { %v2941_v8 = vpop.f32.mrf.mxu0  ;;  %v3086_v4 = vpop.f32.mrf.mxu1 }
 0x6a2   :  { %3284 = vmatprep.mubr.f32.mxu0 %v3086_v4 }
 0x6a3   :  { %3285 = vmatmul.mubr.f32.vlgmr.msra.gmra.mxu0 %v2941_v8  ;;  %v4773_v30 = vpop.f32.mrf.mxu1  ;;  %v4717_v32 = vpop.f32.mrf.mxu0 }
 0x6a4   :  { %3289 = vmatprep.mubr.f32.mxu0 %v4770_v33 }
 0x6a5   :  { %v3096_v27 = vpop.f32.mrf.mxu1  ;;  %v2951_v54 = vpop.f32.mrf.mxu0 }
 0x6a7   :  { %3290 = vmatmul.mubr.f32.gmra.mxu0 %v4714_v56  ;;  %v4776_v40 = vpop.f32.mrf.mxu1  ;;  %v4720_v43 = vpop.f32.mrf.mxu0 }
 0x6a8   :  { %3294 = vmatprep.mubr.f32.mxu0 %v3096_v27 }
 0x6a9   :  { %v3106_v2 = vpop.f32.mrf.mxu1  ;;  %v2961_v14 = vpop.f32.mrf.mxu0 }
 0x6ab   :  { %3295 = vmatmul.mubr.f32.gmra.mxu0 %v2951_v54  ;;  %v4779_v29 = vpop.f32.mrf.mxu1  ;;  %v4723_v41 = vpop.f32.mrf.mxu0 }
 0x6ac   :  { %3299 = vmatprep.mubr.f32.mxu0 %v4773_v30 }
 0x6ad   :  { %v3116_v19 = vpop.f32.mrf.mxu1  ;;  %v2971_v51 = vpop.f32.mrf.mxu0 }
 0x6af   :  { %3300 = vmatmul.mubr.f32.gmra.mxu0 %v4717_v32  ;;  %v4782_v53 = vpop.f32.mrf.mxu1  ;;  %v4726_v28 = vpop.f32.mrf.mxu0 }
 0x6b0   :  { %3304 = vmatprep.mubr.f32.mxu0 %v3106_v2 }
 0x6b1   :  { %v3126_v26 = vpop.f32.mrf.mxu1  ;;  %v2981_v45 = vpop.f32.mrf.mxu0 }
 0x6b3   :  { %3305 = vmatmul.mubr.f32.gmra.mxu0 %v2961_v14  ;;  %v4785_v35 = vpop.f32.mrf.mxu1  ;;  %v4729_v22 = vpop.f32.mrf.mxu0 }
 0x6b4   :  { %3309 = vmatprep.mubr.f32.mxu0 %v4776_v40 }
 0x6b5   :  { %v3136_v60 = vpop.f32.mrf.mxu1  ;;  %v2991_v49 = vpop.f32.mrf.mxu0 }
 0x6b7   :  { %3310 = vmatmul.mubr.f32.gmra.mxu0 %v4720_v43  ;;  %v4788_v13 = vpop.f32.mrf.mxu1  ;;  %v4732_v21 = vpop.f32.mrf.mxu0 }
 0x6b8   :  { %3314 = vmatprep.mubr.f32.mxu0 %v3116_v19 }
 0x6b9   :  { %v3146_v62 = vpop.f32.mrf.mxu1  ;;  %v3001_v0 = vpop.f32.mrf.mxu0 }
 0x6bb   :  { %3315 = vmatmul.mubr.f32.gmra.mxu0 %v2971_v51  ;;  %v4791_v61 = vpop.f32.mrf.mxu1  ;;  %v4735_v50 = vpop.f32.mrf.mxu0 }
 0x6bc   :  { %3319 = vmatprep.mubr.f32.mxu0 %v4779_v29 }
 0x6bd   :  { %v3156_v6 = vpop.f32.mrf.mxu1  ;;  %v3011_v16 = vpop.f32.mrf.mxu0 }
 0x6bf   :  { %3320 = vmatmul.mubr.f32.gmra.mxu0 %v4723_v41 }
 0x6c0   :  { %3324 = vmatprep.mubr.f32.mxu0 %v3126_v26 }
 0x6c3   :  { %3325 = vmatmul.mubr.f32.gmra.mxu0 %v2981_v45 }
 0x6c4   :  { %3329 = vmatprep.mubr.f32.mxu0 %v4782_v53 }
 0x6c7   :  { %3330 = vmatmul.mubr.f32.gmra.mxu0 %v4726_v28 }
 0x6c8   :  { %3334 = vmatprep.mubr.f32.mxu0 %v3136_v60 }
 0x6cb   :  { %3335 = vmatmul.mubr.f32.gmra.mxu0 %v2991_v49 }
 0x6cc   :  { %3339 = vmatprep.mubr.f32.mxu0 %v4785_v35 }
 0x6cf   :  { %3340 = vmatmul.mubr.f32.gmra.mxu0 %v4729_v22  ;;  %v4826_v38 = vpop.f32.mrf.mxu1 }
 0x6d0   :  { %3344 = vmatprep.mubr.f32.mxu0 %v3146_v62 }
 0x6d1   :  { %v3431_v55 = vpop.f32.mrf.mxu1 }
 0x6d3   :  { %3345 = vmatmul.mubr.f32.gmra.mxu0 %v3001_v0  ;;  %v4829_v9 = vpop.f32.mrf.mxu1 }
 0x6d4   :  { %3349 = vmatprep.mubr.f32.mxu0 %v4788_v13 }
 0x6d5   :  { %v3441_v24 = vpop.f32.mrf.mxu1 }
 0x6d7   :  { %3350 = vmatmul.mubr.f32.gmra.mxu0 %v4732_v21  ;;  %v4832_v33 = vpop.f32.mrf.mxu1 }
 0x6d8   :  { %3354 = vmatprep.mubr.f32.mxu0 %v3156_v6 }
 0x6d9   :  { %v3451_v54 = vpop.f32.mrf.mxu1 }
 0x6db   :  { %3355 = vmatmul.mubr.f32.gmra.mxu0 %v3011_v16  ;;  %v4835_v53 = vpop.f32.mrf.mxu1 }
 0x6dc   :  { %3359 = vmatprep.mubr.f32.mxu0 %v4791_v61 }
 0x6dd   :  { %v3461_v22 = vpop.f32.mrf.mxu1 }
 0x6df   :  { %3360 = vmatmul.mubr.f32.gmra.mxu0 %v4735_v50  ;;  %v4838_v6 = vpop.f32.mrf.mxu1 }
 0x6e1   :  { %v3471_v3 = vpop.f32.mrf.mxu1 }
 0x763   :  { %v4232_v1 = vpop.f32.mrf.mxu0 }
 0x765   :  { %v4233_v57 = vpop.f32.mrf.mxu0 }
 0x766   :  { %v4234_v18 = vadd.f32 %v4233_v57, %v4232_v1 }
 0x767   :  { %v4235_v47 = vpop.f32.mrf.mxu0 }
 0x768   :  { %v3287_v59 = vadd.f32 %v4234_v18, %v8468_v17 }
 0x769   :  { %v4236_v58 = vpop.f32.mrf.mxu0 }
 0x76a   :  { %v4237_v12 = vadd.f32 %v4236_v58, %v4235_v47  ;;  %v3432_v15 = vadd.f32 %v3431_v55, %v3287_v59  ;;  %v4841_v47 = vpop.f32.mrf.mxu1 }
 0x76b   :  { %v4238_v52 = vpop.f32.mrf.mxu0 }
 0x76c   :  { %v3292_v34 = vadd.f32 %v4237_v12, %v8468_v17  ;;  %v3510_v39 = vmax.f32 %v3432_v15, 0.0 }
 0x76d   :  { %v4239_v20 = vpop.f32.mrf.mxu0 }
 0x76e   :  { %v3437_v31 = vadd.f32 %v4826_v38, %v3292_v34  ;;  %v4240_v5 = vadd.f32 %v4239_v20, %v4238_v52  ;;  %4880 = vmatprep.mubr.f32.mxu1 %v3510_v39 }
 0x76f   :  { %v4241_v25 = vpop.f32.mrf.mxu0 }
 0x770   :  { %v3511_v36 = vmax.f32 %v3437_v31, 0.0  ;;  %v3297_v11 = vadd.f32 %v4240_v5, %v8468_v17 }
 0x771   :  { %v4242_v44 = vpop.f32.mrf.mxu0 }
 0x772   :  { %v4243_v63 = vadd.f32 %v4242_v44, %v4241_v25  ;;  %v3442_v10 = vadd.f32 %v3441_v24, %v3297_v11  ;;  %4881 = vmatmul.mubr.f32.vlgmr.msra.gmra.mxu1 %v3511_v36 }
 0x773   :  { %v4244_v56 = vpop.f32.mrf.mxu0 }
 0x774   :  { %v3302_v8 = vadd.f32 %v4243_v63, %v8468_v17  ;;  %v3512_v4 = vmax.f32 %v3442_v10, 0.0 }
 0x775   :  { %v4245_v30 = vpop.f32.mrf.mxu0 }
 0x776   :  { %v4246_v27 = vadd.f32 %v4245_v30, %v4244_v56  ;;  %4883 = vmatprep.mubr.f32.mxu1 %v3512_v4  ;;  %v3447_v32 = vadd.f32 %v4829_v9, %v3302_v8  ;;  %v3481_v9 = vpop.f32.mrf.mxu1 }
 0x777   :  { %v4247_v40 = vpop.f32.mrf.mxu0 }
 0x778   :  { %v3307_v2 = vadd.f32 %v4246_v27, %v8468_v17  ;;  %v3513_v43 = vmax.f32 %v3447_v32, 0.0  ;;  %v4844_v24 = vpop.f32.mrf.mxu1 }
 0x779   :  { %v4248_v29 = vpop.f32.mrf.mxu0 }
 0x77a   :  { %v4249_v14 = vadd.f32 %v4248_v29, %v4247_v40  ;;  %v3452_v19 = vadd.f32 %v3451_v54, %v3307_v2  ;;  %4884 = vmatmul.mubr.f32.gmra.mxu1 %v3513_v43 }
 0x77b   :  { %v4250_v41 = vpop.f32.mrf.mxu0 }
 0x77c   :  { %v3312_v51 = vadd.f32 %v4249_v14, %v8468_v17  ;;  %v3514_v26 = vmax.f32 %v3452_v19, 0.0 }
 0x77d   :  { %v4251_v28 = vpop.f32.mrf.mxu0 }
 0x77e   :  { %v4252_v35 = vadd.f32 %v4251_v28, %v4250_v41  ;;  %4886 = vmatprep.mubr.f32.mxu1 %v3514_v26  ;;  %v3457_v45 = vadd.f32 %v4832_v33, %v3312_v51  ;;  %v3491_v33 = vpop.f32.mrf.mxu1 }
 0x77f   :  { %v4253_v60 = vpop.f32.mrf.mxu0 }
 0x780   :  { %v3317_v13 = vadd.f32 %v4252_v35, %v8468_v17  ;;  %v3515_v49 = vmax.f32 %v3457_v45, 0.0  ;;  %v4847_v54 = vpop.f32.mrf.mxu1 }
 0x781   :  { %v4254_v62 = vpop.f32.mrf.mxu0 }
 0x782   :  { %v4255_v21 = vadd.f32 %v4254_v62, %v4253_v60  ;;  %v3462_v61 = vadd.f32 %v3461_v22, %v3317_v13  ;;  %4887 = vmatmul.mubr.f32.gmra.mxu1 %v3515_v49  ;;  %v3942_v62 = vld [vmem:[%s8545_s19] ss:$0 sm:$0xff] }
 0x783   :  { %v4256_v0 = vpop.f32.mrf.mxu0 }
 0x784   :  { %v3322_v50 = vadd.f32 %v4255_v21, %v8468_v17  ;;  %v3516_v16 = vmax.f32 %v3462_v61, 0.0 }
 0x785   :  { %v4257_v48 = vpop.f32.mrf.mxu0 }
 0x786   :  { %v4258_v46 = vadd.f32 %v4257_v48, %v4256_v0  ;;  %4889 = vmatprep.mubr.f32.mxu1 %v3516_v16  ;;  %v3467_v42 = vadd.f32 %v4835_v53, %v3322_v50  ;;  %v3501_v53 = vpop.f32.mrf.mxu1 }
 0x787   :  { %v4259_v37 = vpop.f32.mrf.mxu0 }
 0x788   :  { %v3327_v23 = vadd.f32 %v4258_v46, %v8468_v17  ;;  %v3517_v7 = vmax.f32 %v3467_v42, 0.0 }
 0x789   :  { %v4260_v1 = vpop.f32.mrf.mxu0 }
 0x78a   :  { %v4261_v38 = vadd.f32 %v4260_v1, %v4259_v37  ;;  %v3472_v57 = vadd.f32 %v3471_v3, %v3327_v23  ;;  %4890 = vmatmul.mubr.f32.gmra.mxu1 %v3517_v7 }
 0x78b   :  { %v4262_v18 = vpop.f32.mrf.mxu0 }
 0x78c   :  { %v3332_v55 = vadd.f32 %v4261_v38, %v8468_v17  ;;  %v3518_v59 = vmax.f32 %v3472_v57, 0.0 }
 0x78d   :  { %v4263_v58 = vpop.f32.mrf.mxu0 }
 0x78e   :  { %v4264_v12 = vadd.f32 %v4263_v58, %v4262_v18  ;;  %4892 = vmatprep.mubr.f32.mxu1 %v3518_v59  ;;  %v3477_v15 = vadd.f32 %v4838_v6, %v3332_v55 }
 0x78f   :  { %v4265_v52 = vpop.f32.mrf.mxu0 }
 0x790   :  { %v3337_v34 = vadd.f32 %v4264_v12, %v8468_v17  ;;  %v3519_v39 = vmax.f32 %v3477_v15, 0.0 }
 0x791   :  { %v4266_v20 = vpop.f32.mrf.mxu0 }
 0x792   :  { %v4267_v31 = vadd.f32 %v4266_v20, %v4265_v52  ;;  %v3482_v5 = vadd.f32 %v3481_v9, %v3337_v34  ;;  %4893 = vmatmul.mubr.f32.gmra.mxu1 %v3519_v39 }
 0x793   :  { %v4268_v25 = vpop.f32.mrf.mxu0 }
 0x794   :  { %v3342_v36 = vadd.f32 %v4267_v31, %v8468_v17  ;;  %v3520_v11 = vmax.f32 %v3482_v5, 0.0 }
 0x795   :  { %v4269_v44 = vpop.f32.mrf.mxu0 }
 0x796   :  { %v4270_v63 = vadd.f32 %v4269_v44, %v4268_v25  ;;  %4895 = vmatprep.mubr.f32.mxu1 %v3520_v11  ;;  %v3487_v10 = vadd.f32 %v4841_v47, %v3342_v36 }
 0x797   :  { %v4271_v56 = vpop.f32.mrf.mxu0 }
 0x798   :  { %v3347_v8 = vadd.f32 %v4270_v63, %v8468_v17  ;;  %v3521_v4 = vmax.f32 %v3487_v10, 0.0 }
 0x799   :  { %v4272_v30 = vpop.f32.mrf.mxu0 }
 0x79a   :  { %v4273_v27 = vadd.f32 %v4272_v30, %v4271_v56  ;;  %v3492_v32 = vadd.f32 %v3491_v33, %v3347_v8  ;;  %4896 = vmatmul.mubr.f32.gmra.mxu1 %v3521_v4 }
 0x79b   :  { %v4274_v40 = vpop.f32.mrf.mxu0 }
 0x79c   :  { %v3352_v2 = vadd.f32 %v4273_v27, %v8468_v17  ;;  %v3522_v43 = vmax.f32 %v3492_v32, 0.0 }
 0x79d   :  { %v4275_v29 = vpop.f32.mrf.mxu0 }
 0x79e   :  { %v4276_v14 = vadd.f32 %v4275_v29, %v4274_v40  ;;  %4898 = vmatprep.mubr.f32.mxu1 %v3522_v43  ;;  %v3497_v19 = vadd.f32 %v4844_v24, %v3352_v2 }
 0x79f   :  { %v4277_v41 = vpop.f32.mrf.mxu0 }
 0x7a0   :  { %v3357_v51 = vadd.f32 %v4276_v14, %v8468_v17  ;;  %v3523_v26 = vmax.f32 %v3497_v19, 0.0 }
 0x7a1   :  { %v4278_v28 = vpop.f32.mrf.mxu0 }
 0x7a2   :  { %v4279_v35 = vadd.f32 %v4278_v28, %v4277_v41  ;;  %v3502_v45 = vadd.f32 %v3501_v53, %v3357_v51  ;;  %4899 = vmatmul.mubr.f32.gmra.mxu1 %v3523_v26 }
 0x7a4   :  { %v3362_v60 = vadd.f32 %v4279_v35, %v8468_v17  ;;  %v3524_v22 = vmax.f32 %v3502_v45, 0.0 }
 0x7a6   :  { %4901 = vmatprep.mubr.f32.mxu1 %v3524_v22  ;;  %v3507_v13 = vadd.f32 %v4847_v54, %v3362_v60 }
 0x7a8   :  { %v3525_v49 = vmax.f32 %v3507_v13, 0.0 }
 0x7aa   :  { %4902 = vmatmul.mubr.f32.gmra.mxu1 %v3525_v49 }
 0x832   :  { %v4882_v21 = vpop.f32.mrf.mxu1 }
 0x833   :  { %v3621_v61 = vadd.f32 %v4882_v21, %v3942_v62 }
 0x834   :  { %v3615_v0 = vpop.f32.mrf.mxu1 }
 0x835   :  { %3695 = vst [vmem:[%s8546_s20 + $0x8] sm:$0xff] %v3621_v61  ;;  %v3616_v6 = vadd.f32 %v3942_v62, %v3615_v0 }
 0x837   :  { %3694 = vst [vmem:[%s8546_s20] sm:$0xff] %v3616_v6 }
 0x83a   :  { %v4885_v17 = vpop.f32.mrf.mxu1 }
 0x83b   :  { %v3631_v50 = vadd.f32 %v4885_v17, %v3942_v62 }
 0x83c   :  { %v3625_v16 = vpop.f32.mrf.mxu1 }
 0x83d   :  { %3697 = vst [vmem:[%s8546_s20 + $0x18] sm:$0xff] %v3631_v50  ;;  %v3626_v48 = vadd.f32 %v3942_v62, %v3625_v16 }
 0x83f   :  { %3696 = vst [vmem:[%s8546_s20 + $0x10] sm:$0xff] %v3626_v48 }
 0x842   :  { %v4888_v46 = vpop.f32.mrf.mxu1 }
 0x843   :  { %v3641_v42 = vadd.f32 %v4888_v46, %v3942_v62 }
 0x844   :  { %v3635_v37 = vpop.f32.mrf.mxu1 }
 0x845   :  { %3699 = vst [vmem:[%s8546_s20 + $0x28] sm:$0xff] %v3641_v42  ;;  %v3636_v3 = vadd.f32 %v3942_v62, %v3635_v37 }
 0x847   :  { %3698 = vst [vmem:[%s8546_s20 + $0x20] sm:$0xff] %v3636_v3 }
 0x84a   :  { %v4891_v23 = vpop.f32.mrf.mxu1 }
 0x84b   :  { %v3651_v7 = vadd.f32 %v4891_v23, %v3942_v62 }
 0x84c   :  { %v3645_v1 = vpop.f32.mrf.mxu1 }
 0x84d   :  { %3701 = vst [vmem:[%s8546_s20 + $0x38] sm:$0xff] %v3651_v7  ;;  %v3646_v38 = vadd.f32 %v3942_v62, %v3645_v1 }
 0x84f   :  { %3700 = vst [vmem:[%s8546_s20 + $0x30] sm:$0xff] %v3646_v38 }
 0x852   :  { %v4894_v57 = vpop.f32.mrf.mxu1 }
 0x853   :  { %v3661_v18 = vadd.f32 %v4894_v57, %v3942_v62 }
 0x854   :  { %v3655_v47 = vpop.f32.mrf.mxu1 }
 0x855   :  { %3703 = vst [vmem:[%s8546_s20 + $0x48] sm:$0xff] %v3661_v18  ;;  %v3656_v55 = vadd.f32 %v3942_v62, %v3655_v47 }
 0x857   :  { %3702 = vst [vmem:[%s8546_s20 + $0x40] sm:$0xff] %v3656_v55 }
 0x85a   :  { %v4897_v59 = vpop.f32.mrf.mxu1 }
 0x85b   :  { %v3671_v58 = vadd.f32 %v4897_v59, %v3942_v62 }
 0x85c   :  { %v3665_v12 = vpop.f32.mrf.mxu1 }
 0x85d   :  { %3705 = vst [vmem:[%s8546_s20 + $0x58] sm:$0xff] %v3671_v58  ;;  %v3666_v15 = vadd.f32 %v3942_v62, %v3665_v12 }
 0x85f   :  { %3704 = vst [vmem:[%s8546_s20 + $0x50] sm:$0xff] %v3666_v15 }
 0x862   :  { %v4900_v52 = vpop.f32.mrf.mxu1 }
 0x863   :  { %v3681_v9 = vadd.f32 %v4900_v52, %v3942_v62 }
 0x864   :  { %v3675_v34 = vpop.f32.mrf.mxu1 }
 0x865   :  { %3707 = vst [vmem:[%s8546_s20 + $0x68] sm:$0xff] %v3681_v9  ;;  %v3676_v39 = vadd.f32 %v3942_v62, %v3675_v34 }
 0x867   :  { %3706 = vst [vmem:[%s8546_s20 + $0x60] sm:$0xff] %v3676_v39 }
 0x86a   :  { %v4903_v20 = vpop.f32.mrf.mxu1 }
 0x86b   :  { %v3691_v31 = vadd.f32 %v4903_v20, %v3942_v62 }
 0x86c   :  { %v3685_v5 = vpop.f32.mrf.mxu1 }
 0x86d   :  { %3709 = vst [vmem:[%s8546_s20 + $0x78] sm:$0xff] %v3691_v31  ;;  %v3686_v25 = vadd.f32 %v3942_v62, %v3685_v5 }
 0x86f   :  { %3708 = vst [vmem:[%s8546_s20 + $0x70] sm:$0xff] %v3686_v25 }

</bundles_post_ra>
